<compile_context>
chip_gen: v6e
topology: v6e:2x2x1
jax: 0.10.0
libtpu: 0.0.40
codegen_flags: <defaults>
</compile_context>

<pallas_src>
import functools

import jax
import jax.numpy as jnp
from jax.experimental import pallas as pl
from jax.experimental.pallas import tpu as pltpu

# ----------------------------- config (small) --------------------------------
BATCH = 2
IMG_C, IMG_H, IMG_W = 3, 32, 32
PATCH = 16                               # ViT-B-16 style patching
GH, GW = IMG_H // PATCH, IMG_W // PATCH  # 2 x 2 patches
NUM_PATCHES = GH * GW
NUM_TOKENS = NUM_PATCHES + 1             # +1 class token
T_PAD = ((NUM_TOKENS + 7) // 8) * 8      # pad token rows per image to sublane multiple
PATCH_DIM = IMG_C * PATCH * PATCH        # 768
WIDTH = 128                              # stands in for in_planes (=768 in real model)
PROJ = 64                                # stands in for in_planes_proj (=512)
HEADS = 4
HEAD_DIM = WIDTH // HEADS
LAYERS = 2                               # last layer separated (resblocks[:-1] / [-1])
NUM_CLASSES = 16
CAMERA_NUM = 3
VIEW_NUM = 2
SIE_COE = 1.0
LN_EPS = 1e-5
BN_EPS = 1e-5

BT = BATCH * T_PAD                       # 16 token rows across the whole batch
QROWS = HEADS * BT                       # 64 block-diagonal query rows
LANES = 128                              # lane width of the packed output slab
OUT_GROUPS = 8                           # 7 result row-groups + 1 pad (sublane dense)

_WEIGHT_ORDER = (
    "attn_bias", "qmask", "w_patch", "ln_pre_g", "ln_pre_b",
    "ln1_g", "ln1_b", "w_qkv", "b_qkv", "w_o", "b_o",
    "ln2_g", "ln2_b", "w_fc1", "b_fc1", "w_fc2", "b_fc2",
    "ln_post_g", "ln_post_b", "proj_pad",
    "bn_g", "bn_b", "bn_proj_g", "bn_proj_b", "cls_w_pad", "cls_proj_w_pad",
)


# ------------------------------ Pallas kernel ---------------------------------
def _fused_kernel(patches_ref, tok_add_ref,
                  attn_bias_ref, qmask_ref, w_patch_ref,
                  ln_pre_g_ref, ln_pre_b_ref,
                  ln1_g_ref, ln1_b_ref, w_qkv_ref, b_qkv_ref, w_o_ref, b_o_ref,
                  ln2_g_ref, ln2_b_ref, w_fc1_ref, b_fc1_ref, w_fc2_ref, b_fc2_ref,
                  ln_post_g_ref, ln_post_b_ref, proj_ref,
                  bn_g_ref, bn_b_ref, bnp_g_ref, bnp_b_ref,
                  cls_w_ref, clsp_w_ref,
                  out_ref):
    """Fully fused ViT visual encoder + BN bottlenecks + classifiers, whole batch."""
    f32 = jnp.float32
    bf16 = jnp.bfloat16

    def ln(x, g, b):
        mu = jnp.mean(x, axis=-1, keepdims=True)
        var = jnp.mean(jnp.square(x - mu), axis=-1, keepdims=True)
        return (x - mu) * jax.lax.rsqrt(var + LN_EPS) * g + b

    def bn(x, g, b):
        # training-mode BatchNorm1d over the batch (biased variance, like torch)
        mu = jnp.mean(x, axis=0, keepdims=True)
        var = jnp.mean(jnp.square(x - mu), axis=0, keepdims=True)
        return (x - mu) * jax.lax.rsqrt(var + BN_EPS) * g + b

    def mm(a, w):
        # bf16 operands on the MXU, f32 accumulation
        return jnp.dot(a.astype(bf16), w, preferred_element_type=f32)

    qmask = qmask_ref[...]           # (QROWS, WIDTH) block-diagonal head lane mask
    attn_bias = attn_bias_ref[...]   # (QROWS, BT)    0 / -1e30 additive mask
    scale = 1.0 / float(HEAD_DIM) ** 0.5

    # ---- patch embedding (== Conv2d stride=patch) + cls/pos/SIE additive -----
    # CLS slots and pad rows of `patches` are zero, so one (BT, PATCH_DIM) matmul
    # produces all real patch tokens; tok_add carries class+pos+SIE embeddings.
    h = mm(patches_ref[...], w_patch_ref[...]) + tok_add_ref[...]      # (BT, W) f32
    h = ln(h, ln_pre_g_ref[...], ln_pre_b_ref[...])                    # ln_pre

    h_penult = h
    for l in range(LAYERS):
        if l == LAYERS - 1:
            h_penult = h                      # features after resblocks[:-1]

        # ---------- multi-head self-attention (block-diagonal head packing) ---
        x_ln = ln(h, ln1_g_ref[l], ln1_b_ref[l])
        qkv = mm(x_ln, w_qkv_ref[l]) + b_qkv_ref[l]                    # (BT, 3W) f32
        q = qkv[:, 0:WIDTH]
        k = qkv[:, WIDTH:2 * WIDTH].astype(bf16)
        v = qkv[:, 2 * WIDTH:3 * WIDTH].astype(bf16)

        # replicate q over heads along sublanes; keep only head h's lanes in block h
        q_packed = (jnp.concatenate([q] * HEADS, axis=0) * qmask).astype(bf16)
        # one MXU call: (QROWS, W) x (BT, W) contracted over lanes -> per-head scores
        s = jax.lax.dot_general(q_packed, k, (((1,), (1,)), ((), ())),
                                preferred_element_type=f32) * scale     # (QROWS, BT)
        s = s + attn_bias                     # mask cross-image + padded key rows
        s = s - jnp.max(s, axis=-1, keepdims=True)
        p = jnp.exp(s)
        p = p * pl.reciprocal(jnp.sum(p, axis=-1, keepdims=True), approx=True)

        # one MXU call: (QROWS, BT) x (BT, W) -> per-head contexts on all lanes
        ctx_full = jnp.dot(p.astype(bf16), v, preferred_element_type=f32)
        ctx_full = ctx_full * qmask           # keep head h's lanes in sublane block h
        ctx = ctx_full[0:BT]
        for hd in range(1, HEADS):            # heads occupy disjoint lanes -> sum = pack
            ctx = ctx + ctx_full[hd * BT:(hd + 1) * BT]                 # (BT, W)

        h = h + mm(ctx, w_o_ref[l]) + b_o_ref[l]                        # residual

        # ---------- MLP with QuickGELU (x * sigmoid(1.702 x)) -----------------
        x_ln = ln(h, ln2_g_ref[l], ln2_b_ref[l])
        m1 = mm(x_ln, w_fc1_ref[l]) + b_fc1_ref[l]
        m1 = m1 * jax.nn.sigmoid(1.702 * m1)
        h = h + mm(m1, w_fc2_ref[l]) + b_fc2_ref[l]                     # residual

    # ---- epilogue: CLS rows, ln_post, projection, BN bottlenecks, classifiers ----
    def cls_rows(z):  # gather the CLS row of each image block -> (B, W)
        return jnp.concatenate(
            [z[b * T_PAD:b * T_PAD + 1, :] for b in range(BATCH)], axis=0)

    img_last = cls_rows(h_penult)                                       # pre-ln_post
    img_feat = ln(cls_rows(h), ln_post_g_ref[...], ln_post_b_ref[...])  # ln_post
    img_proj = mm(img_feat, proj_ref[...])          # (B, 128); lanes>=PROJ stay zero

    feat = bn(img_feat, bn_g_ref[...], bn_b_ref[...])
    feat_proj = bn(img_proj, bnp_g_ref[...], bnp_b_ref[...])            # pad lanes -> 0
    score = mm(feat, cls_w_ref[...])                # cols>=NUM_CLASSES are zero
    score_proj = mm(feat_proj, clsp_w_ref[...])

    pad = jnp.zeros((BATCH, LANES), f32)
    # single lane- and sublane-dense store of all results
    out_ref[...] = jnp.concatenate(
        [img_last, img_feat, img_proj, feat, feat_proj, score, score_proj, pad],
        axis=0)


# ------------------------------ kernel wrapper --------------------------------
def encoder_call(patches, tok_add, kp):
    weights = [kp[name] for name in _WEIGHT_ORDER]
    return pl.pallas_call(
        _fused_kernel,
        out_shape=jax.ShapeDtypeStruct((OUT_GROUPS * BATCH, LANES), jnp.float32),
        compiler_params=pltpu.CompilerParams(vmem_limit_bytes=32 * 1024 * 1024),
    )(patches, tok_add, *weights)


# --------------------------- parameter construction ---------------------------
def init_params(key):
    keys = iter(jax.random.split(key, 64))

    def nrm(shape, std=0.02):
        return (std * jax.random.normal(next(keys), shape)).astype(jnp.float32)

    def ones(shape):
        return jnp.ones(shape, jnp.float32)

    def zeros(shape):
        return jnp.zeros(shape, jnp.float32)

    p = {
        "conv1_w": nrm((WIDTH, IMG_C, PATCH, PATCH)),      # OIHW like torch Conv2d
        "class_emb": nrm((WIDTH,)),
        "pos_emb": nrm((NUM_TOKENS, WIDTH)),
        "ln_pre_g": ones((WIDTH,)), "ln_pre_b": zeros((WIDTH,)),
        "ln_post_g": ones((WIDTH,)), "ln_post_b": zeros((WIDTH,)),
        "proj": nrm((WIDTH, PROJ)),
        # SIE camera*view embedding table, trunc_normal(std=0.02) in torch
        "cv_embed": nrm((CAMERA_NUM * VIEW_NUM, WIDTH)),
        # bottleneck BatchNorm1d (kaiming init: weight=1, bias=0; bias frozen)
        "bn_g": ones((WIDTH,)), "bn_b": zeros((WIDTH,)),
        "bn_proj_g": ones((PROJ,)), "bn_proj_b": zeros((PROJ,)),
        # classifiers: Linear(..., bias=False), normal(std=0.001)
        "cls_w": nrm((WIDTH, NUM_CLASSES), std=0.001),
        "cls_proj_w": nrm((PROJ, NUM_CLASSES), std=0.001),
        "blocks": [],
    }
    for _ in range(LAYERS):
        p["blocks"].append({
            "ln1_g": ones((WIDTH,)), "ln1_b": zeros((WIDTH,)),
            "w_qkv": nrm((WIDTH, 3 * WIDTH)), "b_qkv": zeros((3 * WIDTH,)),
            "w_o": nrm((WIDTH, WIDTH)), "b_o": zeros((WIDTH,)),
            "ln2_g": ones((WIDTH,)), "ln2_b": zeros((WIDTH,)),
            "w_fc1": nrm((WIDTH, 4 * WIDTH)), "b_fc1": zeros((4 * WIDTH,)),
            "w_fc2": nrm((4 * WIDTH, WIDTH)), "b_fc2": zeros((WIDTH,)),
        })
    return p


def prepare_kernel_params(p):
    """One-time repack: stack per-block params, broadcast biases to (1, N), prebuild
    the cls/pos token bias, the block-diagonal head lane mask, the attention bias
    (cross-image + padded keys), and zero-pad narrow weights to 128 lanes; cast
    matmul weights to bf16 (f32 accumulation happens in-kernel)."""
    bf16 = jnp.bfloat16
    blocks = p["blocks"]

    def stack(name):
        return jnp.stack([blk[name] for blk in blocks])

    # class/pos token additive bias for one image block of T_PAD rows
    tok_bias = jnp.zeros((T_PAD, WIDTH), jnp.float32)
    tok_bias = tok_bias.at[0].set(p["class_emb"] + p["pos_emb"][0])
    tok_bias = tok_bias.at[1:NUM_TOKENS].set(p["pos_emb"][1:])

    # block-diagonal head lane mask for Q packing / context unpacking
    head_of_row = (jnp.arange(QROWS) // BT)[:, None]
    head_of_lane = (jnp.arange(WIDTH) // HEAD_DIM)[None, :]
    qmask = (head_of_row == head_of_lane).astype(jnp.float32)

    # additive attention bias: disallow cross-image attention and padded key rows
    q_img = (jnp.arange(QROWS) % BT) // T_PAD
    k_img = jnp.arange(BT) // T_PAD
    k_tok = jnp.arange(BT) % T_PAD
    valid = (q_img[:, None] == k_img[None, :]) & (k_tok[None, :] < NUM_TOKENS)
    attn_bias = jnp.where(valid, 0.0, -1e30).astype(jnp.float32)

    def pad_cols(w, n):
        return jnp.pad(w, ((0, 0), (0, n - w.shape[1])))

    def pad_rows_cols(w, m, n):
        return jnp.pad(w, ((0, m - w.shape[0]), (0, n - w.shape[1])))

    kp = {
        # wrapper-side helpers
        "tok_bias": tok_bias,
        "cv_embed": p["cv_embed"],
        # fused kernel inputs
        "attn_bias": attn_bias,
        "qmask": qmask,
        "w_patch": p["conv1_w"].reshape(WIDTH, PATCH_DIM).T.astype(bf16),
        "ln_pre_g": p["ln_pre_g"].reshape(1, WIDTH),
        "ln_pre_b": p["ln_pre_b"].reshape(1, WIDTH),
        "ln1_g": stack("ln1_g").reshape(LAYERS, 1, WIDTH),
        "ln1_b": stack("ln1_b").reshape(LAYERS, 1, WIDTH),
        "w_qkv": stack("w_qkv").astype(bf16),
        "b_qkv": stack("b_qkv").reshape(LAYERS, 1, 3 * WIDTH),
        "w_o": stack("w_o").astype(bf16),
        "b_o": stack("b_o").reshape(LAYERS, 1, WIDTH),
        "ln2_g": stack("ln2_g").reshape(LAYERS, 1, WIDTH),
        "ln2_b": stack("ln2_b").reshape(LAYERS, 1, WIDTH),
        "w_fc1": stack("w_fc1").astype(bf16),
        "b_fc1": stack("b_fc1").reshape(LAYERS, 1, 4 * WIDTH),
        "w_fc2": stack("w_fc2").astype(bf16),
        "b_fc2": stack("b_fc2").reshape(LAYERS, 1, WIDTH),
        "ln_post_g": p["ln_post_g"].reshape(1, WIDTH),
        "ln_post_b": p["ln_post_b"].reshape(1, WIDTH),
        "proj_pad": pad_cols(p["proj"], LANES).astype(bf16),
        "bn_g": p["bn_g"].reshape(1, WIDTH),
        "bn_b": p["bn_b"].reshape(1, WIDTH),
        "bn_proj_g": pad_cols(p["bn_proj_g"].reshape(1, PROJ), LANES),
        "bn_proj_b": pad_cols(p["bn_proj_b"].reshape(1, PROJ), LANES),
        "cls_w_pad": pad_cols(p["cls_w"], LANES).astype(bf16),
        "cls_proj_w_pad": pad_rows_cols(p["cls_proj_w"], LANES, LANES).astype(bf16),
    }
    return kp


# ------------------------------ model forward ---------------------------------
def build_transformer_forward(kp, x, cam_label=None, view_label=None, training=True,
                              neck_feat="before"):
    """ViT-B-16 branch of build_transformer.forward (training path returns
    ([cls_score, cls_score_proj], [img_feature_last, img_feature, img_feature_proj]))."""
    b = x.shape[0]
    assert b == BATCH, "attention masks / output packing are built for BATCH"

    # SIE embedding (added to each image's CLS token inside the kernel)
    if cam_label is not None and view_label is not None:
        cv = SIE_COE * kp["cv_embed"][cam_label * VIEW_NUM + view_label]
    elif cam_label is not None:
        cv = SIE_COE * kp["cv_embed"][cam_label]
    elif view_label is not None:
        cv = SIE_COE * kp["cv_embed"][view_label]
    else:
        cv = jnp.zeros((b, WIDTH), jnp.float32)

    # non-overlapping patch extraction (layout only); bf16 + zero CLS/pad rows
    patches = (
        x.reshape(b, IMG_C, GH, PATCH, GW, PATCH)
        .transpose(0, 2, 4, 1, 3, 5)
        .reshape(b, NUM_PATCHES, PATCH_DIM)
    ).astype(jnp.bfloat16)
    patches = jnp.pad(patches, ((0, 0), (1, T_PAD - NUM_TOKENS), (0, 0)))
    patches = patches.reshape(b * T_PAD, PATCH_DIM)

    # class/pos embedding + SIE embedding folded into one per-call additive tensor
    tok_add = jnp.broadcast_to(kp["tok_bias"], (b, T_PAD, WIDTH))
    tok_add = tok_add.at[:, 0, :].add(cv)
    tok_add = tok_add.reshape(b * T_PAD, WIDTH)

    out = encoder_call(patches, tok_add, kp)   # (OUT_GROUPS*B, 128) dense slab

    def grp(g, width):
        return out[g * b:(g + 1) * b, :width]

    img_feature_last = grp(0, WIDTH)
    img_feature = grp(1, WIDTH)
    img_feature_proj = grp(2, PROJ)
    feat = grp(3, WIDTH)
    feat_proj = grp(4, PROJ)
    cls_score = grp(5, NUM_CLASSES)
    cls_score_proj = grp(6, NUM_CLASSES)

    if training:
        return ([cls_score, cls_score_proj],
                [img_feature_last, img_feature, img_feature_proj])
    elif neck_feat == "after":
        return jnp.concatenate([feat, feat_proj], axis=1)
    else:
        return jnp.concatenate([img_feature, img_feature_proj], axis=1)


# ----------------------------------- main --------------------------------------
if __name__ == "__main__":
    key = jax.random.PRNGKey(0)
    k_param, k_x = jax.random.split(key)
    params = init_params(k_param)
    kparams = prepare_kernel_params(params)

    x = jax.random.normal(k_x, (BATCH, IMG_C, IMG_H, IMG_W), jnp.float32)
    cam_label = jnp.array([0, 2], jnp.int32)
    view_label = jnp.array([1, 0], jnp.int32)

    fwd = jax.jit(functools.partial(build_transformer_forward, training=True))
    scores, feats = fwd(kparams, x, cam_label, view_label)
    jax.block_until_ready((scores, feats))

    assert scores[0].shape == (BATCH, NUM_CLASSES)
    assert scores[1].shape == (BATCH, NUM_CLASSES)
    assert feats[0].shape == (BATCH, WIDTH)
    assert feats[1].shape == (BATCH, WIDTH)
    assert feats[2].shape == (BATCH, PROJ)
    assert all(bool(jnp.all(jnp.isfinite(a))) for a in scores + feats)
    print("KERNEL_OK")
</pallas_src>

<mosaic_0001>
module attributes {stable_mosaic.version = 11 : i64} {
  func.func @_fused_kernel(%arg0: memref<16x768xbf16, #tpu.memory_space<vmem>>, %arg1: memref<16x128xf32, #tpu.memory_space<vmem>>, %arg2: memref<64x16xf32, #tpu.memory_space<vmem>>, %arg3: memref<64x128xf32, #tpu.memory_space<vmem>>, %arg4: memref<768x128xbf16, #tpu.memory_space<vmem>>, %arg5: memref<1x128xf32, #tpu.memory_space<vmem>>, %arg6: memref<1x128xf32, #tpu.memory_space<vmem>>, %arg7: memref<2x1x128xf32, #tpu.memory_space<vmem>>, %arg8: memref<2x1x128xf32, #tpu.memory_space<vmem>>, %arg9: memref<2x128x384xbf16, #tpu.memory_space<vmem>>, %arg10: memref<2x1x384xf32, #tpu.memory_space<vmem>>, %arg11: memref<2x128x128xbf16, #tpu.memory_space<vmem>>, %arg12: memref<2x1x128xf32, #tpu.memory_space<vmem>>, %arg13: memref<2x1x128xf32, #tpu.memory_space<vmem>>, %arg14: memref<2x1x128xf32, #tpu.memory_space<vmem>>, %arg15: memref<2x128x512xbf16, #tpu.memory_space<vmem>>, %arg16: memref<2x1x512xf32, #tpu.memory_space<vmem>>, %arg17: memref<2x512x128xbf16, #tpu.memory_space<vmem>>, %arg18: memref<2x1x128xf32, #tpu.memory_space<vmem>>, %arg19: memref<1x128xf32, #tpu.memory_space<vmem>>, %arg20: memref<1x128xf32, #tpu.memory_space<vmem>>, %arg21: memref<128x128xbf16, #tpu.memory_space<vmem>>, %arg22: memref<1x128xf32, #tpu.memory_space<vmem>>, %arg23: memref<1x128xf32, #tpu.memory_space<vmem>>, %arg24: memref<1x128xf32, #tpu.memory_space<vmem>>, %arg25: memref<1x128xf32, #tpu.memory_space<vmem>>, %arg26: memref<128x128xbf16, #tpu.memory_space<vmem>>, %arg27: memref<128x128xbf16, #tpu.memory_space<vmem>>, %arg28: memref<16x128xf32, #tpu.memory_space<vmem>>) attributes {dimension_semantics = [], scalar_prefetch = 0 : i64, scratch_operands = 0 : i64, tpu.core_type = #tpu.core_type<tc>} {
    %c0 = arith.constant 0 : index
    %c0_0 = arith.constant 0 : index
    %0 = vector.load %arg3[%c0, %c0_0] : memref<64x128xf32, #tpu.memory_space<vmem>>, vector<64x128xf32>
    %c0_1 = arith.constant 0 : index
    %c0_2 = arith.constant 0 : index
    %1 = vector.load %arg2[%c0_1, %c0_2] : memref<64x16xf32, #tpu.memory_space<vmem>>, vector<64x16xf32>
    %c0_3 = arith.constant 0 : index
    %c0_4 = arith.constant 0 : index
    %2 = vector.load %arg0[%c0_3, %c0_4] : memref<16x768xbf16, #tpu.memory_space<vmem>>, vector<16x768xbf16>
    %c0_5 = arith.constant 0 : index
    %c0_6 = arith.constant 0 : index
    %3 = vector.load %arg4[%c0_5, %c0_6] : memref<768x128xbf16, #tpu.memory_space<vmem>>, vector<768x128xbf16>
    %cst = arith.constant dense<0.000000e+00> : vector<16x128xf32>
    %4 = tpu.matmul %2, %3, %cst {dimension_numbers = #tpu.dot_dimension_numbers<[1], [0], [0], [1], [0, 0, 1, 1], [], []>} : vector<16x768xbf16>, vector<768x128xbf16>, vector<16x128xf32> -> vector<16x128xf32>
    %c0_7 = arith.constant 0 : index
    %c0_8 = arith.constant 0 : index
    %5 = vector.load %arg1[%c0_7, %c0_8] : memref<16x128xf32, #tpu.memory_space<vmem>>, vector<16x128xf32>
    %6 = arith.addf %4, %5 : vector<16x128xf32>
    %c0_9 = arith.constant 0 : index
    %c0_10 = arith.constant 0 : index
    %7 = vector.load %arg5[%c0_9, %c0_10] : memref<1x128xf32, #tpu.memory_space<vmem>>, vector<1x128xf32>
    %c0_11 = arith.constant 0 : index
    %c0_12 = arith.constant 0 : index
    %8 = vector.load %arg6[%c0_11, %c0_12] : memref<1x128xf32, #tpu.memory_space<vmem>>, vector<1x128xf32>
    %cst_13 = arith.constant dense<0.000000e+00> : vector<16xf32>
    %9 = vector.multi_reduction <add>, %6, %cst_13 [1] : vector<16x128xf32> to vector<16xf32>
    %10 = vector.shape_cast %9 : vector<16xf32> to vector<16x1xf32>
    %cst_14 = arith.constant 1.280000e+02 : f32
    %11 = vector.broadcast %cst_14 : f32 to vector<16x1xf32>
    %12 = arith.divf %10, %11 : vector<16x1xf32>
    %13 = vector.broadcast %12 : vector<16x1xf32> to vector<16x128xf32>
    %14 = arith.subf %6, %13 : vector<16x128xf32>
    %15 = arith.mulf %14, %14 : vector<16x128xf32>
    %cst_15 = arith.constant dense<0.000000e+00> : vector<16xf32>
    %16 = vector.multi_reduction <add>, %15, %cst_15 [1] : vector<16x128xf32> to vector<16xf32>
    %17 = vector.shape_cast %16 : vector<16xf32> to vector<16x1xf32>
    %cst_16 = arith.constant 1.280000e+02 : f32
    %18 = vector.broadcast %cst_16 : f32 to vector<16x1xf32>
    %19 = arith.divf %17, %18 : vector<16x1xf32>
    %20 = vector.broadcast %12 : vector<16x1xf32> to vector<16x128xf32>
    %21 = arith.subf %6, %20 : vector<16x128xf32>
    %cst_17 = arith.constant 9.99999974E-6 : f32
    %22 = vector.broadcast %cst_17 : f32 to vector<16x1xf32>
    %23 = arith.addf %19, %22 : vector<16x1xf32>
    %24 = math.rsqrt %23 : vector<16x1xf32>
    %25 = vector.broadcast %24 : vector<16x1xf32> to vector<16x128xf32>
    %26 = arith.mulf %21, %25 : vector<16x128xf32>
    %27 = vector.broadcast %7 : vector<1x128xf32> to vector<16x128xf32>
    %28 = arith.mulf %26, %27 : vector<16x128xf32>
    %29 = vector.broadcast %8 : vector<1x128xf32> to vector<16x128xf32>
    %30 = arith.addf %28, %29 : vector<16x128xf32>
    %c0_18 = arith.constant 0 : index
    %c0_19 = arith.constant 0 : index
    %c0_20 = arith.constant 0 : index
    %31 = vector.load %arg7[%c0_18, %c0_19, %c0_20] : memref<2x1x128xf32, #tpu.memory_space<vmem>>, vector<1x1x128xf32>
    %32 = vector.shape_cast %31 : vector<1x1x128xf32> to vector<1x128xf32>
    %c0_21 = arith.constant 0 : index
    %c0_22 = arith.constant 0 : index
    %c0_23 = arith.constant 0 : index
    %33 = vector.load %arg8[%c0_21, %c0_22, %c0_23] : memref<2x1x128xf32, #tpu.memory_space<vmem>>, vector<1x1x128xf32>
    %34 = vector.shape_cast %33 : vector<1x1x128xf32> to vector<1x128xf32>
    %cst_24 = arith.constant dense<0.000000e+00> : vector<16xf32>
    %35 = vector.multi_reduction <add>, %30, %cst_24 [1] : vector<16x128xf32> to vector<16xf32>
    %36 = vector.shape_cast %35 : vector<16xf32> to vector<16x1xf32>
    %cst_25 = arith.constant 1.280000e+02 : f32
    %37 = vector.broadcast %cst_25 : f32 to vector<16x1xf32>
    %38 = arith.divf %36, %37 : vector<16x1xf32>
    %39 = vector.broadcast %38 : vector<16x1xf32> to vector<16x128xf32>
    %40 = arith.subf %30, %39 : vector<16x128xf32>
    %41 = arith.mulf %40, %40 : vector<16x128xf32>
    %cst_26 = arith.constant dense<0.000000e+00> : vector<16xf32>
    %42 = vector.multi_reduction <add>, %41, %cst_26 [1] : vector<16x128xf32> to vector<16xf32>
    %43 = vector.shape_cast %42 : vector<16xf32> to vector<16x1xf32>
    %cst_27 = arith.constant 1.280000e+02 : f32
    %44 = vector.broadcast %cst_27 : f32 to vector<16x1xf32>
    %45 = arith.divf %43, %44 : vector<16x1xf32>
    %46 = vector.broadcast %38 : vector<16x1xf32> to vector<16x128xf32>
    %47 = arith.subf %30, %46 : vector<16x128xf32>
    %cst_28 = arith.constant 9.99999974E-6 : f32
    %48 = vector.broadcast %cst_28 : f32 to vector<16x1xf32>
    %49 = arith.addf %45, %48 : vector<16x1xf32>
    %50 = math.rsqrt %49 : vector<16x1xf32>
    %51 = vector.broadcast %50 : vector<16x1xf32> to vector<16x128xf32>
    %52 = arith.mulf %47, %51 : vector<16x128xf32>
    %53 = vector.broadcast %32 : vector<1x128xf32> to vector<16x128xf32>
    %54 = arith.mulf %52, %53 : vector<16x128xf32>
    %55 = vector.broadcast %34 : vector<1x128xf32> to vector<16x128xf32>
    %56 = arith.addf %54, %55 : vector<16x128xf32>
    %c0_29 = arith.constant 0 : index
    %c0_30 = arith.constant 0 : index
    %c0_31 = arith.constant 0 : index
    %57 = vector.load %arg9[%c0_29, %c0_30, %c0_31] : memref<2x128x384xbf16, #tpu.memory_space<vmem>>, vector<1x128x384xbf16>
    %58 = vector.shape_cast %57 : vector<1x128x384xbf16> to vector<128x384xbf16>
    %59 = arith.truncf %56 : vector<16x128xf32> to vector<16x128xbf16>
    %cst_32 = arith.constant dense<0.000000e+00> : vector<16x384xf32>
    %60 = tpu.matmul %59, %58, %cst_32 {dimension_numbers = #tpu.dot_dimension_numbers<[1], [0], [0], [1], [0, 0, 1, 1], [], []>} : vector<16x128xbf16>, vector<128x384xbf16>, vector<16x384xf32> -> vector<16x384xf32>
    %c0_33 = arith.constant 0 : index
    %c0_34 = arith.constant 0 : index
    %c0_35 = arith.constant 0 : index
    %61 = vector.load %arg10[%c0_33, %c0_34, %c0_35] : memref<2x1x384xf32, #tpu.memory_space<vmem>>, vector<1x1x384xf32>
    %62 = vector.shape_cast %61 : vector<1x1x384xf32> to vector<1x384xf32>
    %63 = vector.broadcast %62 : vector<1x384xf32> to vector<16x384xf32>
    %64 = arith.addf %60, %63 : vector<16x384xf32>
    %65 = vector.extract_strided_slice %64 {offsets = [0, 0], sizes = [16, 128], strides = [1, 1]} : vector<16x384xf32> to vector<16x128xf32>
    %66 = vector.extract_strided_slice %64 {offsets = [0, 128], sizes = [16, 128], strides = [1, 1]} : vector<16x384xf32> to vector<16x128xf32>
    %67 = arith.truncf %66 : vector<16x128xf32> to vector<16x128xbf16>
    %68 = vector.extract_strided_slice %64 {offsets = [0, 256], sizes = [16, 128], strides = [1, 1]} : vector<16x384xf32> to vector<16x128xf32>
    %69 = arith.truncf %68 : vector<16x128xf32> to vector<16x128xbf16>
    %70 = tpu.concatenate %65, %65, %65, %65 in 0 : vector<16x128xf32>, vector<16x128xf32>, vector<16x128xf32>, vector<16x128xf32> -> vector<64x128xf32>
    %71 = arith.mulf %70, %0 : vector<64x128xf32>
    %72 = arith.truncf %71 : vector<64x128xf32> to vector<64x128xbf16>
    %cst_36 = arith.constant dense<0.000000e+00> : vector<64x16xf32>
    %73 = tpu.matmul %72, %67, %cst_36 {dimension_numbers = #tpu.dot_dimension_numbers<[1], [1], [0], [0], [0, 0, 1, 0], [], []>} : vector<64x128xbf16>, vector<16x128xbf16>, vector<64x16xf32> -> vector<64x16xf32>
    %cst_37 = arith.constant 0.176776692 : f32
    %74 = vector.broadcast %cst_37 : f32 to vector<64x16xf32>
    %75 = arith.mulf %73, %74 : vector<64x16xf32>
    %76 = arith.addf %75, %1 : vector<64x16xf32>
    %cst_38 = arith.constant dense<0xFF800000> : vector<64xf32>
    %77 = vector.multi_reduction <maximumf>, %76, %cst_38 [1] : vector<64x16xf32> to vector<64xf32>
    %78 = vector.shape_cast %77 : vector<64xf32> to vector<64x1xf32>
    %79 = vector.broadcast %78 : vector<64x1xf32> to vector<64x16xf32>
    %80 = arith.subf %76, %79 : vector<64x16xf32>
    %81 = math.exp %80 : vector<64x16xf32>
    %cst_39 = arith.constant dense<0.000000e+00> : vector<64xf32>
    %82 = vector.multi_reduction <add>, %81, %cst_39 [1] : vector<64x16xf32> to vector<64xf32>
    %83 = vector.shape_cast %82 : vector<64xf32> to vector<64x1xf32>
    %84 = tpu.reciprocal %83 {approx = true} : vector<64x1xf32> -> vector<64x1xf32>
    %85 = vector.broadcast %84 : vector<64x1xf32> to vector<64x16xf32>
    %86 = arith.mulf %81, %85 : vector<64x16xf32>
    %87 = arith.truncf %86 : vector<64x16xf32> to vector<64x16xbf16>
    %cst_40 = arith.constant dense<0.000000e+00> : vector<64x128xf32>
    %88 = tpu.matmul %87, %69, %cst_40 {dimension_numbers = #tpu.dot_dimension_numbers<[1], [0], [0], [1], [0, 0, 1, 1], [], []>} : vector<64x16xbf16>, vector<16x128xbf16>, vector<64x128xf32> -> vector<64x128xf32>
    %89 = arith.mulf %88, %0 : vector<64x128xf32>
    %90 = vector.extract_strided_slice %89 {offsets = [0, 0], sizes = [16, 128], strides = [1, 1]} : vector<64x128xf32> to vector<16x128xf32>
    %91 = vector.extract_strided_slice %89 {offsets = [16, 0], sizes = [16, 128], strides = [1, 1]} : vector<64x128xf32> to vector<16x128xf32>
    %92 = arith.addf %90, %91 : vector<16x128xf32>
    %93 = vector.extract_strided_slice %89 {offsets = [32, 0], sizes = [16, 128], strides = [1, 1]} : vector<64x128xf32> to vector<16x128xf32>
    %94 = arith.addf %92, %93 : vector<16x128xf32>
    %95 = vector.extract_strided_slice %89 {offsets = [48, 0], sizes = [16, 128], strides = [1, 1]} : vector<64x128xf32> to vector<16x128xf32>
    %96 = arith.addf %94, %95 : vector<16x128xf32>
    %c0_41 = arith.constant 0 : index
    %c0_42 = arith.constant 0 : index
    %c0_43 = arith.constant 0 : index
    %97 = vector.load %arg11[%c0_41, %c0_42, %c0_43] : memref<2x128x128xbf16, #tpu.memory_space<vmem>>, vector<1x128x128xbf16>
    %98 = vector.shape_cast %97 : vector<1x128x128xbf16> to vector<128x128xbf16>
    %99 = arith.truncf %96 : vector<16x128xf32> to vector<16x128xbf16>
    %cst_44 = arith.constant dense<0.000000e+00> : vector<16x128xf32>
    %100 = tpu.matmul %99, %98, %cst_44 {dimension_numbers = #tpu.dot_dimension_numbers<[1], [0], [0], [1], [0, 0, 1, 1], [], []>} : vector<16x128xbf16>, vector<128x128xbf16>, vector<16x128xf32> -> vector<16x128xf32>
    %101 = arith.addf %30, %100 : vector<16x128xf32>
    %c0_45 = arith.constant 0 : index
    %c0_46 = arith.constant 0 : index
    %c0_47 = arith.constant 0 : index
    %102 = vector.load %arg12[%c0_45, %c0_46, %c0_47] : memref<2x1x128xf32, #tpu.memory_space<vmem>>, vector<1x1x128xf32>
    %103 = vector.shape_cast %102 : vector<1x1x128xf32> to vector<1x128xf32>
    %104 = vector.broadcast %103 : vector<1x128xf32> to vector<16x128xf32>
    %105 = arith.addf %101, %104 : vector<16x128xf32>
    %c0_48 = arith.constant 0 : index
    %c0_49 = arith.constant 0 : index
    %c0_50 = arith.constant 0 : index
    %106 = vector.load %arg13[%c0_48, %c0_49, %c0_50] : memref<2x1x128xf32, #tpu.memory_space<vmem>>, vector<1x1x128xf32>
    %107 = vector.shape_cast %106 : vector<1x1x128xf32> to vector<1x128xf32>
    %c0_51 = arith.constant 0 : index
    %c0_52 = arith.constant 0 : index
    %c0_53 = arith.constant 0 : index
    %108 = vector.load %arg14[%c0_51, %c0_52, %c0_53] : memref<2x1x128xf32, #tpu.memory_space<vmem>>, vector<1x1x128xf32>
    %109 = vector.shape_cast %108 : vector<1x1x128xf32> to vector<1x128xf32>
    %cst_54 = arith.constant dense<0.000000e+00> : vector<16xf32>
    %110 = vector.multi_reduction <add>, %105, %cst_54 [1] : vector<16x128xf32> to vector<16xf32>
    %111 = vector.shape_cast %110 : vector<16xf32> to vector<16x1xf32>
    %cst_55 = arith.constant 1.280000e+02 : f32
    %112 = vector.broadcast %cst_55 : f32 to vector<16x1xf32>
    %113 = arith.divf %111, %112 : vector<16x1xf32>
    %114 = vector.broadcast %113 : vector<16x1xf32> to vector<16x128xf32>
    %115 = arith.subf %105, %114 : vector<16x128xf32>
    %116 = arith.mulf %115, %115 : vector<16x128xf32>
    %cst_56 = arith.constant dense<0.000000e+00> : vector<16xf32>
    %117 = vector.multi_reduction <add>, %116, %cst_56 [1] : vector<16x128xf32> to vector<16xf32>
    %118 = vector.shape_cast %117 : vector<16xf32> to vector<16x1xf32>
    %cst_57 = arith.constant 1.280000e+02 : f32
    %119 = vector.broadcast %cst_57 : f32 to vector<16x1xf32>
    %120 = arith.divf %118, %119 : vector<16x1xf32>
    %121 = vector.broadcast %113 : vector<16x1xf32> to vector<16x128xf32>
    %122 = arith.subf %105, %121 : vector<16x128xf32>
    %cst_58 = arith.constant 9.99999974E-6 : f32
    %123 = vector.broadcast %cst_58 : f32 to vector<16x1xf32>
    %124 = arith.addf %120, %123 : vector<16x1xf32>
    %125 = math.rsqrt %124 : vector<16x1xf32>
    %126 = vector.broadcast %125 : vector<16x1xf32> to vector<16x128xf32>
    %127 = arith.mulf %122, %126 : vector<16x128xf32>
    %128 = vector.broadcast %107 : vector<1x128xf32> to vector<16x128xf32>
    %129 = arith.mulf %127, %128 : vector<16x128xf32>
    %130 = vector.broadcast %109 : vector<1x128xf32> to vector<16x128xf32>
    %131 = arith.addf %129, %130 : vector<16x128xf32>
    %c0_59 = arith.constant 0 : index
    %c0_60 = arith.constant 0 : index
    %c0_61 = arith.constant 0 : index
    %132 = vector.load %arg15[%c0_59, %c0_60, %c0_61] : memref<2x128x512xbf16, #tpu.memory_space<vmem>>, vector<1x128x512xbf16>
    %133 = vector.shape_cast %132 : vector<1x128x512xbf16> to vector<128x512xbf16>
    %134 = arith.truncf %131 : vector<16x128xf32> to vector<16x128xbf16>
    %cst_62 = arith.constant dense<0.000000e+00> : vector<16x512xf32>
    %135 = tpu.matmul %134, %133, %cst_62 {dimension_numbers = #tpu.dot_dimension_numbers<[1], [0], [0], [1], [0, 0, 1, 1], [], []>} : vector<16x128xbf16>, vector<128x512xbf16>, vector<16x512xf32> -> vector<16x512xf32>
    %c0_63 = arith.constant 0 : index
    %c0_64 = arith.constant 0 : index
    %c0_65 = arith.constant 0 : index
    %136 = vector.load %arg16[%c0_63, %c0_64, %c0_65] : memref<2x1x512xf32, #tpu.memory_space<vmem>>, vector<1x1x512xf32>
    %137 = vector.shape_cast %136 : vector<1x1x512xf32> to vector<1x512xf32>
    %138 = vector.broadcast %137 : vector<1x512xf32> to vector<16x512xf32>
    %139 = arith.addf %135, %138 : vector<16x512xf32>
    %cst_66 = arith.constant 1.702000e+00 : f32
    %140 = vector.broadcast %cst_66 : f32 to vector<16x512xf32>
    %141 = arith.mulf %140, %139 : vector<16x512xf32>
    %142 = arith.negf %141 : vector<16x512xf32>
    %143 = math.exp %142 : vector<16x512xf32>
    %cst_67 = arith.constant 1.000000e+00 : f32
    %144 = vector.broadcast %cst_67 : f32 to vector<16x512xf32>
    %145 = arith.addf %144, %143 : vector<16x512xf32>
    %146 = arith.divf %144, %145 : vector<16x512xf32>
    %147 = arith.mulf %139, %146 : vector<16x512xf32>
    %c0_68 = arith.constant 0 : index
    %c0_69 = arith.constant 0 : index
    %c0_70 = arith.constant 0 : index
    %148 = vector.load %arg17[%c0_68, %c0_69, %c0_70] : memref<2x512x128xbf16, #tpu.memory_space<vmem>>, vector<1x512x128xbf16>
    %149 = vector.shape_cast %148 : vector<1x512x128xbf16> to vector<512x128xbf16>
    %150 = arith.truncf %147 : vector<16x512xf32> to vector<16x512xbf16>
    %cst_71 = arith.constant dense<0.000000e+00> : vector<16x128xf32>
    %151 = tpu.matmul %150, %149, %cst_71 {dimension_numbers = #tpu.dot_dimension_numbers<[1], [0], [0], [1], [0, 0, 1, 1], [], []>} : vector<16x512xbf16>, vector<512x128xbf16>, vector<16x128xf32> -> vector<16x128xf32>
    %152 = arith.addf %105, %151 : vector<16x128xf32>
    %c0_72 = arith.constant 0 : index
    %c0_73 = arith.constant 0 : index
    %c0_74 = arith.constant 0 : index
    %153 = vector.load %arg18[%c0_72, %c0_73, %c0_74] : memref<2x1x128xf32, #tpu.memory_space<vmem>>, vector<1x1x128xf32>
    %154 = vector.shape_cast %153 : vector<1x1x128xf32> to vector<1x128xf32>
    %155 = vector.broadcast %154 : vector<1x128xf32> to vector<16x128xf32>
    %156 = arith.addf %152, %155 : vector<16x128xf32>
    %c1 = arith.constant 1 : index
    %c0_75 = arith.constant 0 : index
    %c0_76 = arith.constant 0 : index
    %157 = vector.load %arg7[%c1, %c0_75, %c0_76] : memref<2x1x128xf32, #tpu.memory_space<vmem>>, vector<1x1x128xf32>
    %158 = vector.shape_cast %157 : vector<1x1x128xf32> to vector<1x128xf32>
    %c1_77 = arith.constant 1 : index
    %c0_78 = arith.constant 0 : index
    %c0_79 = arith.constant 0 : index
    %159 = vector.load %arg8[%c1_77, %c0_78, %c0_79] : memref<2x1x128xf32, #tpu.memory_space<vmem>>, vector<1x1x128xf32>
    %160 = vector.shape_cast %159 : vector<1x1x128xf32> to vector<1x128xf32>
    %cst_80 = arith.constant dense<0.000000e+00> : vector<16xf32>
    %161 = vector.multi_reduction <add>, %156, %cst_80 [1] : vector<16x128xf32> to vector<16xf32>
    %162 = vector.shape_cast %161 : vector<16xf32> to vector<16x1xf32>
    %cst_81 = arith.constant 1.280000e+02 : f32
    %163 = vector.broadcast %cst_81 : f32 to vector<16x1xf32>
    %164 = arith.divf %162, %163 : vector<16x1xf32>
    %165 = vector.broadcast %164 : vector<16x1xf32> to vector<16x128xf32>
    %166 = arith.subf %156, %165 : vector<16x128xf32>
    %167 = arith.mulf %166, %166 : vector<16x128xf32>
    %cst_82 = arith.constant dense<0.000000e+00> : vector<16xf32>
    %168 = vector.multi_reduction <add>, %167, %cst_82 [1] : vector<16x128xf32> to vector<16xf32>
    %169 = vector.shape_cast %168 : vector<16xf32> to vector<16x1xf32>
    %cst_83 = arith.constant 1.280000e+02 : f32
    %170 = vector.broadcast %cst_83 : f32 to vector<16x1xf32>
    %171 = arith.divf %169, %170 : vector<16x1xf32>
    %172 = vector.broadcast %164 : vector<16x1xf32> to vector<16x128xf32>
    %173 = arith.subf %156, %172 : vector<16x128xf32>
    %cst_84 = arith.constant 9.99999974E-6 : f32
    %174 = vector.broadcast %cst_84 : f32 to vector<16x1xf32>
    %175 = arith.addf %171, %174 : vector<16x1xf32>
    %176 = math.rsqrt %175 : vector<16x1xf32>
    %177 = vector.broadcast %176 : vector<16x1xf32> to vector<16x128xf32>
    %178 = arith.mulf %173, %177 : vector<16x128xf32>
    %179 = vector.broadcast %158 : vector<1x128xf32> to vector<16x128xf32>
    %180 = arith.mulf %178, %179 : vector<16x128xf32>
    %181 = vector.broadcast %160 : vector<1x128xf32> to vector<16x128xf32>
    %182 = arith.addf %180, %181 : vector<16x128xf32>
    %c1_85 = arith.constant 1 : index
    %c0_86 = arith.constant 0 : index
    %c0_87 = arith.constant 0 : index
    %183 = vector.load %arg9[%c1_85, %c0_86, %c0_87] : memref<2x128x384xbf16, #tpu.memory_space<vmem>>, vector<1x128x384xbf16>
    %184 = vector.shape_cast %183 : vector<1x128x384xbf16> to vector<128x384xbf16>
    %185 = arith.truncf %182 : vector<16x128xf32> to vector<16x128xbf16>
    %cst_88 = arith.constant dense<0.000000e+00> : vector<16x384xf32>
    %186 = tpu.matmul %185, %184, %cst_88 {dimension_numbers = #tpu.dot_dimension_numbers<[1], [0], [0], [1], [0, 0, 1, 1], [], []>} : vector<16x128xbf16>, vector<128x384xbf16>, vector<16x384xf32> -> vector<16x384xf32>
    %c1_89 = arith.constant 1 : index
    %c0_90 = arith.constant 0 : index
    %c0_91 = arith.constant 0 : index
    %187 = vector.load %arg10[%c1_89, %c0_90, %c0_91] : memref<2x1x384xf32, #tpu.memory_space<vmem>>, vector<1x1x384xf32>
    %188 = vector.shape_cast %187 : vector<1x1x384xf32> to vector<1x384xf32>
    %189 = vector.broadcast %188 : vector<1x384xf32> to vector<16x384xf32>
    %190 = arith.addf %186, %189 : vector<16x384xf32>
    %191 = vector.extract_strided_slice %190 {offsets = [0, 0], sizes = [16, 128], strides = [1, 1]} : vector<16x384xf32> to vector<16x128xf32>
    %192 = vector.extract_strided_slice %190 {offsets = [0, 128], sizes = [16, 128], strides = [1, 1]} : vector<16x384xf32> to vector<16x128xf32>
    %193 = arith.truncf %192 : vector<16x128xf32> to vector<16x128xbf16>
    %194 = vector.extract_strided_slice %190 {offsets = [0, 256], sizes = [16, 128], strides = [1, 1]} : vector<16x384xf32> to vector<16x128xf32>
    %195 = arith.truncf %194 : vector<16x128xf32> to vector<16x128xbf16>
    %196 = tpu.concatenate %191, %191, %191, %191 in 0 : vector<16x128xf32>, vector<16x128xf32>, vector<16x128xf32>, vector<16x128xf32> -> vector<64x128xf32>
    %197 = arith.mulf %196, %0 : vector<64x128xf32>
    %198 = arith.truncf %197 : vector<64x128xf32> to vector<64x128xbf16>
    %cst_92 = arith.constant dense<0.000000e+00> : vector<64x16xf32>
    %199 = tpu.matmul %198, %193, %cst_92 {dimension_numbers = #tpu.dot_dimension_numbers<[1], [1], [0], [0], [0, 0, 1, 0], [], []>} : vector<64x128xbf16>, vector<16x128xbf16>, vector<64x16xf32> -> vector<64x16xf32>
    %cst_93 = arith.constant 0.176776692 : f32
    %200 = vector.broadcast %cst_93 : f32 to vector<64x16xf32>
    %201 = arith.mulf %199, %200 : vector<64x16xf32>
    %202 = arith.addf %201, %1 : vector<64x16xf32>
    %cst_94 = arith.constant dense<0xFF800000> : vector<64xf32>
    %203 = vector.multi_reduction <maximumf>, %202, %cst_94 [1] : vector<64x16xf32> to vector<64xf32>
    %204 = vector.shape_cast %203 : vector<64xf32> to vector<64x1xf32>
    %205 = vector.broadcast %204 : vector<64x1xf32> to vector<64x16xf32>
    %206 = arith.subf %202, %205 : vector<64x16xf32>
    %207 = math.exp %206 : vector<64x16xf32>
    %cst_95 = arith.constant dense<0.000000e+00> : vector<64xf32>
    %208 = vector.multi_reduction <add>, %207, %cst_95 [1] : vector<64x16xf32> to vector<64xf32>
    %209 = vector.shape_cast %208 : vector<64xf32> to vector<64x1xf32>
    %210 = tpu.reciprocal %209 {approx = true} : vector<64x1xf32> -> vector<64x1xf32>
    %211 = vector.broadcast %210 : vector<64x1xf32> to vector<64x16xf32>
    %212 = arith.mulf %207, %211 : vector<64x16xf32>
    %213 = arith.truncf %212 : vector<64x16xf32> to vector<64x16xbf16>
    %cst_96 = arith.constant dense<0.000000e+00> : vector<64x128xf32>
    %214 = tpu.matmul %213, %195, %cst_96 {dimension_numbers = #tpu.dot_dimension_numbers<[1], [0], [0], [1], [0, 0, 1, 1], [], []>} : vector<64x16xbf16>, vector<16x128xbf16>, vector<64x128xf32> -> vector<64x128xf32>
    %215 = arith.mulf %214, %0 : vector<64x128xf32>
    %216 = vector.extract_strided_slice %215 {offsets = [0, 0], sizes = [16, 128], strides = [1, 1]} : vector<64x128xf32> to vector<16x128xf32>
    %217 = vector.extract_strided_slice %215 {offsets = [16, 0], sizes = [16, 128], strides = [1, 1]} : vector<64x128xf32> to vector<16x128xf32>
    %218 = arith.addf %216, %217 : vector<16x128xf32>
    %219 = vector.extract_strided_slice %215 {offsets = [32, 0], sizes = [16, 128], strides = [1, 1]} : vector<64x128xf32> to vector<16x128xf32>
    %220 = arith.addf %218, %219 : vector<16x128xf32>
    %221 = vector.extract_strided_slice %215 {offsets = [48, 0], sizes = [16, 128], strides = [1, 1]} : vector<64x128xf32> to vector<16x128xf32>
    %222 = arith.addf %220, %221 : vector<16x128xf32>
    %c1_97 = arith.constant 1 : index
    %c0_98 = arith.constant 0 : index
    %c0_99 = arith.constant 0 : index
    %223 = vector.load %arg11[%c1_97, %c0_98, %c0_99] : memref<2x128x128xbf16, #tpu.memory_space<vmem>>, vector<1x128x128xbf16>
    %224 = vector.shape_cast %223 : vector<1x128x128xbf16> to vector<128x128xbf16>
    %225 = arith.truncf %222 : vector<16x128xf32> to vector<16x128xbf16>
    %cst_100 = arith.constant dense<0.000000e+00> : vector<16x128xf32>
    %226 = tpu.matmul %225, %224, %cst_100 {dimension_numbers = #tpu.dot_dimension_numbers<[1], [0], [0], [1], [0, 0, 1, 1], [], []>} : vector<16x128xbf16>, vector<128x128xbf16>, vector<16x128xf32> -> vector<16x128xf32>
    %227 = arith.addf %156, %226 : vector<16x128xf32>
    %c1_101 = arith.constant 1 : index
    %c0_102 = arith.constant 0 : index
    %c0_103 = arith.constant 0 : index
    %228 = vector.load %arg12[%c1_101, %c0_102, %c0_103] : memref<2x1x128xf32, #tpu.memory_space<vmem>>, vector<1x1x128xf32>
    %229 = vector.shape_cast %228 : vector<1x1x128xf32> to vector<1x128xf32>
    %230 = vector.broadcast %229 : vector<1x128xf32> to vector<16x128xf32>
    %231 = arith.addf %227, %230 : vector<16x128xf32>
    %c1_104 = arith.constant 1 : index
    %c0_105 = arith.constant 0 : index
    %c0_106 = arith.constant 0 : index
    %232 = vector.load %arg13[%c1_104, %c0_105, %c0_106] : memref<2x1x128xf32, #tpu.memory_space<vmem>>, vector<1x1x128xf32>
    %233 = vector.shape_cast %232 : vector<1x1x128xf32> to vector<1x128xf32>
    %c1_107 = arith.constant 1 : index
    %c0_108 = arith.constant 0 : index
    %c0_109 = arith.constant 0 : index
    %234 = vector.load %arg14[%c1_107, %c0_108, %c0_109] : memref<2x1x128xf32, #tpu.memory_space<vmem>>, vector<1x1x128xf32>
    %235 = vector.shape_cast %234 : vector<1x1x128xf32> to vector<1x128xf32>
    %cst_110 = arith.constant dense<0.000000e+00> : vector<16xf32>
    %236 = vector.multi_reduction <add>, %231, %cst_110 [1] : vector<16x128xf32> to vector<16xf32>
    %237 = vector.shape_cast %236 : vector<16xf32> to vector<16x1xf32>
    %cst_111 = arith.constant 1.280000e+02 : f32
    %238 = vector.broadcast %cst_111 : f32 to vector<16x1xf32>
    %239 = arith.divf %237, %238 : vector<16x1xf32>
    %240 = vector.broadcast %239 : vector<16x1xf32> to vector<16x128xf32>
    %241 = arith.subf %231, %240 : vector<16x128xf32>
    %242 = arith.mulf %241, %241 : vector<16x128xf32>
    %cst_112 = arith.constant dense<0.000000e+00> : vector<16xf32>
    %243 = vector.multi_reduction <add>, %242, %cst_112 [1] : vector<16x128xf32> to vector<16xf32>
    %244 = vector.shape_cast %243 : vector<16xf32> to vector<16x1xf32>
    %cst_113 = arith.constant 1.280000e+02 : f32
    %245 = vector.broadcast %cst_113 : f32 to vector<16x1xf32>
    %246 = arith.divf %244, %245 : vector<16x1xf32>
    %247 = vector.broadcast %239 : vector<16x1xf32> to vector<16x128xf32>
    %248 = arith.subf %231, %247 : vector<16x128xf32>
    %cst_114 = arith.constant 9.99999974E-6 : f32
    %249 = vector.broadcast %cst_114 : f32 to vector<16x1xf32>
    %250 = arith.addf %246, %249 : vector<16x1xf32>
    %251 = math.rsqrt %250 : vector<16x1xf32>
    %252 = vector.broadcast %251 : vector<16x1xf32> to vector<16x128xf32>
    %253 = arith.mulf %248, %252 : vector<16x128xf32>
    %254 = vector.broadcast %233 : vector<1x128xf32> to vector<16x128xf32>
    %255 = arith.mulf %253, %254 : vector<16x128xf32>
    %256 = vector.broadcast %235 : vector<1x128xf32> to vector<16x128xf32>
    %257 = arith.addf %255, %256 : vector<16x128xf32>
    %c1_115 = arith.constant 1 : index
    %c0_116 = arith.constant 0 : index
    %c0_117 = arith.constant 0 : index
    %258 = vector.load %arg15[%c1_115, %c0_116, %c0_117] : memref<2x128x512xbf16, #tpu.memory_space<vmem>>, vector<1x128x512xbf16>
    %259 = vector.shape_cast %258 : vector<1x128x512xbf16> to vector<128x512xbf16>
    %260 = arith.truncf %257 : vector<16x128xf32> to vector<16x128xbf16>
    %cst_118 = arith.constant dense<0.000000e+00> : vector<16x512xf32>
    %261 = tpu.matmul %260, %259, %cst_118 {dimension_numbers = #tpu.dot_dimension_numbers<[1], [0], [0], [1], [0, 0, 1, 1], [], []>} : vector<16x128xbf16>, vector<128x512xbf16>, vector<16x512xf32> -> vector<16x512xf32>
    %c1_119 = arith.constant 1 : index
    %c0_120 = arith.constant 0 : index
    %c0_121 = arith.constant 0 : index
    %262 = vector.load %arg16[%c1_119, %c0_120, %c0_121] : memref<2x1x512xf32, #tpu.memory_space<vmem>>, vector<1x1x512xf32>
    %263 = vector.shape_cast %262 : vector<1x1x512xf32> to vector<1x512xf32>
    %264 = vector.broadcast %263 : vector<1x512xf32> to vector<16x512xf32>
    %265 = arith.addf %261, %264 : vector<16x512xf32>
    %cst_122 = arith.constant 1.702000e+00 : f32
    %266 = vector.broadcast %cst_122 : f32 to vector<16x512xf32>
    %267 = arith.mulf %266, %265 : vector<16x512xf32>
    %268 = arith.negf %267 : vector<16x512xf32>
    %269 = math.exp %268 : vector<16x512xf32>
    %cst_123 = arith.constant 1.000000e+00 : f32
    %270 = vector.broadcast %cst_123 : f32 to vector<16x512xf32>
    %271 = arith.addf %270, %269 : vector<16x512xf32>
    %272 = arith.divf %270, %271 : vector<16x512xf32>
    %273 = arith.mulf %265, %272 : vector<16x512xf32>
    %c1_124 = arith.constant 1 : index
    %c0_125 = arith.constant 0 : index
    %c0_126 = arith.constant 0 : index
    %274 = vector.load %arg17[%c1_124, %c0_125, %c0_126] : memref<2x512x128xbf16, #tpu.memory_space<vmem>>, vector<1x512x128xbf16>
    %275 = vector.shape_cast %274 : vector<1x512x128xbf16> to vector<512x128xbf16>
    %276 = arith.truncf %273 : vector<16x512xf32> to vector<16x512xbf16>
    %cst_127 = arith.constant dense<0.000000e+00> : vector<16x128xf32>
    %277 = tpu.matmul %276, %275, %cst_127 {dimension_numbers = #tpu.dot_dimension_numbers<[1], [0], [0], [1], [0, 0, 1, 1], [], []>} : vector<16x512xbf16>, vector<512x128xbf16>, vector<16x128xf32> -> vector<16x128xf32>
    %278 = arith.addf %231, %277 : vector<16x128xf32>
    %c1_128 = arith.constant 1 : index
    %c0_129 = arith.constant 0 : index
    %c0_130 = arith.constant 0 : index
    %279 = vector.load %arg18[%c1_128, %c0_129, %c0_130] : memref<2x1x128xf32, #tpu.memory_space<vmem>>, vector<1x1x128xf32>
    %280 = vector.shape_cast %279 : vector<1x1x128xf32> to vector<1x128xf32>
    %281 = vector.broadcast %280 : vector<1x128xf32> to vector<16x128xf32>
    %282 = arith.addf %278, %281 : vector<16x128xf32>
    %283 = vector.extract_strided_slice %156 {offsets = [0, 0], sizes = [1, 128], strides = [1, 1]} : vector<16x128xf32> to vector<1x128xf32>
    %284 = vector.extract_strided_slice %156 {offsets = [8, 0], sizes = [1, 128], strides = [1, 1]} : vector<16x128xf32> to vector<1x128xf32>
    %285 = tpu.concatenate %283, %284 in 0 : vector<1x128xf32>, vector<1x128xf32> -> vector<2x128xf32>
    %286 = vector.extract_strided_slice %282 {offsets = [0, 0], sizes = [1, 128], strides = [1, 1]} : vector<16x128xf32> to vector<1x128xf32>
    %287 = vector.extract_strided_slice %282 {offsets = [8, 0], sizes = [1, 128], strides = [1, 1]} : vector<16x128xf32> to vector<1x128xf32>
    %288 = tpu.concatenate %286, %287 in 0 : vector<1x128xf32>, vector<1x128xf32> -> vector<2x128xf32>
    %c0_131 = arith.constant 0 : index
    %c0_132 = arith.constant 0 : index
    %289 = vector.load %arg19[%c0_131, %c0_132] : memref<1x128xf32, #tpu.memory_space<vmem>>, vector<1x128xf32>
    %c0_133 = arith.constant 0 : index
    %c0_134 = arith.constant 0 : index
    %290 = vector.load %arg20[%c0_133, %c0_134] : memref<1x128xf32, #tpu.memory_space<vmem>>, vector<1x128xf32>
    %cst_135 = arith.constant dense<0.000000e+00> : vector<2xf32>
    %291 = vector.multi_reduction <add>, %288, %cst_135 [1] : vector<2x128xf32> to vector<2xf32>
    %292 = vector.shape_cast %291 : vector<2xf32> to vector<2x1xf32>
    %cst_136 = arith.constant 1.280000e+02 : f32
    %293 = vector.broadcast %cst_136 : f32 to vector<2x1xf32>
    %294 = arith.divf %292, %293 : vector<2x1xf32>
    %295 = vector.broadcast %294 : vector<2x1xf32> to vector<2x128xf32>
    %296 = arith.subf %288, %295 : vector<2x128xf32>
    %297 = arith.mulf %296, %296 : vector<2x128xf32>
    %cst_137 = arith.constant dense<0.000000e+00> : vector<2xf32>
    %298 = vector.multi_reduction <add>, %297, %cst_137 [1] : vector<2x128xf32> to vector<2xf32>
    %299 = vector.shape_cast %298 : vector<2xf32> to vector<2x1xf32>
    %cst_138 = arith.constant 1.280000e+02 : f32
    %300 = vector.broadcast %cst_138 : f32 to vector<2x1xf32>
    %301 = arith.divf %299, %300 : vector<2x1xf32>
    %302 = vector.broadcast %294 : vector<2x1xf32> to vector<2x128xf32>
    %303 = arith.subf %288, %302 : vector<2x128xf32>
    %cst_139 = arith.constant 9.99999974E-6 : f32
    %304 = vector.broadcast %cst_139 : f32 to vector<2x1xf32>
    %305 = arith.addf %301, %304 : vector<2x1xf32>
    %306 = math.rsqrt %305 : vector<2x1xf32>
    %307 = vector.broadcast %306 : vector<2x1xf32> to vector<2x128xf32>
    %308 = arith.mulf %303, %307 : vector<2x128xf32>
    %309 = vector.broadcast %289 : vector<1x128xf32> to vector<2x128xf32>
    %310 = arith.mulf %308, %309 : vector<2x128xf32>
    %311 = vector.broadcast %290 : vector<1x128xf32> to vector<2x128xf32>
    %312 = arith.addf %310, %311 : vector<2x128xf32>
    %c0_140 = arith.constant 0 : index
    %c0_141 = arith.constant 0 : index
    %313 = vector.load %arg21[%c0_140, %c0_141] : memref<128x128xbf16, #tpu.memory_space<vmem>>, vector<128x128xbf16>
    %314 = arith.truncf %312 : vector<2x128xf32> to vector<2x128xbf16>
    %cst_142 = arith.constant dense<0.000000e+00> : vector<2x128xf32>
    %315 = tpu.matmul %314, %313, %cst_142 {dimension_numbers = #tpu.dot_dimension_numbers<[1], [0], [0], [1], [0, 0, 1, 1], [], []>} : vector<2x128xbf16>, vector<128x128xbf16>, vector<2x128xf32> -> vector<2x128xf32>
    %c0_143 = arith.constant 0 : index
    %c0_144 = arith.constant 0 : index
    %316 = vector.load %arg22[%c0_143, %c0_144] : memref<1x128xf32, #tpu.memory_space<vmem>>, vector<1x128xf32>
    %c0_145 = arith.constant 0 : index
    %c0_146 = arith.constant 0 : index
    %317 = vector.load %arg23[%c0_145, %c0_146] : memref<1x128xf32, #tpu.memory_space<vmem>>, vector<1x128xf32>
    %cst_147 = arith.constant dense<0.000000e+00> : vector<128xf32>
    %318 = vector.multi_reduction <add>, %312, %cst_147 [0] : vector<2x128xf32> to vector<128xf32>
    %319 = vector.shape_cast %318 : vector<128xf32> to vector<1x128xf32>
    %cst_148 = arith.constant 2.000000e+00 : f32
    %320 = vector.broadcast %cst_148 : f32 to vector<1x128xf32>
    %321 = arith.divf %319, %320 : vector<1x128xf32>
    %322 = vector.broadcast %321 : vector<1x128xf32> to vector<2x128xf32>
    %323 = arith.subf %312, %322 : vector<2x128xf32>
    %324 = arith.mulf %323, %323 : vector<2x128xf32>
    %cst_149 = arith.constant dense<0.000000e+00> : vector<128xf32>
    %325 = vector.multi_reduction <add>, %324, %cst_149 [0] : vector<2x128xf32> to vector<128xf32>
    %326 = vector.shape_cast %325 : vector<128xf32> to vector<1x128xf32>
    %cst_150 = arith.constant 2.000000e+00 : f32
    %327 = vector.broadcast %cst_150 : f32 to vector<1x128xf32>
    %328 = arith.divf %326, %327 : vector<1x128xf32>
    %329 = vector.broadcast %321 : vector<1x128xf32> to vector<2x128xf32>
    %330 = arith.subf %312, %329 : vector<2x128xf32>
    %cst_151 = arith.constant 9.99999974E-6 : f32
    %331 = vector.broadcast %cst_151 : f32 to vector<1x128xf32>
    %332 = arith.addf %328, %331 : vector<1x128xf32>
    %333 = math.rsqrt %332 : vector<1x128xf32>
    %334 = vector.broadcast %333 : vector<1x128xf32> to vector<2x128xf32>
    %335 = arith.mulf %330, %334 : vector<2x128xf32>
    %336 = vector.broadcast %316 : vector<1x128xf32> to vector<2x128xf32>
    %337 = arith.mulf %335, %336 : vector<2x128xf32>
    %338 = vector.broadcast %317 : vector<1x128xf32> to vector<2x128xf32>
    %339 = arith.addf %337, %338 : vector<2x128xf32>
    %c0_152 = arith.constant 0 : index
    %c0_153 = arith.constant 0 : index
    %340 = vector.load %arg24[%c0_152, %c0_153] : memref<1x128xf32, #tpu.memory_space<vmem>>, vector<1x128xf32>
    %c0_154 = arith.constant 0 : index
    %c0_155 = arith.constant 0 : index
    %341 = vector.load %arg25[%c0_154, %c0_155] : memref<1x128xf32, #tpu.memory_space<vmem>>, vector<1x128xf32>
    %cst_156 = arith.constant dense<0.000000e+00> : vector<128xf32>
    %342 = vector.multi_reduction <add>, %315, %cst_156 [0] : vector<2x128xf32> to vector<128xf32>
    %343 = vector.shape_cast %342 : vector<128xf32> to vector<1x128xf32>
    %cst_157 = arith.constant 2.000000e+00 : f32
    %344 = vector.broadcast %cst_157 : f32 to vector<1x128xf32>
    %345 = arith.divf %343, %344 : vector<1x128xf32>
    %346 = vector.broadcast %345 : vector<1x128xf32> to vector<2x128xf32>
    %347 = arith.subf %315, %346 : vector<2x128xf32>
    %348 = arith.mulf %347, %347 : vector<2x128xf32>
    %cst_158 = arith.constant dense<0.000000e+00> : vector<128xf32>
    %349 = vector.multi_reduction <add>, %348, %cst_158 [0] : vector<2x128xf32> to vector<128xf32>
    %350 = vector.shape_cast %349 : vector<128xf32> to vector<1x128xf32>
    %cst_159 = arith.constant 2.000000e+00 : f32
    %351 = vector.broadcast %cst_159 : f32 to vector<1x128xf32>
    %352 = arith.divf %350, %351 : vector<1x128xf32>
    %353 = vector.broadcast %345 : vector<1x128xf32> to vector<2x128xf32>
    %354 = arith.subf %315, %353 : vector<2x128xf32>
    %cst_160 = arith.constant 9.99999974E-6 : f32
    %355 = vector.broadcast %cst_160 : f32 to vector<1x128xf32>
    %356 = arith.addf %352, %355 : vector<1x128xf32>
    %357 = math.rsqrt %356 : vector<1x128xf32>
    %358 = vector.broadcast %357 : vector<1x128xf32> to vector<2x128xf32>
    %359 = arith.mulf %354, %358 : vector<2x128xf32>
    %360 = vector.broadcast %340 : vector<1x128xf32> to vector<2x128xf32>
    %361 = arith.mulf %359, %360 : vector<2x128xf32>
    %362 = vector.broadcast %341 : vector<1x128xf32> to vector<2x128xf32>
    %363 = arith.addf %361, %362 : vector<2x128xf32>
    %c0_161 = arith.constant 0 : index
    %c0_162 = arith.constant 0 : index
    %364 = vector.load %arg26[%c0_161, %c0_162] : memref<128x128xbf16, #tpu.memory_space<vmem>>, vector<128x128xbf16>
    %365 = arith.truncf %339 : vector<2x128xf32> to vector<2x128xbf16>
    %cst_163 = arith.constant dense<0.000000e+00> : vector<2x128xf32>
    %366 = tpu.matmul %365, %364, %cst_163 {dimension_numbers = #tpu.dot_dimension_numbers<[1], [0], [0], [1], [0, 0, 1, 1], [], []>} : vector<2x128xbf16>, vector<128x128xbf16>, vector<2x128xf32> -> vector<2x128xf32>
    %c0_164 = arith.constant 0 : index
    %c0_165 = arith.constant 0 : index
    %367 = vector.load %arg27[%c0_164, %c0_165] : memref<128x128xbf16, #tpu.memory_space<vmem>>, vector<128x128xbf16>
    %368 = arith.truncf %363 : vector<2x128xf32> to vector<2x128xbf16>
    %cst_166 = arith.constant dense<0.000000e+00> : vector<2x128xf32>
    %369 = tpu.matmul %368, %367, %cst_166 {dimension_numbers = #tpu.dot_dimension_numbers<[1], [0], [0], [1], [0, 0, 1, 1], [], []>} : vector<2x128xbf16>, vector<128x128xbf16>, vector<2x128xf32> -> vector<2x128xf32>
    %cst_167 = arith.constant 0.000000e+00 : f32
    %370 = vector.broadcast %cst_167 : f32 to vector<2x128xf32>
    %371 = tpu.concatenate %285, %312, %315, %339, %363, %366, %369, %370 in 0 : vector<2x128xf32>, vector<2x128xf32>, vector<2x128xf32>, vector<2x128xf32>, vector<2x128xf32>, vector<2x128xf32>, vector<2x128xf32>, vector<2x128xf32> -> vector<16x128xf32>
    %c0_168 = arith.constant 0 : index
    %c0_169 = arith.constant 0 : index
    %372 = vector.load %arg28[%c0_168, %c0_169] : memref<16x128xf32, #tpu.memory_space<vmem>>, vector<16x128xf32>
    tpu.vector_store %arg28[%c0_168, %c0_169], %371 {strides = array<i32>} : memref<16x128xf32, #tpu.memory_space<vmem>>, vector<16x128xf32>,
    return
  }
}

</mosaic_0001>

<bundles_post_ra>
// kernel: build_transformer_forward.1
= control target key start
LH: loop header
LB: loop body
LE: loop exit
PB: predicated region body
PF: predicated region fallthrough
CT: control target
= control target key end

     0   :  { %s7203_s0 = inlined_call_operand.vmem [shape: bf16[16,768], index: 0, kind: input, shape index: {}]   ;;  %s7204_s1 = inlined_call_operand.vmem [shape: f32[16,128], index: 1, kind: input, shape index: {}]   ;;  %s7205_s2 = inlined_call_operand.vmem [shape: f32[64,16], index: 2, kind: input, shape index: {}]   ;;  %s7206_s3 = inlined_call_operand.vmem [shape: f32[64,128], index: 3, kind: input, shape index: {}]   ;;  %s7207_s4 = inlined_call_operand.hbm [shape: bf16[768,128], index: 4, kind: input, shape index: {}]   ;;  %s7208_s5 = inlined_call_operand.hbm [shape: f32[1,128], index: 5, kind: input, shape index: {}]   ;;  %s7209_s6 = inlined_call_operand.hbm [shape: f32[1,128], index: 6, kind: input, shape index: {}]   ;;  %s7210_s7 = inlined_call_operand.hbm [shape: f32[2,1,128], index: 7, kind: input, shape index: {}]   ;;  %s7211_s8 = inlined_call_operand.hbm [shape: f32[2,1,128], index: 8, kind: input, shape index: {}]   ;;  %s7212_s9 = inlined_call_operand.hbm [shape: bf16[2,128,384], index: 9, kind: input, shape index: {}]   ;;  %s7213_s10 = inlined_call_operand.vmem [shape: f32[2,1,384], index: 10, kind: input, shape index: {}]   ;;  %s7214_s11 = inlined_call_operand.vmem [shape: bf16[2,128,128], index: 11, kind: input, shape index: {}]   ;;  %s7215_s12 = inlined_call_operand.hbm [shape: f32[2,1,128], index: 12, kind: input, shape index: {}]   ;;  %s7216_s13 = inlined_call_operand.hbm [shape: f32[2,1,128], index: 13, kind: input, shape index: {}]   ;;  %s7217_s14 = inlined_call_operand.hbm [shape: f32[2,1,128], index: 14, kind: input, shape index: {}]   ;;  %s7218_s15 = inlined_call_operand.vmem [shape: bf16[2,128,512], index: 15, kind: input, shape index: {}]   ;;  %s7219_s16 = inlined_call_operand.vmem [shape: f32[2,1,512], index: 16, kind: input, shape index: {}]   ;;  %s7220_s17 = inlined_call_operand.vmem [shape: bf16[2,512,128], index: 17, kind: input, shape index: {}]   ;;  %s7221_s18 = inlined_call_operand.hbm [shape: f32[2,1,128], index: 18, kind: input, shape index: {}]   ;;  %s7222_s19 = inlined_call_operand.hbm [shape: f32[1,128], index: 19, kind: input, shape index: {}]   ;;  %s7223_s20 = inlined_call_operand.hbm [shape: f32[1,128], index: 20, kind: input, shape index: {}]   ;;  %s7224_s21 = inlined_call_operand.vmem [shape: bf16[128,128], index: 21, kind: input, shape index: {}]   ;;  %s7225_s22 = inlined_call_operand.hbm [shape: f32[1,128], index: 22, kind: input, shape index: {}]   ;;  %s7226_s23 = inlined_call_operand.hbm [shape: f32[1,128], index: 23, kind: input, shape index: {}]   ;;  %s7227_s24 = inlined_call_operand.hbm [shape: f32[1,128], index: 24, kind: input, shape index: {}]   ;;  %s7228_s25 = inlined_call_operand.hbm [shape: f32[1,128], index: 25, kind: input, shape index: {}]   ;;  %s7229_s26 = inlined_call_operand.vmem [shape: bf16[128,128], index: 26, kind: input, shape index: {}]   ;;  %s7230_s27 = inlined_call_operand.vmem [shape: bf16[128,128], index: 27, kind: input, shape index: {}]   ;;  %s7231_s28 = inlined_call_operand.vmem [shape: f32[16,128], index: 28, kind: output, shape index: {}]  }
   0x1   :  { %7239 = sst [smem:[#allocation36_spill]] %s7203_s0 }
   0x2   :  { %7240 = sst [smem:[#allocation37_spill]] %s7204_s1 }
   0x3   :  { %7241 = sst [smem:[#allocation38_spill]] %s7205_s2 }
   0x4   :  { %7242 = sst [smem:[#allocation39_spill]] %s7206_s3 }
   0x5   :  { %7243 = sst [smem:[#allocation40_spill]] %s7207_s4 }
   0x6   :  { %7244 = sst [smem:[#allocation41_spill]] %s7208_s5 }
   0x7   :  { %7245 = sst [smem:[#allocation42_spill]] %s7209_s6 }
   0x8   :  { %7246 = sst [smem:[#allocation43_spill]] %s7210_s7 }
   0x9   :  { %7247 = sst [smem:[#allocation44_spill]] %s7211_s8 }
   0xa   :  { %7248 = sst [smem:[#allocation45_spill]] %s7212_s9 }
   0xb   :  { %7249 = sst [smem:[#allocation46_spill]] %s7213_s10 }
   0xc   :  { %7250 = sst [smem:[#allocation47_spill]] %s7214_s11 }
   0xd   :  { %7251 = sst [smem:[#allocation48_spill]] %s7215_s12 }
   0xe   :  { %7252 = sst [smem:[#allocation49_spill]] %s7231_s28 }
   0xf   :  { %33 = vsyncpa [#allocation3], 0 }
  0x10   :  { %34 = vsyncpa [#allocation5], 0 }
  0x11   :  { %35 = vsyncpa [#allocation8], 0 }
  0x12   :  { %36 = vsyncpa [#allocation11], 0 }
  0x13   :  { %37 = vsyncpa [#allocation14], 0 }
  0x14   :  { %38 = vsyncpa [#allocation17], 0 }
  0x15   :  { %39 = vsyncpa [#allocation20], 0 }
  0x16   :  { %40 = vsyncpa [#allocation23], 0 }
  0x17   :  { %41 = vsyncpa [#allocation26], 0  ;;  %s5982_s8 = smov [#allocation4]   ;;  %s5983_s9 = smov [#allocation7]  }
  0x18   :  { %s68_s5 = sshll.u32 %s5982_s8, 4  ;;  %s87_s30 = sshll.u32 %s5983_s9, 4  ;;  %s69_s5 = int_to_ptr.vmem [resolvable:$true] %s68_s5  ;;  %s88_s30 = int_to_ptr.vmem [resolvable:$true] %s87_s30 }
  0x19   :  { %s5652_s3 = scalar_lea.vmem %s69_s5, 16  ;;  %s5656_s6 = scalar_lea.vmem %s69_s5, 32 }
  0x1a   :  { %p5653_p0 = scmp.ne.s32.totalorder %s69_s5, %s5652_s3  ;;  %p5657_p1 = scmp.lt.s32.totalorder %s69_s5, %s69_s5 }
  0x1b   :  { %p5658_p2 = scmp.lt.s32.totalorder %s5656_s6, %s5652_s3 }
  0x1d   :  { %p5659_p3 = por %p5658_p2, %p5657_p1 }
  0x1f   :  { %p5660_p4 = pnand %p5659_p3, %p5653_p0 }
  0x21   :  { %5663 = shalt.err (!%p5660_p4)
}
  0x22   :  { %s7253_s11 = sld [smem:[#allocation41_spill]]  ;;  %s5672_s29 = scalar_lea.vmem %s88_s30, 32 }
  0x23   :  { %p5673_p5 = scmp.ne.s32.totalorder %s88_s30, %s5672_s29  ;;  %p5677_p6 = scmp.lt.s32.totalorder %s88_s30, %s88_s30 }
  0x24   :  { %p5678_p7 = scmp.lt.s32.totalorder %s5672_s29, %s5672_s29 }
  0x26   :  { %p5679_p8 = por %p5678_p7, %p5677_p6 }
  0x28   :  { %71 = dma.hbm_to_vmem [thread:$0]  %s7253_s11, 16, %s69_s5, [#allocation5]  }
  0x29   :  { %p5680_p9 = pnand %p5679_p8, %p5673_p5 }
  0x2b   :  { %5683 = shalt.err (!%p5680_p9)
}
  0x2c   :  { %s5984_s2 = smov 16   ;;  %s5985_s7 = smov 1  }
  0x2d   :  { %s7254_s4 = sld [smem:[#allocation43_spill]]  ;;  %s5986_s8 = smov [#allocation10]  }
  0x2e   :  { %s111_s9 = sshll.u32 %s5986_s8, 4  ;;  %s112_s9 = int_to_ptr.vmem [resolvable:$true] %s111_s9 }
  0x2f   :  { %s5692_s5 = scalar_lea.vmem %s112_s9, 6144  ;;  %p5697_p11 = scmp.lt.s32.totalorder %s112_s9, %s112_s9 }
  0x30   :  { %p5693_p10 = scmp.ne.s32.totalorder %s112_s9, %s5692_s5  ;;  %p5698_p12 = scmp.lt.s32.totalorder %s5692_s5, %s5692_s5 }
  0x32   :  { %p5699_p13 = por %p5698_p12, %p5697_p11 }
  0x33   :  { %93 = dma.hbm_to_vmem [thread:$0]  %s7254_s4, 32, %s88_s30, [#allocation8], %s5984_s2, %s5984_s2, %s5985_s7  }
  0x34   :  { %p5700_p0 = pnand %p5699_p13, %p5693_p10 }
  0x36   :  { %5703 = shalt.err (!%p5700_p0)
}
  0x37   :  { %s5987_s3 = smov 192   ;;  %s5988_s6 = smov 12  }
  0x38   :  { %s7255_s11 = sld [smem:[#allocation45_spill]]  ;;  %s5989_s29 = smov [#allocation13]  }
  0x39   :  { %s139_s28 = sshll.u32 %s5989_s29, 4  ;;  %s5990_s30 = smov [#allocation16]   ;;  %s140_s28 = int_to_ptr.vmem [resolvable:$true] %s139_s28 }
  0x3a   :  { %s169_s12 = sshll.u32 %s5990_s30, 4  ;;  %s5712_s1 = scalar_lea.vmem %s140_s28, 32  ;;  %s170_s12 = int_to_ptr.vmem [resolvable:$true] %s169_s12 }
  0x3b   :  { %p5713_p1 = scmp.ne.s32.totalorder %s140_s28, %s5712_s1  ;;  %p5717_p2 = scmp.lt.s32.totalorder %s140_s28, %s140_s28 }
  0x3c   :  { %p5718_p3 = scmp.lt.s32.totalorder %s5712_s1, %s5712_s1 }
  0x3e   :  { %117 = dma.hbm_to_vmem [thread:$0]  %s7255_s11, 6144, %s112_s9, [#allocation11], %s5987_s3, %s5987_s3, %s5988_s6  }
  0x3f   :  { %p5719_p4 = por %p5718_p3, %p5717_p2 }
  0x41   :  { %p5720_p5 = pnand %p5719_p4, %p5713_p1 }
  0x43   :  { %5723 = shalt.err (!%p5720_p5)
}
  0x44   :  { %145 = dma.hbm_to_vmem [thread:$0]  %s7216_s13, 32, %s140_s28, [#allocation14], %s5984_s2, %s5984_s2, %s5985_s7  }
  0x45   :  { %s5732_s9 = scalar_lea.vmem %s170_s12, 32  ;;  %p5737_p7 = scmp.lt.s32.totalorder %s170_s12, %s170_s12 }
  0x46   :  { %p5733_p6 = scmp.ne.s32.totalorder %s170_s12, %s5732_s9  ;;  %p5738_p8 = scmp.lt.s32.totalorder %s5732_s9, %s5732_s9 }
  0x48   :  { %p5739_p9 = por %p5738_p8, %p5737_p7 }
  0x4a   :  { %p5740_p10 = pnand %p5739_p9, %p5733_p6 }
  0x4c   :  { %5743 = shalt.err (!%p5740_p10)
}
  0x4d   :  { %175 = dma.hbm_to_vmem [thread:$0]  %s7221_s18, 32, %s170_s12, [#allocation17], %s5984_s2, %s5984_s2, %s5985_s7  }
  0x4e   :  { %s5991_s6 = smov [#allocation19]   ;;  %s5992_s0 = smov [#allocation22]  }
  0x4f   :  { %s192_s10 = sshll.u32 %s5991_s6, 4  ;;  %s214_s13 = sshll.u32 %s5992_s0, 4  ;;  %s193_s10 = int_to_ptr.vmem [resolvable:$true] %s192_s10  ;;  %s215_s13 = int_to_ptr.vmem [resolvable:$true] %s214_s13 }
  0x50   :  { %s5752_s28 = scalar_lea.vmem %s193_s10, 16  ;;  %s5756_s11 = scalar_lea.vmem %s193_s10, 32 }
  0x51   :  { %p5753_p11 = scmp.ne.s32.totalorder %s193_s10, %s5752_s28  ;;  %p5757_p12 = scmp.lt.s32.totalorder %s193_s10, %s193_s10 }
  0x52   :  { %p5758_p13 = scmp.lt.s32.totalorder %s5756_s11, %s5752_s28 }
  0x54   :  { %p5759_p0 = por %p5758_p13, %p5757_p12 }
  0x56   :  { %p5760_p1 = pnand %p5759_p0, %p5753_p11 }
  0x58   :  { %5763 = shalt.err (!%p5760_p1)
}
  0x59   :  { %195 = dma.hbm_to_vmem [thread:$0]  %s7223_s20, 16, %s193_s10, [#allocation20]  }
  0x5a   :  { %s5772_s1 = scalar_lea.vmem %s215_s13, 16  ;;  %s5776_s18 = scalar_lea.vmem %s215_s13, 32 }
  0x5b   :  { %p5773_p2 = scmp.ne.s32.totalorder %s215_s13, %s5772_s1  ;;  %p5777_p3 = scmp.lt.s32.totalorder %s215_s13, %s215_s13 }
  0x5c   :  { %p5778_p4 = scmp.lt.s32.totalorder %s5776_s18, %s5772_s1 }
  0x5e   :  { %p5779_p5 = por %p5778_p4, %p5777_p3 }
  0x60   :  { %p5780_p6 = pnand %p5779_p5, %p5773_p2 }
  0x62   :  { %5783 = shalt.err (!%p5780_p6)
}
  0x63   :  { %217 = dma.hbm_to_vmem [thread:$0]  %s7226_s23, 16, %s215_s13, [#allocation23]  }
  0x64   :  { %s5993_s8 = smov [#allocation2]  }
  0x65   :  { %s55_s9 = sshll.u32 %s5993_s8, 4  ;;  %s56_s9 = int_to_ptr.vmem [resolvable:$true] %s55_s9 }
  0x66   :  { %s5792_s5 = scalar_lea.vmem %s56_s9, 6144  ;;  %p5797_p8 = scmp.lt.s32.totalorder %s56_s9, %s56_s9 }
  0x67   :  { %p5793_p7 = scmp.ne.s32.totalorder %s56_s9, %s5792_s5  ;;  %p5798_p9 = scmp.lt.s32.totalorder %s5792_s5, %s5792_s5 }
  0x69   :  { %p5799_p10 = por %p5798_p9, %p5797_p8 }
  0x6b   :  { %p5800_p11 = pnand %p5799_p10, %p5793_p7 }
  0x6d   :  { %5803 = shalt.err (!%p5800_p11)
}
  0x6e   :  { %s5994_s20 = smov 64   ;;  %s5995_s3 = smov 4  }
  0x6f   :  { %s7256_s0 = sld [smem:[#allocation40_spill]]  ;;  %s5996_s28 = smov [#allocation6]  }
  0x70   :  { %s78_s11 = sshll.u32 %s5996_s28, 4  ;;  %s5997_s29 = smov [#allocation9]   ;;  %s79_s11 = int_to_ptr.vmem [resolvable:$true] %s78_s11 }
  0x71   :  { %s99_s23 = sshll.u32 %s5997_s29, 4  ;;  %s5812_s13 = scalar_lea.vmem %s79_s11, 16  ;;  %s100_s23 = int_to_ptr.vmem [resolvable:$true] %s99_s23 }
  0x72   :  { %p5813_p12 = scmp.ne.s32.totalorder %s79_s11, %s5812_s13  ;;  %s5816_s30 = scalar_lea.vmem %s79_s11, 32 }
  0x73   :  { %p5817_p13 = scmp.lt.s32.totalorder %s79_s11, %s79_s11  ;;  %p5818_p0 = scmp.lt.s32.totalorder %s5816_s30, %s5812_s13 }
  0x75   :  { %61 = dma.hbm_to_vmem [thread:$0]  %s7256_s0, 6144, %s56_s9, [#allocation3], %s5994_s20, %s5994_s20, %s5995_s3  }
  0x76   :  { %p5819_p1 = por %p5818_p0, %p5817_p13 }
  0x78   :  { %p5820_p2 = pnand %p5819_p1, %p5813_p12 }
  0x7a   :  { %5823 = shalt.err (!%p5820_p2)
}
  0x7b   :  { %s7257_s12 = sld [smem:[#allocation42_spill]]  ;;  %s5832_s4 = scalar_lea.vmem %s100_s23, 32 }
  0x7c   :  { %p5833_p3 = scmp.ne.s32.totalorder %s100_s23, %s5832_s4  ;;  %p5837_p4 = scmp.lt.s32.totalorder %s100_s23, %s100_s23 }
  0x7d   :  { %p5838_p5 = scmp.lt.s32.totalorder %s5832_s4, %s5832_s4 }
  0x7f   :  { %p5839_p6 = por %p5838_p5, %p5837_p4 }
  0x81   :  { %81 = dma.hbm_to_vmem [thread:$0]  %s7257_s12, 16, %s79_s11, [#allocation5]  }
  0x82   :  { %p5840_p7 = pnand %p5839_p6, %p5833_p3 }
  0x84   :  { %5843 = shalt.err (!%p5840_p7)
}
  0x85   :  { %s7258_s5 = sld [smem:[#allocation44_spill]]  ;;  %s5998_s20 = smov [#allocation12]  }
  0x86   :  { %s127_s3 = sshll.u32 %s5998_s20, 4  ;;  %s5999_s6 = smov [#allocation15]   ;;  %s128_s3 = int_to_ptr.vmem [resolvable:$true] %s127_s3 }
  0x87   :  { %s151_s10 = sshll.u32 %s5999_s6, 4  ;;  %s5852_s0 = scalar_lea.vmem %s128_s3, 32  ;;  %s152_s10 = int_to_ptr.vmem [resolvable:$true] %s151_s10 }
  0x88   :  { %p5853_p8 = scmp.ne.s32.totalorder %s128_s3, %s5852_s0  ;;  %p5857_p9 = scmp.lt.s32.totalorder %s128_s3, %s128_s3 }
  0x89   :  { %p5858_p10 = scmp.lt.s32.totalorder %s5852_s0, %s5852_s0 }
  0x8b   :  { %105 = dma.hbm_to_vmem [thread:$0]  %s7258_s5, 32, %s100_s23, [#allocation8], %s5984_s2, %s5984_s2, %s5985_s7  }
  0x8c   :  { %p5859_p11 = por %p5858_p10, %p5857_p9 }
  0x8e   :  { %p5860_p12 = pnand %p5859_p11, %p5853_p8 }
  0x90   :  { %5863 = shalt.err (!%p5860_p12)
}
  0x91   :  { %s7259_s29 = sld [smem:[#allocation48_spill]]  ;;  %s5872_s23 = scalar_lea.vmem %s152_s10, 32 }
  0x92   :  { %p5873_p13 = scmp.ne.s32.totalorder %s152_s10, %s5872_s23  ;;  %p5877_p0 = scmp.lt.s32.totalorder %s152_s10, %s152_s10 }
  0x93   :  { %p5878_p1 = scmp.lt.s32.totalorder %s5872_s23, %s5872_s23 }
  0x95   :  { %p5879_p2 = por %p5878_p1, %p5877_p0 }
  0x97   :  { %133 = dma.hbm_to_vmem [thread:$0]  %s7259_s29, 32, %s128_s3, [#allocation11], %s5984_s2, %s5984_s2, %s5985_s7  }
  0x98   :  { %p5880_p3 = pnand %p5879_p2, %p5873_p13 }
  0x9a   :  { %5883 = shalt.err (!%p5880_p3)
}
  0x9b   :  { %157 = dma.hbm_to_vmem [thread:$0]  %s7217_s14, 32, %s152_s10, [#allocation14], %s5984_s2, %s5984_s2, %s5985_s7  }
  0x9c   :  { %s6000_s1 = smov [#allocation18]   ;;  %s6001_s12 = smov [#allocation21]  }
  0x9d   :  { %s182_s18 = sshll.u32 %s6000_s1, 4  ;;  %s204_s4 = sshll.u32 %s6001_s12, 4  ;;  %s183_s18 = int_to_ptr.vmem [resolvable:$true] %s182_s18  ;;  %s205_s4 = int_to_ptr.vmem [resolvable:$true] %s204_s4 }
  0x9e   :  { %s5892_s8 = scalar_lea.vmem %s183_s18, 16  ;;  %s5896_s9 = scalar_lea.vmem %s183_s18, 32 }
  0x9f   :  { %p5893_p4 = scmp.ne.s32.totalorder %s183_s18, %s5892_s8  ;;  %p5897_p5 = scmp.lt.s32.totalorder %s183_s18, %s183_s18 }
  0xa0   :  { %p5898_p6 = scmp.lt.s32.totalorder %s5896_s9, %s5892_s8 }
  0xa2   :  { %p5899_p7 = por %p5898_p6, %p5897_p5 }
  0xa4   :  { %p5900_p8 = pnand %p5899_p7, %p5893_p4 }
  0xa6   :  { %5903 = shalt.err (!%p5900_p8)
}
  0xa7   :  { %185 = dma.hbm_to_vmem [thread:$0]  %s7222_s19, 16, %s183_s18, [#allocation17]  }
  0xa8   :  { %s5912_s3 = scalar_lea.vmem %s205_s4, 16  ;;  %s5916_s14 = scalar_lea.vmem %s205_s4, 32 }
  0xa9   :  { %p5913_p9 = scmp.ne.s32.totalorder %s205_s4, %s5912_s3  ;;  %p5917_p10 = scmp.lt.s32.totalorder %s205_s4, %s205_s4 }
  0xaa   :  { %p5918_p11 = scmp.lt.s32.totalorder %s5916_s14, %s5912_s3 }
  0xac   :  { %p5919_p12 = por %p5918_p11, %p5917_p10 }
  0xae   :  { %p5920_p13 = pnand %p5919_p12, %p5913_p9 }
  0xb0   :  { %5923 = shalt.err (!%p5920_p13)
}
  0xb1   :  { %207 = dma.hbm_to_vmem [thread:$0]  %s7225_s22, 16, %s205_s4, [#allocation20]  }
  0xb2   :  { %s6002_s6 = smov [#allocation24]   ;;  %s6003_s0 = smov [#allocation25]  }
  0xb3   :  { %s224_s10 = sshll.u32 %s6002_s6, 4  ;;  %s234_s28 = sshll.u32 %s6003_s0, 4  ;;  %s225_s10 = int_to_ptr.vmem [resolvable:$true] %s224_s10  ;;  %s235_s28 = int_to_ptr.vmem [resolvable:$true] %s234_s28 }
  0xb4   :  { %s5932_s11 = scalar_lea.vmem %s225_s10, 16  ;;  %s5936_s19 = scalar_lea.vmem %s225_s10, 32 }
  0xb5   :  { %p5933_p0 = scmp.ne.s32.totalorder %s225_s10, %s5932_s11  ;;  %p5937_p1 = scmp.lt.s32.totalorder %s225_s10, %s225_s10 }
  0xb6   :  { %p5938_p2 = scmp.lt.s32.totalorder %s5936_s19, %s5932_s11 }
  0xb8   :  { %p5939_p3 = por %p5938_p2, %p5937_p1 }
  0xba   :  { %p5940_p4 = pnand %p5939_p3, %p5933_p0 }
  0xbc   :  { %5943 = shalt.err (!%p5940_p4)
}
  0xbd   :  { %227 = dma.hbm_to_vmem [thread:$0]  %s7227_s24, 16, %s225_s10, [#allocation23]  }
  0xbe   :  { %s5952_s13 = scalar_lea.vmem %s235_s28, 16  ;;  %s5956_s22 = scalar_lea.vmem %s235_s28, 32 }
  0xbf   :  { %p5953_p5 = scmp.ne.s32.totalorder %s235_s28, %s5952_s13  ;;  %p5957_p6 = scmp.lt.s32.totalorder %s235_s28, %s235_s28 }
  0xc0   :  { %p5958_p7 = scmp.lt.s32.totalorder %s5956_s22, %s5952_s13 }
  0xc2   :  { %p5959_p8 = por %p5958_p7, %p5957_p6 }
  0xc4   :  { %p5960_p9 = pnand %p5959_p8, %p5953_p5 }
  0xc6   :  { %5963 = shalt.err (!%p5960_p9)
}
  0xc7   :  { %237 = dma.hbm_to_vmem [thread:$0]  %s7228_s25, 16, %s235_s28, [#allocation26]  }
  0xc8   :  { %5964 = dma.done.wait [#allocation3], 6144  }
  0xc9   :  { %5965 = vsyncadd [#allocation3], 4294961152 }
  0xca   :  { %5966 = dma.done.wait [#allocation5], 32  }
  0xcb   :  { %5967 = vsyncadd [#allocation5], 4294967264 }
  0xcc   :  { %5968 = dma.done.wait [#allocation8], 64  }
  0xcd   :  { %5969 = vsyncadd [#allocation8], 4294967232 }
  0xce   :  { %5970 = dma.done.wait [#allocation11], 6176  }
  0xcf   :  { %5971 = vsyncadd [#allocation11], 4294961120 }
  0xd0   :  { %5972 = dma.done.wait [#allocation14], 64  }
  0xd1   :  { %5973 = vsyncadd [#allocation14], 4294967232 }
  0xd2   :  { %5974 = dma.done.wait [#allocation17], 48  }
  0xd3   :  { %5975 = vsyncadd [#allocation17], 4294967248 }
  0xd4   :  { %5976 = dma.done.wait [#allocation20], 32  }
  0xd5   :  { %5977 = vsyncadd [#allocation20], 4294967264 }
  0xd6   :  { %5978 = dma.done.wait [#allocation23], 32  }
  0xd7   :  { %5979 = vsyncadd [#allocation23], 4294967264 }
  0xd8   :  { %5980 = dma.done.wait [#allocation26], 16  }
  0xd9   :  { %5981 = vsyncadd [#allocation26], 4294967280  ;;  %v5153_v0 = vld [vmem:[#allocation2 + $0x78] sm:$0xff]   ;;  %v5157_v4 = vld [vmem:[#allocation2 + $0x70] sm:$0xff]   ;;  %s7260_s18 = sld [smem:[#allocation36_spill]]  ;;  %vm6006_vm0 = vmmov 0  }
  0xda   :  { %v5154_v1 = vld [vmem:[#allocation2 + $0x38] sm:$0xff]   ;;  %4711 = vmatprep.subr.bf16.mxu0 %v5153_v0  ;;  %v5158_v5 = vld [vmem:[#allocation2 + $0x30] sm:$0xff]   ;;  %v5161_v8 = vld [vmem:[#allocation2 + $0x68] sm:$0xff]   ;;  %s7261_s0 = sld [smem:[#allocation37_spill]]  ;;  %vm1290_vm1 = vcmask 130048   ;;  %vm3827_vm2 = vcmask 1041408  }
  0xdb   :  { %v5155_v2 = vld [vmem:[#allocation2 + $0xf8] sm:$0xff]   ;;  %4712 = vmatpush3.bf16.msra.mxu0 %v5154_v1  ;;  %v5159_v6 = vld [vmem:[#allocation2 + $0xf0] sm:$0xff]   ;;  %v5162_v9 = vld [vmem:[#allocation2 + $0x28] sm:$0xff]   ;;  %s7262_s23 = sld [smem:[#allocation46_spill]]  ;;  %vm3819_vm3 = vcmask 1040384   ;;  %vm4261_vm4 = vcmask 1043456  }
  0xdc   :  { %v5156_v3 = vld [vmem:[#allocation2 + $0xb8] sm:$0xff]   ;;  %4733 = vmatprep.subr.bf16.mxu1 %v5155_v2  ;;  %4713 = vmatprep.subr.bf16.mxu0 %v5157_v4  ;;  %v5160_v7 = vld [vmem:[#allocation2 + $0xb0] sm:$0xff]   ;;  %v5163_v10 = vld [vmem:[#allocation2 + $0xe8] sm:$0xff]   ;;  %s7263_s30 = sld [smem:[#allocation39_spill]]  ;;  %vm4263_vm5 = vcmask 1045504  }
  0xdd   :  { %4734 = vmatpush3.bf16.msra.mxu1 %v5156_v3  ;;  %v5164_v11 = vld [vmem:[#allocation2 + $0xa8] sm:$0xff]   ;;  %v5165_v12 = vld [vmem:[#allocation2 + $0x60] sm:$0xff]   ;;  %v5169_v16 = vld [vmem:[#allocation2 + $0x58] sm:$0xff]   ;;  %s7265_s3 = sld [smem:[#allocation47_spill]] }
  0xde   :  { %4735 = vmatprep.subr.bf16.mxu1 %v5159_v6  ;;  %v5166_v13 = vld [vmem:[#allocation2 + $0x20] sm:$0xff]   ;;  %v5170_v17 = vld [vmem:[#allocation2 + $0x18] sm:$0xff]   ;;  %v5173_v20 = vld [vmem:[#allocation2 + $0x50] sm:$0xff]   ;;  %s7266_s12 = sld [smem:[#allocation49_spill]] }
  0xdf   :  { %4714 = vmatpush3.bf16.msra.mxu0 %v5158_v5  ;;  %v5167_v14 = vld [vmem:[#allocation2 + $0xe0] sm:$0xff]   ;;  %v5171_v18 = vld [vmem:[#allocation2 + $0xd8] sm:$0xff]   ;;  %v5174_v21 = vld [vmem:[#allocation2 + $0x10] sm:$0xff]  }
  0xe0   :  { %4715 = vmatprep.subr.bf16.mxu0 %v5161_v8  ;;  %v5168_v15 = vld [vmem:[#allocation2 + $0xa0] sm:$0xff]   ;;  %v5172_v19 = vld [vmem:[#allocation2 + $0x98] sm:$0xff]   ;;  %v5175_v22 = vld [vmem:[#allocation2 + $0xd0] sm:$0xff]  }
  0xe1   :  { %4736 = vmatpush3.bf16.msra.mxu1 %v5160_v7  ;;  %v5176_v23 = vld [vmem:[#allocation2 + $0x90] sm:$0xff]   ;;  %v5177_v24 = vld [vmem:[#allocation2 + $0x48] sm:$0xff]   ;;  %v5181_v28 = vld [vmem:[#allocation2 + $0x40] sm:$0xff]  }
  0xe2   :  { %4737 = vmatprep.subr.bf16.mxu1 %v5163_v10  ;;  %v5178_v25 = vld [vmem:[#allocation2 + $0x8] sm:$0xff]   ;;  %v5182_v29 = vld [vmem:[#allocation2] sm:$0xff]   ;;  %v5188_v34 = vld [vmem:[#allocation2 + $0x178] sm:$0xff]  }
  0xe3   :  { %4716 = vmatpush3.bf16.msra.mxu0 %v5162_v9  ;;  %v5179_v26 = vld [vmem:[#allocation2 + $0xc8] sm:$0xff]   ;;  %v5183_v30 = vld [vmem:[#allocation2 + $0xc0] sm:$0xff]   ;;  %v5192_v37 = vld [vmem:[#allocation2 + $0x138] sm:$0xff]  }
  0xe4   :  { %4717 = vmatprep.subr.bf16.mxu0 %v5165_v12  ;;  %v5180_v27 = vld [vmem:[#allocation2 + $0x88] sm:$0xff]   ;;  %v5184_v31 = vld [vmem:[%s7260_s18] ss:$24 sps:$4 sm:$0xff]   ;;  %v5186_v32 = vld [vmem:[%s7260_s18 + $0x4] ss:$24 sps:$4 sm:$0xff]  }
  0xe5   :  { %4738 = vmatpush3.bf16.msra.mxu1 %v5164_v11  ;;  %v5187_v33 = vld [vmem:[#allocation2 + $0x80] sm:$0xff]   ;;  %761 = vmatprep.mubr.bf16.mxu0 %v5186_v32  ;;  %v5193_v38 = vld [vmem:[#allocation2 + $0x170] sm:$0xff]   ;;  %v5195_v40 = vld [vmem:[#allocation2 + $0x168] sm:$0xff]  }
  0xe6   :  { %4739 = vmatprep.subr.bf16.mxu1 %v5167_v14  ;;  %v5189_v35 = vld [vmem:[%s7260_s18 + $0x8] ss:$24 sps:$4 sm:$0xff]   ;;  %v5191_v36 = vld [vmem:[%s7260_s18 + $0xc] ss:$24 sps:$4 sm:$0xff]   ;;  %v5194_v39 = vld [vmem:[#allocation2 + $0x130] sm:$0xff]  }
  0xe7   :  { %4718 = vmatpush3.bf16.msra.mxu0 %v5166_v13  ;;  %802 = vmatprep.mubr.bf16.mxu1 %v5191_v36  ;;  %v5196_v41 = vld [vmem:[#allocation2 + $0x128] sm:$0xff]   ;;  %v5197_v42 = vld [vmem:[#allocation2 + $0x160] sm:$0xff]   ;;  %v5199_v44 = vld [vmem:[#allocation2 + $0x158] sm:$0xff]  }
  0xe8   :  { %4719 = vmatprep.subr.bf16.mxu0 %v5169_v16  ;;  %v5198_v43 = vld [vmem:[#allocation2 + $0x120] sm:$0xff]   ;;  %v5200_v45 = vld [vmem:[#allocation2 + $0x118] sm:$0xff]   ;;  %v5201_v46 = vld [vmem:[#allocation2 + $0x150] sm:$0xff]  }
  0xe9   :  { %4740 = vmatpush3.bf16.msra.mxu1 %v5168_v15  ;;  %v5209_v47 = vld [vmem:[%s7260_s18 + $0x14] ss:$24 sps:$4 sm:$0xff]   ;;  %v5205_v51 = vld [vmem:[#allocation2 + $0x140] sm:$0xff]   ;;  %v5207_v53 = vld [vmem:[%s7260_s18 + $0x10] ss:$24 sps:$4 sm:$0xff]  }
  0xea   :  { %4741 = vmatprep.subr.bf16.mxu1 %v5171_v18  ;;  %v5202_v48 = vld [vmem:[#allocation2 + $0x110] sm:$0xff]   ;;  %v5203_v49 = vld [vmem:[#allocation2 + $0x148] sm:$0xff]   ;;  %v5206_v52 = vld [vmem:[#allocation2 + $0x100] sm:$0xff]  }
  0xeb   :  { %4720 = vmatpush3.bf16.msra.mxu0 %v5170_v17  ;;  %v5204_v50 = vld [vmem:[#allocation2 + $0x108] sm:$0xff]   ;;  %v409_v60 = vld [vmem:[%s7261_s0] sm:$0xff] }
  0xec   :  { %4721 = vmatprep.subr.bf16.mxu0 %v5173_v20  ;;  %v410_v2 = vld [vmem:[%s7261_s0 + $0x8] sm:$0xff]  ;;  %s7264_s0 = sld [smem:[#allocation38_spill]] }
  0xed   :  { %4742 = vmatpush3.bf16.msra.mxu1 %v5172_v19 }
  0xee   :  { %4743 = vmatprep.subr.bf16.mxu1 %v5175_v22 }
  0xef   :  { %4722 = vmatpush3.bf16.msra.mxu0 %v5174_v21 }
  0xf0   :  { %4723 = vmatprep.subr.bf16.mxu0 %v5177_v24 }
  0xf1   :  { %4744 = vmatpush3.bf16.msra.mxu1 %v5176_v23 }
  0xf2   :  { %4745 = vmatprep.subr.bf16.mxu1 %v5179_v26 }
  0xf3   :  { %4724 = vmatpush3.bf16.msra.mxu0 %v5178_v25 }
  0xf4   :  { %4725 = vmatprep.subr.bf16.mxu0 %v5181_v28 }
  0xf5   :  { %4746 = vmatpush3.bf16.msra.mxu1 %v5180_v27 }
  0xf6   :  { %4747 = vmatprep.subr.bf16.mxu1 %v5183_v30 }
  0xf7   :  { %4726 = vmatpush3.bf16.msra.mxu0 %v5182_v29 }
  0xf8   :  { %4755 = vmatprep.subr.bf16.mxu0 %v5188_v34 }
  0xf9   :  { %4748 = vmatpush3.bf16.msra.mxu1 %v5187_v33  ;;  %v4338_v33 = vld [vmem:[#allocation6] ss:$0 sm:$0xff] }
  0xfa   :  { %762 = vmatmul.mubr.bf16.vlgmr.msra.gmra.mxu0 %v5184_v31  ;;  %v4337_v31 = vld [vmem:[#allocation4] ss:$0 sm:$0xff] }
  0xfb   :  { %4756 = vmatpush3.bf16.msra.mxu0 %v5192_v37  ;;  %843 = vmatprep.mubr.bf16.mxu0 %v5209_v47 }
  0xfc   :  { %803 = vmatmul.mubr.bf16.vlgmr.msra.gmra.mxu1 %v5189_v35  ;;  %4757 = vmatprep.subr.bf16.mxu0 %v5193_v38 }
  0xff   :  { %4758 = vmatpush3.bf16.msra.mxu0 %v5194_v39 }
 0x100   :  { %4759 = vmatprep.subr.bf16.mxu0 %v5195_v40  ;;  %v5210_v40 = vld [vmem:[#allocation10 + $0xa8] ss:$12 sps:$4 sm:$0xff]  }
 0x103   :  { %4760 = vmatpush3.bf16.msra.mxu0 %v5196_v41  ;;  %v5212_v41 = vld [vmem:[#allocation10 + $0xac] ss:$12 sps:$4 sm:$0xff]  }
 0x104   :  { %4761 = vmatprep.subr.bf16.mxu0 %v5197_v42  ;;  %v6004_v42 = vmov 0.0   ;;  %1111 = vmatprep.subr.bf16.mxu1 %v5212_v41 }
 0x105   :  { %1112 = vmatpush1.bf16.msra.mxu1 %v5210_v40 }
 0x107   :  { %4762 = vmatpush3.bf16.msra.mxu0 %v5198_v43  ;;  %v5213_v43 = vld [vmem:[#allocation10 + $0xb0] ss:$12 sps:$4 sm:$0xff]  }
 0x108   :  { %4763 = vmatprep.subr.bf16.mxu0 %v5199_v44 }
 0x10b   :  { %4764 = vmatpush3.bf16.msra.mxu0 %v5200_v45 }
 0x10c   :  { %4765 = vmatprep.subr.bf16.mxu0 %v5201_v46 }
 0x10f   :  { %4766 = vmatpush3.bf16.msra.mxu0 %v5202_v48 }
 0x110   :  { %4767 = vmatprep.subr.bf16.mxu0 %v5203_v49 }
 0x113   :  { %4768 = vmatpush3.bf16.msra.mxu0 %v5204_v50 }
 0x114   :  { %4769 = vmatprep.subr.bf16.mxu0 %v5205_v51 }
 0x117   :  { %4770 = vmatpush3.bf16.msra.mxu0 %v5206_v52  ;;  %v5216_v52 = vld [vmem:[#allocation10 + $0x94] ss:$12 sps:$4 sm:$0xff]  }
 0x118   :  { %4948 = vmatprep.subr.bf16.mxu0 %v6004_v42  ;;  %1113 = vmatprep.subr.bf16.mxu1 %v5216_v52 }
 0x11a   :  { %844 = vmatmul.mubr.bf16.vlgmr.msra.gmra.mxu0 %v5207_v53  ;;  %v5214_v53 = vld [vmem:[#allocation10 + $0x90] ss:$12 sps:$4 sm:$0xff]  }
 0x11b   :  { %4949 = vmatpush3.bf16.msra.mxu0 %v5213_v43  ;;  %1114 = vmatpush1.bf16.msra.mxu1 %v5214_v53 }
 0x11c   :  { %4950 = vmatprep.subr.bf16.mxu0 %v6004_v42  ;;  %4964 = vmatprep.mubr.msk.bf16.mxu0 %vm6006_vm0, %v6004_v42 }
 0x1ba   :  { %v4727_v54 = vpop.f32.mrf.mxu0 }
 0x1bc   :  { %v4728_v55 = vpop.f32.mrf.mxu0  ;;  %v4749_v56 = vpop.f32.mrf.mxu1 }
 0x1bd   :  { %v4729_v59 = vadd.f32 %v4728_v55, %v4727_v54  ;;  %v5217_v54 = vld [vmem:[#allocation10 + $0x98] ss:$12 sps:$4 sm:$0xff]   ;;  %v5220_v55 = vld [vmem:[#allocation10 + $0x7c] ss:$12 sps:$4 sm:$0xff]  }
 0x1be   :  { %v4730_v57 = vpop.f32.mrf.mxu0  ;;  %v4750_v58 = vpop.f32.mrf.mxu1  ;;  %4951 = vmatpush3.bf16.msra.mxu0 %v5217_v54  ;;  %1115 = vmatprep.subr.bf16.mxu1 %v5220_v55 }
 0x1bf   :  { %v764_v63 = vadd.f32 %v4729_v59, %v409_v60  ;;  %v4751_v0 = vadd.f32 %v4750_v58, %v4749_v56  ;;  %4952 = vmatprep.subr.bf16.mxu0 %v6004_v42  ;;  %v5218_v56 = vld [vmem:[#allocation10 + $0x78] ss:$12 sps:$4 sm:$0xff]   ;;  %v5222_v58 = vld [vmem:[#allocation10 + $0x60] ss:$12 sps:$4 sm:$0xff]   ;;  %v5225_v60 = vld [vmem:[#allocation10 + $0x68] ss:$12 sps:$4 sm:$0xff]  }
 0x1c0   :  { %v4731_v61 = vpop.f32.mrf.mxu0  ;;  %v4752_v62 = vpop.f32.mrf.mxu1  ;;  %1116 = vmatpush1.bf16.msra.mxu1 %v5218_v56  ;;  %v5224_v59 = vld [vmem:[#allocation10 + $0x64] ss:$12 sps:$4 sm:$0xff]  }
 0x1c1   :  { %v4732_v1 = vadd.f32 %v4731_v61, %v4730_v57  ;;  %v805_v6 = vadd.f32 %v4751_v0, %v764_v63  ;;  %v5221_v57 = vld [vmem:[#allocation10 + $0x80] ss:$12 sps:$4 sm:$0xff]   ;;  %1117 = vmatprep.subr.bf16.mxu1 %v5224_v59  ;;  %v5229_v63 = vld [vmem:[#allocation10 + $0x50] ss:$12 sps:$4 sm:$0xff]  }
 0x1c2   :  { %v4753_v3 = vpop.f32.mrf.mxu1  ;;  %4953 = vmatpush3.bf16.msra.mxu0 %v5221_v57  ;;  %v5228_v61 = vld [vmem:[#allocation10 + $0x4c] ss:$12 sps:$4 sm:$0xff]   ;;  %v5232_v0 = vld [vmem:[#allocation10 + $0x34] ss:$12 sps:$4 sm:$0xff]  }
 0x1c3   :  { %v767_v7 = vadd.f32 %v4732_v1, %v410_v2  ;;  %v4754_v8 = vadd.f32 %v4753_v3, %v4752_v62  ;;  %4954 = vmatprep.subr.bf16.mxu0 %v6004_v42  ;;  %v5226_v62 = vld [vmem:[#allocation10 + $0x48] ss:$12 sps:$4 sm:$0xff]   ;;  %v6005_v1 = vmov 0   ;;  %v5230_v2 = vld [vmem:[#allocation10 + $0x30] ss:$12 sps:$4 sm:$0xff]  }
 0x1c4   :  { %1118 = vmatpush1.bf16.msra.mxu1 %v5222_v58  ;;  %1143 = vmatprep.mubr.bf16.mxu1 %v6005_v1  ;;  %v5233_v3 = vld [vmem:[#allocation10 + $0x38] ss:$12 sps:$4 sm:$0xff]   ;;  %v6304_v59 = vld [vmem:[%s7263_s30 + $0x18] sm:$0xff] }
 0x1c5   :  { %v808_v13 = vadd.f32 %v4754_v8, %v767_v7  ;;  %1119 = vmatprep.subr.bf16.mxu1 %v5228_v61  ;;  %v5240_v7 = vld [vmem:[#allocation10 + $0x4] ss:$12 sps:$4 sm:$0xff]   ;;  %v5238_v8 = vld [vmem:[#allocation10] ss:$12 sps:$4 sm:$0xff]  }
 0x1c6   :  { %4955 = vmatpush3.bf16.msra.mxu0 %v5225_v60  ;;  %v6309_v61 = vld [vmem:[%s7263_s30 + $0x28] sm:$0xff] }
 0x1c7   :  { %4956 = vmatprep.subr.bf16.mxu0 %v6004_v42 }
 0x1c8   :  { %1120 = vmatpush1.bf16.msra.mxu1 %v5226_v62  ;;  %v6314_v62 = vld [vmem:[%s7263_s30 + $0x10] sm:$0xff] }
 0x1c9   :  { %1121 = vmatprep.subr.bf16.mxu1 %v5232_v0  ;;  %v6320_v0 = vld [vmem:[%s7263_s30 + $0x20] sm:$0xff] }
 0x1ca   :  { %4957 = vmatpush3.bf16.msra.mxu0 %v5229_v63 }
 0x1cb   :  { %4958 = vmatprep.subr.bf16.mxu0 %v6004_v42 }
 0x1cc   :  { %1122 = vmatpush1.bf16.msra.mxu1 %v5230_v2 }
 0x1ce   :  { %4959 = vmatpush3.bf16.msra.mxu0 %v5233_v3 }
 0x1cf   :  { %4960 = vmatprep.subr.bf16.mxu0 %v6004_v42 }
 0x1da   :  { %v4771_v4 = vpop.f32.mrf.mxu0 }
 0x1dc   :  { %v4772_v5 = vpop.f32.mrf.mxu0 }
 0x1dd   :  { %v4773_v9 = vadd.f32 %v4772_v5, %v4771_v4  ;;  %v5236_v4 = vld [vmem:[#allocation10 + $0x1c] ss:$12 sps:$4 sm:$0xff]   ;;  %v5234_v5 = vld [vmem:[#allocation10 + $0x18] ss:$12 sps:$4 sm:$0xff]  }
 0x1de   :  { %v4774_v10 = vpop.f32.mrf.mxu0  ;;  %1123 = vmatprep.subr.bf16.mxu1 %v5236_v4 }
 0x1df   :  { %v846_v11 = vadd.f32 %v4773_v9, %v805_v6  ;;  %v5237_v6 = vld [vmem:[#allocation10 + $0x20] ss:$12 sps:$4 sm:$0xff]   ;;  %1124 = vmatpush1.bf16.msra.mxu1 %v5234_v5  ;;  %v5241_v9 = vld [vmem:[#allocation10 + $0x8] ss:$12 sps:$4 sm:$0xff]  }
 0x1e0   :  { %v4775_v12 = vpop.f32.mrf.mxu0  ;;  %4961 = vmatpush3.bf16.msra.mxu0 %v5237_v6  ;;  %1125 = vmatprep.subr.bf16.mxu1 %v5240_v7  ;;  %v6328_v7 = vld [vmem:[%s7263_s30 + $0x38] sm:$0xff] }
 0x1e1   :  { %v4776_v14 = vadd.f32 %v4775_v12, %v4774_v10  ;;  %854 = vadd.xlane.f32.xlu0 %v846_v11  ;;  %4962 = vmatprep.subr.bf16.mxu0 %v6004_v42 }
 0x1e3   :  { %v849_v15 = vadd.f32 %v4776_v14, %v808_v13  ;;  %1126 = vmatpush1.bf16.msra.mxu1 %v5238_v8  ;;  %v6333_v8 = vld [vmem:[%s7263_s30 + $0x30] sm:$0xff] }
 0x1e4   :  { %4963 = vmatpush3.bf16.msra.mxu0 %v5241_v9 }
 0x1e5   :  { %856 = vadd.xlane.f32.xlu0 %v849_v15 }
 0x26a   :  { %v855_v16 = vpop.xlane.xlu0 %854 }
 0x26b   :  { %v859_v17 = vmul.f32 0.0078125, %v855_v16 }
 0x26d   :  { %v861_v18 = vsub.f32 %v846_v11, %v859_v17 }
 0x26e   :  { %v857_v19 = vpop.xlane.xlu0 %856 }
 0x26f   :  { %v860_v20 = vmul.f32 0.0078125, %v857_v19  ;;  %v863_v21 = vmul.f32 %v861_v18, %v861_v18 }
 0x271   :  { %v862_v22 = vsub.f32 %v849_v15, %v860_v20  ;;  %865 = vadd.xlane.f32.xlu1 %v863_v21 }
 0x273   :  { %v864_v23 = vmul.f32 %v862_v22, %v862_v22 }
 0x275   :  { %867 = vadd.xlane.f32.xlu1 %v864_v23 }
 0x2fa   :  { %v866_v24 = vpop.xlane.xlu1 %865 }
 0x2fb   :  { %v869_v25 = vmul.f32 0.0078125, %v866_v24 }
 0x2fd   :  { %v871_v26 = vadd.f32 1e-05, %v869_v25 }
 0x2fe   :  { %v868_v27 = vpop.xlane.xlu1 %867 }
 0x2ff   :  { %5474 = vrsqrt.f32 %v871_v26  ;;  %v870_v28 = vmul.f32 0.0078125, %v868_v27  ;;  %v968_v27 = vlaneseq }
 0x301   :  { %v872_v29 = vadd.f32 1e-05, %v870_v28  ;;  %v6272_v28 = vshrl.u32 %v968_v27, 7 }
 0x303   :  { %5476 = vrsqrt.f32 %v872_v29  ;;  %v6275_v29 = vsub.s32 0, %v6272_v28 }
 0x30c   :  { %v5475_v30 = vpop.eup %5474 }
 0x30d   :  { %v875_v32 = vmul.f32 %v5475_v30, %v861_v18  ;;  %v4339_v18 = vld [vmem:[#allocation7] ss:$0 sm:$0xff]  ;;  %v966_v30 = vld [vmem:[%s7262_s23] sm:$0x7] }
 0x30f   :  { %v883_v34 = vmul.f32 %v4337_v31, %v875_v32  ;;  %v971_v32 = vrot.slane %v966_v30, %v6275_v29 }
 0x310   :  { %v5477_v35 = vpop.eup %5476 }
 0x311   :  { %v6242_v36 = vadd.f32 %v4338_v33, %v883_v34  ;;  %v876_v37 = vmul.f32 %v5477_v35, %v862_v22  ;;  %v4340_v22 = vld [vmem:[#allocation9] ss:$0 sm:$0xff]  ;;  %v6285_v35 = vsub.s32 2, %v6272_v28 }
 0x313   :  { %895 = vadd.xlane.f32.xlu0 %v6242_v36  ;;  %v884_v38 = vmul.f32 %v4337_v31, %v876_v37  ;;  %v6281_v31 = vsub.s32 1, %v6272_v28 }
 0x315   :  { %v6245_v39 = vadd.f32 %v4338_v33, %v884_v38  ;;  %v975_v37 = vrot.slane %v966_v30, %v6281_v31 }
 0x317   :  { %897 = vadd.xlane.f32.xlu1 %v6245_v39 }
 0x39c   :  { %v896_v44 = vpop.xlane.xlu0 %895 }
 0x39d   :  { %v899_v45 = vmul.f32 0.0078125, %v896_v44 }
 0x39f   :  { %v6251_v46 = vsub.f32 %v6242_v36, %v899_v45  ;;  %v6291_v45 = vld [vmem:[%s7263_s30] sm:$0xff] }
 0x3a0   :  { %v898_v47 = vpop.xlane.xlu1 %897 }
 0x3a1   :  { %v900_v48 = vmul.f32 0.0078125, %v898_v47  ;;  %v903_v49 = vmul.f32 %v6251_v46, %v6251_v46  ;;  %v979_v47 = vrot.slane %v966_v30, %v6285_v35 }
 0x3a3   :  { %v6256_v50 = vsub.f32 %v6245_v39, %v900_v48  ;;  %905 = vadd.xlane.f32.xlu0 %v903_v49 }
 0x3a5   :  { %v904_v51 = vmul.f32 %v6256_v50, %v6256_v50 }
 0x3a7   :  { %907 = vadd.xlane.f32.xlu1 %v904_v51 }
 0x42c   :  { %v906_v10 = vpop.xlane.xlu0 %905 }
 0x42d   :  { %v909_v11 = vmul.f32 0.0078125, %v906_v10 }
 0x42f   :  { %v911_v12 = vadd.f32 1e-05, %v909_v11 }
 0x430   :  { %v908_v13 = vpop.xlane.xlu1 %907 }
 0x431   :  { %5478 = vrsqrt.f32 %v911_v12  ;;  %v910_v14 = vmul.f32 0.0078125, %v908_v13 }
 0x433   :  { %v912_v15 = vadd.f32 1e-05, %v910_v14  ;;  %v299_v14 = vld [vmem:[%s7264_s0] sm:$0xff] }
 0x435   :  { %5480 = vrsqrt.f32 %v912_v15 }
 0x43e   :  { %v5479_v16 = vpop.eup %5478 }
 0x43f   :  { %v915_v17 = vmul.f32 %v5479_v16, %v6251_v46  ;;  %v6296_v46 = vld [vmem:[%s7263_s30 + $0x8] sm:$0xff] }
 0x441   :  { %v923_v21 = vmul.f32 %v4339_v18, %v915_v17 }
 0x442   :  { %v5481_v19 = vpop.eup %5480 }
 0x443   :  { %v916_v20 = vmul.f32 %v5481_v19, %v6256_v50  ;;  %v931_v24 = vadd.f32 %v4340_v22, %v923_v21 }
 0x445   :  { %v924_v23 = vmul.f32 %v4339_v18, %v916_v20  ;;  %v301_v18 = vld [vmem:[%s7264_s0 + $0x10] sm:$0xff] }
 0x447   :  { %v932_v25 = vadd.f32 %v4340_v22, %v924_v23  ;;  %v300_v22 = vld [vmem:[%s7264_s0 + $0x8] sm:$0xff] }
 0x449   :  { %v965_v26 = vpack.c.bf16 %v932_v25, %v931_v24 }
 0x44b   :  { %1144 = vmatmul.mubr.bf16.vlgmr.msra.gmra.mxu1 %v965_v26  ;;  %4965 = vmatmul.mubr.bf16.vlgmr.msra.gmra.mxu0 %v965_v26  ;;  %v302_v26 = vld [vmem:[%s7264_s0 + $0x18] sm:$0xff] }
 0x44c   :  { %1878 = vmatprep.mubr.bf16.mxu0 %v6005_v1 }
 0x50b   :  { %v1145_v33 = vpop.f32.mrf.mxu1  ;;  %v1188_v34 = vpop.f32.mrf.mxu0 }
 0x50c   :  { %v1146_v41 = vadd.f32 %v1145_v33, %v971_v32  ;;  %v1189_v56 = vadd.f32 %v1188_v34, %v979_v47  ;;  %v303_v34 = vld [vmem:[%s7264_s0 + $0x20] sm:$0xff] }
 0x50d   :  { %v1147_v38 = vpop.f32.mrf.mxu1  ;;  %v4966_v40 = vpop.f32.mrf.mxu0 }
 0x50e   :  { %v1148_v49 = vadd.f32 %v1147_v38, %v975_v37  ;;  %v1197_v54 = vmul.f32 %v1146_v41, %v6291_v45  ;;  %v1199_v3 = vmul.f32 %v1146_v41, %v6314_v62  ;;  %v1201_v4 = vmul.f32 %v1146_v41, %v6320_v0 }
 0x50f   :  { %v1149_v43 = vpop.f32.mrf.mxu1  ;;  %v1191_v44 = vpop.f32.mrf.mxu0  ;;  %v1203_v10 = vmul.f32 %v1146_v41, %v6333_v8 }
 0x510   :  { %v1150_v48 = vadd.f32 %v1149_v43, %v971_v32  ;;  %v1192_v52 = vadd.f32 %v1191_v44, %v979_v47  ;;  %v305_v44 = vld [vmem:[%s7264_s0 + $0x30] sm:$0xff] }
 0x511   :  { %v1151_v50 = vpop.f32.mrf.mxu1  ;;  %v4967_v51 = vpop.f32.mrf.mxu0 }
 0x512   :  { %v1152_v53 = vadd.f32 %v1151_v50, %v975_v37  ;;  %v1198_v55 = vmul.f32 %v1150_v48, %v6296_v46  ;;  %v1196_v60 = vpack.c.bf16 %v1192_v52, %v1189_v56  ;;  %v1200_v63 = vmul.f32 %v1150_v48, %v6304_v59  ;;  %v304_v50 = vld [vmem:[%s7264_s0 + $0x28] sm:$0xff] }
 0x513   :  { %v1202_v2 = vmul.f32 %v1150_v48, %v6309_v61  ;;  %v1204_v9 = vmul.f32 %v1150_v48, %v6328_v7 }
 0x514   :  { %v1195_v57 = vpack.c.bf16 %v1152_v53, %v1148_v49  ;;  %v1205_v58 = vpack.c.bf16 %v1198_v55, %v1197_v54  ;;  %v1206_v5 = vpack.c.bf16 %v1200_v63, %v1199_v3  ;;  %v306_v55 = vld [vmem:[%s7264_s0 + $0x38] sm:$0xff] }
 0x515   :  { %v1207_v6 = vpack.c.bf16 %v1202_v2, %v1201_v4  ;;  %v1208_v11 = vpack.c.bf16 %v1204_v9, %v1203_v10 }
 0x516   :  { %4968 = vmatprep.subr.bf16.mxu1 %v1195_v57  ;;  %4970 = vmatprep.mubr.bf16.mxu1 %v1205_v58 }
 0x517   :  { %4969 = vmatpush3.bf16.xpose.msra.mxu1 %v1195_v57 }
 0x518   :  { %4978 = vmatprep.subr.bf16.mxu1 %v1196_v60 }
 0x51e   :  { %4971 = vmatmul.mubr.bf16.vlgmr.msra.gmra.mxu1 %v1206_v5 }
 0x51f   :  { %4974 = vmatprep.mubr.bf16.mxu1 %v1207_v6  ;;  %4979 = vmatpush3.bf16.msra.mxu1 %v1196_v60 }
 0x520   :  { %4988 = vmatprep.subr.bf16.mxu1 %v6004_v42 }
 0x526   :  { %4975 = vmatmul.mubr.bf16.gmra.mxu1 %v1208_v11 }
 0x5de   :  { %v4972_v12 = vpop.f32.mrf.mxu1 }
 0x5df   :  { %v1276_v15 = vmul.f32 0.17677669, %v4972_v12 }
 0x5e0   :  { %v1243_v13 = vpop.f32.mrf.mxu1 }
 0x5e1   :  { %v1274_v16 = vmul.f32 0.17677669, %v1243_v13  ;;  %v1284_v25 = vadd.f32 %v1276_v15, %v301_v18 }
 0x5e2   :  { %v4973_v17 = vpop.f32.mrf.mxu1 }
 0x5e3   :  { %v1282_v19 = vadd.f32 %v1274_v16, %v299_v14  ;;  %v1277_v20 = vmul.f32 0.17677669, %v4973_v17  ;;  %v1297_v40 = vsel %vm1290_vm1, %v1284_v25, -inf }
 0x5e4   :  { %v1246_v21 = vpop.f32.mrf.mxu1 }
 0x5e5   :  { %v1275_v23 = vmul.f32 0.17677669, %v1246_v21  ;;  %v1291_v24 = vsel %vm1290_vm1, %v1282_v19, -inf  ;;  %v1285_v33 = vadd.f32 %v1277_v20, %v302_v26 }
 0x5e6   :  { %1292 = vmax.xlane.f32.xlu0 %v1291_v24  ;;  %v4976_v27 = vpop.f32.mrf.mxu1 }
 0x5e7   :  { %v1283_v30 = vadd.f32 %v1275_v23, %v300_v22  ;;  %v1280_v37 = vmul.f32 0.17677669, %v4976_v27  ;;  %v1300_v49 = vsel %vm1290_vm1, %v1285_v33, -inf }
 0x5e8   :  { %v1259_v32 = vpop.f32.mrf.mxu1 }
 0x5e9   :  { %v1278_v38 = vmul.f32 0.17677669, %v1259_v32  ;;  %v1294_v41 = vsel %vm1290_vm1, %v1283_v30, -inf  ;;  %v1288_v54 = vadd.f32 %v1280_v37, %v305_v44 }
 0x5ea   :  { %1298 = vmax.xlane.f32.xlu0 %v1297_v40  ;;  %1295 = vmax.xlane.f32.xlu1 %v1294_v41  ;;  %v4977_v43 = vpop.f32.mrf.mxu1 }
 0x5eb   :  { %v1286_v47 = vadd.f32 %v1278_v38, %v303_v34  ;;  %v1281_v51 = vmul.f32 0.17677669, %v4977_v43  ;;  %v1309_v57 = vsel %vm1290_vm1, %v1288_v54, -inf }
 0x5ec   :  { %v1262_v48 = vpop.f32.mrf.mxu1 }
 0x5ed   :  { %v1279_v52 = vmul.f32 0.17677669, %v1262_v48  ;;  %v1303_v53 = vsel %vm1290_vm1, %v1286_v47, -inf  ;;  %v1289_v60 = vadd.f32 %v1281_v51, %v306_v55 }
 0x5ee   :  { %1301 = vmax.xlane.f32.xlu1 %v1300_v49  ;;  %1304 = vmax.xlane.f32.xlu0 %v1303_v53 }
 0x5ef   :  { %v1287_v56 = vadd.f32 %v1279_v52, %v304_v50  ;;  %v1312_v63 = vsel %vm1290_vm1, %v1289_v60, -inf }
 0x5f1   :  { %v1306_v58 = vsel %vm1290_vm1, %v1287_v56, -inf }
 0x5f2   :  { %1310 = vmax.xlane.f32.xlu0 %v1309_v57  ;;  %1307 = vmax.xlane.f32.xlu1 %v1306_v58 }
 0x5f6   :  { %1313 = vmax.xlane.f32.xlu1 %v1312_v63 }
 0x66f   :  { %v1293_v2 = vpop.xlane.xlu0 %1292 }
 0x670   :  { %v1315_v3 = vsub.f32 %v1282_v19, %v1293_v2 }
 0x672   :  { %v1323_v4 = vmul.f32 1.442695, %v1315_v3 }
 0x673   :  { %v1299_v5 = vpop.xlane.xlu0 %1298  ;;  %v1296_v6 = vpop.xlane.xlu1 %1295 }
 0x674   :  { %5482 = vpow2.f32 %v1323_v4  ;;  %v1317_v9 = vsub.f32 %v1284_v25, %v1299_v5  ;;  %v1316_v10 = vsub.f32 %v1283_v30, %v1296_v6 }
 0x676   :  { %v1327_v11 = vmul.f32 1.442695, %v1317_v9  ;;  %v1325_v12 = vmul.f32 1.442695, %v1316_v10 }
 0x677   :  { %v1302_v13 = vpop.xlane.xlu1 %1301  ;;  %v1305_v14 = vpop.xlane.xlu0 %1304 }
 0x678   :  { %5484 = vpow2.f32 %v1327_v11  ;;  %v1318_v15 = vsub.f32 %v1285_v33, %v1302_v13  ;;  %v1319_v16 = vsub.f32 %v1286_v47, %v1305_v14  ;;  %v5242_v14 = vld [vmem:[%s7265_s3 + $0x38] sm:$0xff]  }
 0x679   :  { %5486 = vpow2.f32 %v1325_v12 }
 0x67a   :  { %v1329_v17 = vmul.f32 1.442695, %v1318_v15  ;;  %v1331_v18 = vmul.f32 1.442695, %v1319_v16 }
 0x67b   :  { %v1311_v20 = vpop.xlane.xlu0 %1310  ;;  %v1308_v21 = vpop.xlane.xlu1 %1307 }
 0x67c   :  { %5488 = vpow2.f32 %v1329_v17  ;;  %v1321_v19 = vsub.f32 %v1288_v54, %v1311_v20  ;;  %v1320_v22 = vsub.f32 %v1287_v56, %v1308_v21  ;;  %v5243_v21 = vld [vmem:[%s7265_s3 + $0x30] sm:$0xff]  }
 0x67d   :  { %5490 = vpow2.f32 %v1331_v18 }
 0x67e   :  { %v1335_v23 = vmul.f32 1.442695, %v1321_v19  ;;  %v1333_v24 = vmul.f32 1.442695, %v1320_v22 }
 0x67f   :  { %v1314_v25 = vpop.xlane.xlu1 %1313 }
 0x680   :  { %5492 = vpow2.f32 %v1335_v23  ;;  %v1322_v26 = vsub.f32 %v1289_v60, %v1314_v25 }
 0x681   :  { %v5483_v27 = vpop.eup %5482  ;;  %5494 = vpow2.f32 %v1333_v24 }
 0x682   :  { %v1337_v30 = vmul.f32 1.442695, %v1322_v26  ;;  %v1339_v32 = vsel %vm1290_vm1, %v5483_v27, 0.0  ;;  %v5244_v26 = vld [vmem:[%s7265_s3 + $0x28] sm:$0xff]  }
 0x683   :  { %1340 = vadd.xlane.f32.xlu0 %v1339_v32  ;;  %v5247_v32 = vld [vmem:[%s7265_s3 + $0x10] sm:$0xff]  }
 0x684   :  { %5496 = vpow2.f32 %v1337_v30  ;;  %v5246_v30 = vld [vmem:[%s7265_s3 + $0x18] sm:$0xff]  }
 0x685   :  { %v5485_v33 = vpop.eup %5484 }
 0x686   :  { %v5487_v34 = vpop.eup %5486  ;;  %v1345_v37 = vsel %vm1290_vm1, %v5485_v33, 0.0 }
 0x687   :  { %1346 = vadd.xlane.f32.xlu0 %v1345_v37  ;;  %v1342_v38 = vsel %vm1290_vm1, %v5487_v34, 0.0 }
 0x688   :  { %1343 = vadd.xlane.f32.xlu1 %v1342_v38 }
 0x689   :  { %v5489_v40 = vpop.eup %5488 }
 0x68a   :  { %v5491_v41 = vpop.eup %5490  ;;  %v1348_v43 = vsel %vm1290_vm1, %v5489_v40, 0.0 }
 0x68b   :  { %v1351_v44 = vsel %vm1290_vm1, %v5491_v41, 0.0 }
 0x68c   :  { %1352 = vadd.xlane.f32.xlu0 %v1351_v44  ;;  %1349 = vadd.xlane.f32.xlu1 %v1348_v43 }
 0x68d   :  { %v5493_v47 = vpop.eup %5492 }
 0x68e   :  { %v5495_v48 = vpop.eup %5494  ;;  %v1357_v49 = vsel %vm1290_vm1, %v5493_v47, 0.0 }
 0x68f   :  { %v1354_v50 = vsel %vm1290_vm1, %v5495_v48, 0.0 }
 0x690   :  { %1358 = vadd.xlane.f32.xlu0 %v1357_v49  ;;  %1355 = vadd.xlane.f32.xlu1 %v1354_v50 }
 0x691   :  { %v5497_v51 = vpop.eup %5496 }
 0x692   :  { %v1360_v52 = vsel %vm1290_vm1, %v5497_v51, 0.0 }
 0x694   :  { %1361 = vadd.xlane.f32.xlu1 %v1360_v52 }
 0x70c   :  { %v1341_v53 = vpop.xlane.xlu0 %1340 }
 0x70d   :  { %5498 = vrcp.f32 %v1341_v53 }
 0x710   :  { %v1347_v54 = vpop.xlane.xlu0 %1346 }
 0x711   :  { %v1344_v55 = vpop.xlane.xlu1 %1343 }
 0x712   :  { %5500 = vrcp.f32 %v1344_v55 }
 0x713   :  { %5502 = vrcp.f32 %v1347_v54 }
 0x715   :  { %v1353_v56 = vpop.xlane.xlu0 %1352  ;;  %v1350_v57 = vpop.xlane.xlu1 %1349 }
 0x716   :  { %5504 = vrcp.f32 %v1350_v57 }
 0x717   :  { %5506 = vrcp.f32 %v1353_v56 }
 0x719   :  { %v1359_v58 = vpop.xlane.xlu0 %1358  ;;  %v1356_v60 = vpop.xlane.xlu1 %1355 }
 0x71a   :  { %5508 = vrcp.f32 %v1356_v60  ;;  %v5499_v63 = vpop.eup %5498 }
 0x71b   :  { %5510 = vrcp.f32 %v1359_v58  ;;  %v1371_v4 = vmul.f32 %v5499_v63, %v5483_v27  ;;  %v5245_v27 = vld [vmem:[%s7265_s3 + $0x20] sm:$0xff]  }
 0x71d   :  { %v1362_v2 = vpop.xlane.xlu1 %1361 }
 0x71e   :  { %5512 = vrcp.f32 %v1362_v2 }
 0x71f   :  { %v5501_v3 = vpop.eup %5500 }
 0x720   :  { %v1372_v5 = vmul.f32 %v5501_v3, %v5487_v34  ;;  %v5503_v6 = vpop.eup %5502  ;;  %v5249_v34 = vld [vmem:[%s7265_s3] sm:$0xff]  }
 0x721   :  { %v1373_v11 = vmul.f32 %v5503_v6, %v5485_v33  ;;  %v5248_v33 = vld [vmem:[%s7265_s3 + $0x8] sm:$0xff]   ;;  %v5250_v6 = vld [vmem:[%s7218_s15 + $0xe0] ss:$16 sps:$4 sm:$0xff]  }
 0x722   :  { %v1379_v9 = vpack.c.bf16 %v1372_v5, %v1371_v4 }
 0x723   :  { %v5505_v10 = vpop.eup %5504 }
 0x724   :  { %4980 = vmatprep.mubr.msk.bf16.mxu1 %vm1290_vm1, %v1379_v9  ;;  %v1374_v12 = vmul.f32 %v5505_v10, %v5489_v40  ;;  %v5507_v13 = vpop.eup %5506  ;;  %v5253_v9 = vld [vmem:[%s7218_s15 + $0xe8] ss:$16 sps:$4 sm:$0xff]  }
 0x725   :  { %v1375_v18 = vmul.f32 %v5507_v13, %v5491_v41 }
 0x726   :  { %v1380_v15 = vpack.c.bf16 %v1374_v12, %v1373_v11 }
 0x727   :  { %v5509_v16 = vpop.eup %5508 }
 0x728   :  { %v5511_v17 = vpop.eup %5510  ;;  %4981 = vmatmul.mubr.msk.bf16.vlgmr.msra.gmra.mxu1 %vm1290_vm1, %v1380_v15  ;;  %v1376_v20 = vmul.f32 %v5509_v16, %v5495_v48 }
 0x729   :  { %4989 = vmatpush3.bf16.msra.mxu1 %v5242_v14  ;;  %v1377_v23 = vmul.f32 %v5511_v17, %v5493_v47 }
 0x72a   :  { %v1381_v22 = vpack.c.bf16 %v1376_v20, %v1375_v18  ;;  %4990 = vmatprep.subr.bf16.mxu1 %v6004_v42  ;;  %v5258_v18 = vld [vmem:[%s7218_s15 + $0xc4] ss:$16 sps:$4 sm:$0xff]   ;;  %v5261_v20 = vld [vmem:[%s7218_s15 + $0xcc] ss:$16 sps:$4 sm:$0xff]  }
 0x72b   :  { %v5513_v19 = vpop.eup %5512 }
 0x72c   :  { %v1378_v24 = vmul.f32 %v5513_v19, %v5497_v51  ;;  %4984 = vmatprep.mubr.msk.bf16.mxu1 %vm1290_vm1, %v1381_v22  ;;  %v5259_v19 = vld [vmem:[%s7218_s15 + $0xc8] ss:$16 sps:$4 sm:$0xff]   ;;  %v5264_v22 = vld [vmem:[%s7218_s15 + $0xa4] ss:$16 sps:$4 sm:$0xff]  }
 0x72d   :  { %4991 = vmatpush3.bf16.msra.mxu1 %v5243_v21  ;;  %v5256_v21 = vld [vmem:[%s7218_s15 + $0xc0] ss:$16 sps:$4 sm:$0xff]  }
 0x72e   :  { %v1382_v25 = vpack.c.bf16 %v1378_v24, %v1377_v23  ;;  %4992 = vmatprep.subr.bf16.mxu1 %v6004_v42  ;;  %v5267_v23 = vld [vmem:[%s7218_s15 + $0xac] ss:$16 sps:$4 sm:$0xff]   ;;  %v5262_v24 = vld [vmem:[%s7218_s15 + $0xa0] ss:$16 sps:$4 sm:$0xff]  }
 0x730   :  { %4985 = vmatmul.mubr.msk.bf16.gmra.mxu1 %vm1290_vm1, %v1382_v25  ;;  %v5265_v25 = vld [vmem:[%s7218_s15 + $0xa8] ss:$16 sps:$4 sm:$0xff]  }
 0x731   :  { %5004 = vmatprep.mubr.msk.bf16.mxu1 %vm6006_vm0, %v6004_v42  ;;  %4993 = vmatpush3.bf16.msra.mxu1 %v5244_v26  ;;  %v5268_v26 = vld [vmem:[%s7218_s15 + $0x80] ss:$16 sps:$4 sm:$0xff]  }
 0x732   :  { %4994 = vmatprep.subr.bf16.mxu1 %v6004_v42 }
 0x735   :  { %4995 = vmatpush3.bf16.msra.mxu1 %v5245_v27  ;;  %v5270_v27 = vld [vmem:[%s7218_s15 + $0x84] ss:$16 sps:$4 sm:$0xff]  }
 0x736   :  { %4996 = vmatprep.subr.bf16.mxu1 %v6004_v42 }
 0x739   :  { %4997 = vmatpush3.bf16.msra.mxu1 %v5246_v30  ;;  %v5271_v30 = vld [vmem:[%s7218_s15 + $0x88] ss:$16 sps:$4 sm:$0xff]  }
 0x73a   :  { %4998 = vmatprep.subr.bf16.mxu1 %v6004_v42 }
 0x73d   :  { %4999 = vmatpush3.bf16.msra.mxu1 %v5247_v32  ;;  %v5273_v32 = vld [vmem:[%s7218_s15 + $0x8c] ss:$16 sps:$4 sm:$0xff]  }
 0x73e   :  { %5000 = vmatprep.subr.bf16.mxu1 %v6004_v42 }
 0x741   :  { %5001 = vmatpush3.bf16.msra.mxu1 %v5248_v33  ;;  %v5276_v33 = vld [vmem:[%s7218_s15 + $0x64] ss:$16 sps:$4 sm:$0xff]  }
 0x742   :  { %5002 = vmatprep.subr.bf16.mxu1 %v6004_v42 }
 0x745   :  { %5003 = vmatpush3.bf16.msra.mxu1 %v5249_v34  ;;  %v5279_v34 = vld [vmem:[%s7218_s15 + $0x6c] ss:$16 sps:$4 sm:$0xff]  }
 0x7e8   :  { %v4982_v37 = vpop.f32.mrf.mxu1 }
 0x7e9   :  { %v1462_v48 = vmul.f32 %v4982_v37, %v6314_v62  ;;  %v5274_v37 = vld [vmem:[%s7218_s15 + $0x60] ss:$16 sps:$4 sm:$0xff]  }
 0x7ea   :  { %v1429_v38 = vpop.f32.mrf.mxu1 }
 0x7eb   :  { %v1460_v44 = vmul.f32 %v1429_v38, %v6291_v45  ;;  %v5277_v38 = vld [vmem:[%s7218_s15 + $0x68] ss:$16 sps:$4 sm:$0xff]  }
 0x7ec   :  { %v4983_v40 = vpop.f32.mrf.mxu1 }
 0x7ed   :  { %v1468_v52 = vadd.f32 %v1462_v48, %v1460_v44  ;;  %v1463_v53 = vmul.f32 %v4983_v40, %v6304_v59  ;;  %v5282_v40 = vld [vmem:[%s7218_s15 + $0x44] ss:$16 sps:$4 sm:$0xff]   ;;  %v5283_v44 = vld [vmem:[%s7218_s15 + $0x48] ss:$16 sps:$4 sm:$0xff]   ;;  %v5291_v48 = vld [vmem:[%s7218_s15 + $0x2c] ss:$16 sps:$4 sm:$0xff]  }
 0x7ee   :  { %v1432_v41 = vpop.f32.mrf.mxu1 }
 0x7ef   :  { %v1461_v49 = vmul.f32 %v1432_v41, %v6296_v46  ;;  %v5285_v41 = vld [vmem:[%s7218_s15 + $0x4c] ss:$16 sps:$4 sm:$0xff]  }
 0x7f0   :  { %v4986_v43 = vpop.f32.mrf.mxu1 }
 0x7f1   :  { %v1469_v55 = vadd.f32 %v1463_v53, %v1461_v49  ;;  %v1466_v58 = vmul.f32 %v4986_v43, %v6333_v8  ;;  %v5280_v43 = vld [vmem:[%s7218_s15 + $0x40] ss:$16 sps:$4 sm:$0xff]  }
 0x7f2   :  { %v1445_v47 = vpop.f32.mrf.mxu1  ;;  %v5286_v49 = vld [vmem:[%s7218_s15 + $0x20] ss:$16 sps:$4 sm:$0xff]  }
 0x7f3   :  { %v1464_v50 = vmul.f32 %v1445_v47, %v6320_v0  ;;  %v4377_v0 = vld [vmem:[#allocation12] ss:$0 sm:$0xff]  ;;  %v5288_v47 = vld [vmem:[%s7218_s15 + $0x24] ss:$16 sps:$4 sm:$0xff]   ;;  %v5292_v53 = vld [vmem:[%s7218_s15] ss:$16 sps:$4 sm:$0xff]  }
 0x7f4   :  { %v4987_v51 = vpop.f32.mrf.mxu1 }
 0x7f5   :  { %v1470_v56 = vadd.f32 %v1468_v52, %v1464_v50  ;;  %v1467_v45 = vmul.f32 %v4987_v51, %v6328_v7  ;;  %v5289_v50 = vld [vmem:[%s7218_s15 + $0x28] ss:$16 sps:$4 sm:$0xff]   ;;  %v5294_v51 = vld [vmem:[%s7218_s15 + $0x4] ss:$16 sps:$4 sm:$0xff]   ;;  %v5297_v52 = vld [vmem:[%s7218_s15 + $0xc] ss:$16 sps:$4 sm:$0xff]  }
 0x7f6   :  { %v1448_v54 = vpop.f32.mrf.mxu1 }
 0x7f7   :  { %v1465_v57 = vmul.f32 %v1448_v54, %v6309_v61  ;;  %v1472_v63 = vadd.f32 %v1470_v56, %v1466_v58  ;;  %v5295_v54 = vld [vmem:[%s7218_s15 + $0x8] ss:$16 sps:$4 sm:$0xff]  }
 0x7f9   :  { %v1471_v60 = vadd.f32 %v1469_v55, %v1465_v57 }
 0x7fb   :  { %v1473_v62 = vadd.f32 %v1471_v60, %v1467_v45 }
 0x7fd   :  { %v1490_v2 = vpack.c.bf16 %v1473_v62, %v1472_v63 }
 0x7ff   :  { %5005 = vmatmul.mubr.bf16.vlgmr.msra.gmra.mxu1 %v1490_v2  ;;  %v4378_v2 = vld [vmem:[#allocation13] ss:$0 sm:$0xff] }
 0x800   :  { %1921 = vmatprep.mubr.bf16.mxu1 %v6005_v1 }
 0x8bf   :  { %v1573_v46 = vpop.f32.mrf.mxu1 }
 0x8c0   :  { %v1580_v59 = vadd.f32 %v1573_v46, %v6242_v36  ;;  %v5252_v36 = vld [vmem:[%s7218_s15 + $0xe4] ss:$16 sps:$4 sm:$0xff]  }
 0x8c1   :  { %v5006_v3 = vpop.f32.mrf.mxu1  ;;  %1846 = vmatprep.subr.bf16.mxu0 %v5252_v36  ;;  %v5298_v36 = vld [vmem:[%s7220_s17 + $0x78] sm:$0xff]  }
 0x8c2   :  { %v6425_v4 = vadd.f32 %v4377_v0, %v1580_v59  ;;  %1847 = vmatpush1.bf16.msra.mxu0 %v5250_v6  ;;  %v4379_v3 = vld [vmem:[#allocation15] ss:$0 sm:$0xff] }
 0x8c3   :  { %v1576_v5 = vpop.f32.mrf.mxu1  ;;  %1848 = vmatprep.subr.bf16.mxu0 %v5258_v18  ;;  %v5309_v18 = vld [vmem:[%s7220_s17 + $0xa8] sm:$0xff]  }
 0x8c4   :  { %v1581_v61 = vadd.f32 %v1576_v5, %v6245_v39  ;;  %1593 = vadd.xlane.f32.xlu0 %v6425_v4  ;;  %v5255_v39 = vld [vmem:[%s7218_s15 + $0xec] ss:$16 sps:$4 sm:$0xff]  }
 0x8c5   :  { %v5007_v7 = vpop.f32.mrf.mxu1  ;;  %1889 = vmatprep.subr.bf16.mxu1 %v5255_v39  ;;  %v5300_v39 = vld [vmem:[%s7220_s17 + $0x38] sm:$0xff]  }
 0x8c6   :  { %v6429_v8 = vadd.f32 %v4377_v0, %v1581_v61  ;;  %1890 = vmatpush1.bf16.msra.mxu1 %v5253_v9  ;;  %1849 = vmatpush1.bf16.msra.mxu0 %v5256_v21  ;;  %v5299_v9 = vld [vmem:[%s7220_s17 + $0xf8] sm:$0xff]   ;;  %v5311_v21 = vld [vmem:[%s7220_s17 + $0xe0] sm:$0xff]  }
 0x8c7   :  { %1891 = vmatprep.subr.bf16.mxu1 %v5261_v20  ;;  %1850 = vmatprep.subr.bf16.mxu0 %v5264_v22  ;;  %v5310_v20 = vld [vmem:[%s7220_s17 + $0x60] sm:$0xff]  }
 0x8c8   :  { %1595 = vadd.xlane.f32.xlu1 %v6429_v8  ;;  %v5313_v22 = vld [vmem:[%s7220_s17 + $0xa0] sm:$0xff]  }
 0x8ca   :  { %1892 = vmatpush1.bf16.msra.mxu1 %v5259_v19  ;;  %1851 = vmatpush1.bf16.msra.mxu0 %v5262_v24  ;;  %v5312_v19 = vld [vmem:[%s7220_s17 + $0x20] sm:$0xff]   ;;  %v5315_v24 = vld [vmem:[%s7220_s17 + $0xd8] sm:$0xff]  }
 0x8cb   :  { %1893 = vmatprep.subr.bf16.mxu1 %v5267_v23  ;;  %1852 = vmatprep.subr.bf16.mxu0 %v5270_v27  ;;  %v5314_v23 = vld [vmem:[%s7220_s17 + $0x58] sm:$0xff]   ;;  %v5318_v27 = vld [vmem:[%s7220_s17 + $0x50] sm:$0xff]  }
 0x8ce   :  { %1894 = vmatpush1.bf16.msra.mxu1 %v5265_v25  ;;  %1853 = vmatpush1.bf16.msra.mxu0 %v5268_v26  ;;  %v5316_v25 = vld [vmem:[%s7220_s17 + $0x18] sm:$0xff]  }
 0x8cf   :  { %1895 = vmatprep.subr.bf16.mxu1 %v5273_v32  ;;  %1854 = vmatprep.subr.bf16.mxu0 %v5276_v33  ;;  %v5317_v26 = vld [vmem:[%s7220_s17 + $0x98] sm:$0xff]   ;;  %v5320_v32 = vld [vmem:[%s7220_s17 + $0x10] sm:$0xff]  }
 0x8d0   :  { %v5321_v33 = vld [vmem:[%s7220_s17 + $0x90] sm:$0xff]  }
 0x8d2   :  { %1896 = vmatpush1.bf16.msra.mxu1 %v5271_v30  ;;  %1855 = vmatpush1.bf16.msra.mxu0 %v5274_v37  ;;  %v5319_v30 = vld [vmem:[%s7220_s17 + $0xd0] sm:$0xff]   ;;  %v5323_v37 = vld [vmem:[%s7220_s17 + $0xc8] sm:$0xff]  }
 0x8d3   :  { %1897 = vmatprep.subr.bf16.mxu1 %v5279_v34  ;;  %1856 = vmatprep.subr.bf16.mxu0 %v5282_v40  ;;  %v5322_v34 = vld [vmem:[%s7220_s17 + $0x48] sm:$0xff]  }
 0x8d4   :  { %v5325_v40 = vld [vmem:[%s7220_s17 + $0x88] sm:$0xff]  }
 0x8d6   :  { %1898 = vmatpush1.bf16.msra.mxu1 %v5277_v38  ;;  %1857 = vmatpush1.bf16.msra.mxu0 %v5280_v43  ;;  %v5324_v38 = vld [vmem:[%s7220_s17 + $0x8] sm:$0xff]   ;;  %v5327_v43 = vld [vmem:[%s7220_s17 + $0xc0] sm:$0xff]  }
 0x8d7   :  { %1899 = vmatprep.subr.bf16.mxu1 %v5285_v41  ;;  %1858 = vmatprep.subr.bf16.mxu0 %v5288_v47  ;;  %v5326_v41 = vld [vmem:[%s7220_s17 + $0x40] sm:$0xff]  }
 0x8d8   :  { %v5329_v47 = vld [vmem:[%s7220_s17 + $0x80] sm:$0xff]  }
 0x8da   :  { %1900 = vmatpush1.bf16.msra.mxu1 %v5283_v44  ;;  %1859 = vmatpush1.bf16.msra.mxu0 %v5286_v49  ;;  %v5328_v44 = vld [vmem:[%s7220_s17] sm:$0xff]   ;;  %v1680_v49 = vsub.s32 3, %v6272_v28 }
 0x8db   :  { %1901 = vmatprep.subr.bf16.mxu1 %v5291_v48  ;;  %1860 = vmatprep.subr.bf16.mxu0 %v5294_v51  ;;  %v1664_v48 = vld [vmem:[%s7219_s16] sm:$0xf] }
 0x8dc   :  { %v1677_v51 = vrot.slane %v1664_v48, %v6285_v35 }
 0x8de   :  { %1902 = vmatpush1.bf16.msra.mxu1 %v5289_v50  ;;  %1861 = vmatpush1.bf16.msra.mxu0 %v5292_v53  ;;  %v1669_v50 = vrot.slane %v1664_v48, %v6275_v29  ;;  %v1681_v53 = vrot.slane %v1664_v48, %v1680_v49 }
 0x8df   :  { %1903 = vmatprep.subr.bf16.mxu1 %v5297_v52  ;;  %4805 = vmatprep.subr.bf16.mxu0 %v5298_v36  ;;  %v1673_v52 = vrot.slane %v1664_v48, %v6281_v31 }
 0x8e2   :  { %1904 = vmatpush1.bf16.msra.mxu1 %v5295_v54 }
 0x8e3   :  { %4827 = vmatprep.subr.bf16.mxu1 %v5299_v9 }
 0x94d   :  { %v1594_v10 = vpop.xlane.xlu0 %1593 }
 0x94e   :  { %v1597_v11 = vmul.f32 0.0078125, %v1594_v10  ;;  %v5301_v10 = vld [vmem:[%s7220_s17 + $0xb8] sm:$0xff]  }
 0x950   :  { %v6445_v12 = vsub.f32 %v6425_v4, %v1597_v11  ;;  %v5302_v11 = vld [vmem:[%s7220_s17 + $0x70] sm:$0xff]  }
 0x951   :  { %v1596_v13 = vpop.xlane.xlu1 %1595 }
 0x952   :  { %v1598_v14 = vmul.f32 0.0078125, %v1596_v13  ;;  %v1601_v15 = vmul.f32 %v6445_v12, %v6445_v12  ;;  %v5304_v13 = vld [vmem:[%s7220_s17 + $0x30] sm:$0xff]  }
 0x954   :  { %v6450_v16 = vsub.f32 %v6429_v8, %v1598_v14  ;;  %1603 = vadd.xlane.f32.xlu0 %v1601_v15  ;;  %v5305_v14 = vld [vmem:[%s7220_s17 + $0xb0] sm:$0xff]   ;;  %v5306_v15 = vld [vmem:[%s7220_s17 + $0x68] sm:$0xff]  }
 0x956   :  { %v1602_v17 = vmul.f32 %v6450_v16, %v6450_v16 }
 0x958   :  { %1605 = vadd.xlane.f32.xlu1 %v1602_v17  ;;  %v5308_v17 = vld [vmem:[%s7220_s17 + $0x28] sm:$0xff]  }
 0x9dd   :  { %v1604_v55 = vpop.xlane.xlu0 %1603 }
 0x9de   :  { %v1607_v56 = vmul.f32 0.0078125, %v1604_v55 }
 0x9e0   :  { %v1609_v57 = vadd.f32 1e-05, %v1607_v56 }
 0x9e1   :  { %v1606_v58 = vpop.xlane.xlu1 %1605 }
 0x9e2   :  { %5514 = vrsqrt.f32 %v1609_v57  ;;  %v1608_v45 = vmul.f32 0.0078125, %v1606_v58 }
 0x9e4   :  { %v1610_v60 = vadd.f32 1e-05, %v1608_v45 }
 0x9e6   :  { %5516 = vrsqrt.f32 %v1610_v60 }
 0x9ef   :  { %v5515_v63 = vpop.eup %5514 }
 0x9f0   :  { %v1613_v62 = vmul.f32 %v5515_v63, %v6445_v12  ;;  %v5303_v12 = vld [vmem:[%s7220_s17 + $0xf0] sm:$0xff]  }
 0x9f2   :  { %v1621_v59 = vmul.f32 %v4378_v2, %v1613_v62 }
 0x9f3   :  { %v5517_v46 = vpop.eup %5516 }
 0x9f4   :  { %v1614_v0 = vmul.f32 %v5517_v46, %v6450_v16  ;;  %v1629_v61 = vadd.f32 %v4379_v3, %v1621_v59  ;;  %v5307_v16 = vld [vmem:[%s7220_s17 + $0xe8] sm:$0xff]  }
 0x9f6   :  { %v1622_v5 = vmul.f32 %v4378_v2, %v1614_v0 }
 0x9f8   :  { %v1630_v7 = vadd.f32 %v4379_v3, %v1622_v5 }
 0x9fa   :  { %v1663_v6 = vpack.c.bf16 %v1630_v7, %v1629_v61 }
 0x9fc   :  { %1879 = vmatmul.mubr.bf16.vlgmr.msra.gmra.mxu0 %v1663_v6  ;;  %1922 = vmatmul.mubr.bf16.vlgmr.msra.gmra.mxu1 %v1663_v6 }
 0x9fd   :  { %4806 = vmatpush3.bf16.msra.mxu0 %v5300_v39  ;;  %4828 = vmatpush3.bf16.msra.mxu1 %v5301_v10 }
 0x9fe   :  { %4807 = vmatprep.subr.bf16.mxu0 %v5302_v11  ;;  %4829 = vmatprep.subr.bf16.mxu1 %v5303_v12 }
 0xa01   :  { %4808 = vmatpush3.bf16.msra.mxu0 %v5304_v13  ;;  %4830 = vmatpush3.bf16.msra.mxu1 %v5305_v14 }
 0xa02   :  { %4809 = vmatprep.subr.bf16.mxu0 %v5306_v15  ;;  %4831 = vmatprep.subr.bf16.mxu1 %v5307_v16 }
 0xa05   :  { %4810 = vmatpush3.bf16.msra.mxu0 %v5308_v17  ;;  %4832 = vmatpush3.bf16.msra.mxu1 %v5309_v18 }
 0xa06   :  { %4811 = vmatprep.subr.bf16.mxu0 %v5310_v20  ;;  %4833 = vmatprep.subr.bf16.mxu1 %v5311_v21 }
 0xa09   :  { %4812 = vmatpush3.bf16.msra.mxu0 %v5312_v19  ;;  %4834 = vmatpush3.bf16.msra.mxu1 %v5313_v22 }
 0xa0a   :  { %4813 = vmatprep.subr.bf16.mxu0 %v5314_v23  ;;  %4835 = vmatprep.subr.bf16.mxu1 %v5315_v24 }
 0xa0d   :  { %4814 = vmatpush3.bf16.msra.mxu0 %v5316_v25  ;;  %4836 = vmatpush3.bf16.msra.mxu1 %v5317_v26 }
 0xa0e   :  { %4815 = vmatprep.subr.bf16.mxu0 %v5318_v27  ;;  %4837 = vmatprep.subr.bf16.mxu1 %v5319_v30 }
 0xa11   :  { %4816 = vmatpush3.bf16.msra.mxu0 %v5320_v32  ;;  %4838 = vmatpush3.bf16.msra.mxu1 %v5321_v33 }
 0xa12   :  { %4817 = vmatprep.subr.bf16.mxu0 %v5322_v34  ;;  %4839 = vmatprep.subr.bf16.mxu1 %v5323_v37 }
 0xa15   :  { %4818 = vmatpush3.bf16.msra.mxu0 %v5324_v38  ;;  %4840 = vmatpush3.bf16.msra.mxu1 %v5325_v40 }
 0xa16   :  { %4819 = vmatprep.subr.bf16.mxu0 %v5326_v41  ;;  %4841 = vmatprep.subr.bf16.mxu1 %v5327_v43 }
 0xa19   :  { %4820 = vmatpush3.bf16.msra.mxu0 %v5328_v44  ;;  %4842 = vmatpush3.bf16.msra.mxu1 %v5329_v47 }
 0xa1a   :  { %5008 = vmatprep.subr.bf16.mxu1 %v6004_v42 }
 0xabc   :  { %v1880_v54 = vpop.f32.mrf.mxu0  ;;  %v1923_v55 = vpop.f32.mrf.mxu1 }
 0xabd   :  { %v6646_v56 = vadd.f32 %v1880_v54, %v1669_v50  ;;  %v6648_v57 = vadd.f32 %v1923_v55, %v1677_v51 }
 0xabe   :  { %v1882_v58 = vpop.f32.mrf.mxu0  ;;  %v1925_v45 = vpop.f32.mrf.mxu1 }
 0xabf   :  { %v4412_v60 = vmul.f32 -1.702, %v6646_v56  ;;  %v4414_v63 = vmul.f32 -1.702, %v6648_v57  ;;  %v6652_v62 = vadd.f32 %v1882_v58, %v1673_v52  ;;  %v6654_v2 = vadd.f32 %v1925_v45, %v1681_v53 }
 0xac0   :  { %v1884_v46 = vpop.f32.mrf.mxu0  ;;  %v1927_v0 = vpop.f32.mrf.mxu1 }
 0xac1   :  { %v1948_v59 = vmul.f32 1.442695, %v4412_v60  ;;  %v1952_v3 = vmul.f32 1.442695, %v4414_v63  ;;  %v4413_v5 = vmul.f32 -1.702, %v6652_v62  ;;  %v1885_v61 = vadd.f32 %v1884_v46, %v1669_v50 }
 0xac2   :  { %v4415_v7 = vmul.f32 -1.702, %v6654_v2  ;;  %v1928_v6 = vadd.f32 %v1927_v0, %v1677_v51  ;;  %v1886_v36 = vpop.f32.mrf.mxu0  ;;  %v1929_v9 = vpop.f32.mrf.mxu1 }
 0xac3   :  { %5518 = vpow2.f32 %v1948_v59  ;;  %v1950_v39 = vmul.f32 1.442695, %v4413_v5  ;;  %v4416_v10 = vmul.f32 -1.702, %v1885_v61  ;;  %v1887_v11 = vadd.f32 %v1886_v36, %v1673_v52 }
 0xac4   :  { %5520 = vpow2.f32 %v1952_v3  ;;  %v1954_v12 = vmul.f32 1.442695, %v4415_v7  ;;  %v4418_v13 = vmul.f32 -1.702, %v1928_v6  ;;  %v1930_v14 = vadd.f32 %v1929_v9, %v1681_v53 }
 0xac5   :  { %5522 = vpow2.f32 %v1950_v39  ;;  %v1956_v15 = vmul.f32 1.442695, %v4416_v10  ;;  %v4417_v16 = vmul.f32 -1.702, %v1887_v11 }
 0xac6   :  { %5524 = vpow2.f32 %v1954_v12  ;;  %v1960_v17 = vmul.f32 1.442695, %v4418_v13  ;;  %v4419_v18 = vmul.f32 -1.702, %v1930_v14  ;;  %v4452_v12 = vld [vmem:[#allocation16] ss:$0 sm:$0xff] }
 0xac7   :  { %5526 = vpow2.f32 %v1956_v15  ;;  %v1958_v20 = vmul.f32 1.442695, %v4417_v16 }
 0xac8   :  { %5528 = vpow2.f32 %v1960_v17  ;;  %v1962_v21 = vmul.f32 1.442695, %v4419_v18 }
 0xac9   :  { %5530 = vpow2.f32 %v1958_v20 }
 0xaca   :  { %5532 = vpow2.f32 %v1962_v21 }
 0xad0   :  { %v5519_v19 = vpop.eup %5518 }
 0xad1   :  { %v5521_v22 = vpop.eup %5520  ;;  %v1964_v23 = vadd.f32 1.0, %v5519_v19  ;;  %v5330_v19 = vld [vmem:[#allocation10 + $0x168] ss:$12 sps:$4 sm:$0xff]  }
 0xad2   :  { %v5523_v24 = vpop.eup %5522  ;;  %v1966_v25 = vadd.f32 1.0, %v5521_v22  ;;  %v5332_v22 = vld [vmem:[#allocation10 + $0x16c] ss:$12 sps:$4 sm:$0xff]  }
 0xad3   :  { %v5525_v26 = vpop.eup %5524  ;;  %5534 = vrcp.f32 %v1964_v23  ;;  %v1965_v27 = vadd.f32 1.0, %v5523_v24  ;;  %v5333_v23 = vld [vmem:[#allocation10 + $0x170] ss:$12 sps:$4 sm:$0xff]   ;;  %2571 = vmatprep.subr.bf16.mxu0 %v5332_v22 }
 0xad4   :  { %v5527_v30 = vpop.eup %5526  ;;  %5536 = vrcp.f32 %v1966_v25  ;;  %v1967_v32 = vadd.f32 1.0, %v5525_v26 }
 0xad5   :  { %v5529_v33 = vpop.eup %5528  ;;  %5538 = vrcp.f32 %v1965_v27  ;;  %v1968_v34 = vadd.f32 1.0, %v5527_v30 }
 0xad6   :  { %v5531_v37 = vpop.eup %5530  ;;  %5540 = vrcp.f32 %v1967_v32  ;;  %v1970_v38 = vadd.f32 1.0, %v5529_v33  ;;  %v5336_v33 = vld [vmem:[#allocation10 + $0x154] ss:$12 sps:$4 sm:$0xff]  }
 0xad7   :  { %v5533_v40 = vpop.eup %5532  ;;  %5542 = vrcp.f32 %v1968_v34  ;;  %v1969_v41 = vadd.f32 1.0, %v5531_v37  ;;  %v5334_v34 = vld [vmem:[#allocation10 + $0x150] ss:$12 sps:$4 sm:$0xff]   ;;  %v5337_v37 = vld [vmem:[#allocation10 + $0x158] ss:$12 sps:$4 sm:$0xff]  }
 0xad8   :  { %5544 = vrcp.f32 %v1970_v38  ;;  %v1971_v43 = vadd.f32 1.0, %v5533_v40  ;;  %v5340_v38 = vld [vmem:[#allocation10 + $0x13c] ss:$12 sps:$4 sm:$0xff]   ;;  %v5338_v40 = vld [vmem:[#allocation10 + $0x138] ss:$12 sps:$4 sm:$0xff]  }
 0xad9   :  { %5546 = vrcp.f32 %v1969_v41  ;;  %v5341_v41 = vld [vmem:[#allocation10 + $0x140] ss:$12 sps:$4 sm:$0xff]  }
 0xada   :  { %5548 = vrcp.f32 %v1971_v43  ;;  %v5342_v43 = vld [vmem:[#allocation10 + $0x120] ss:$12 sps:$4 sm:$0xff]  }
 0xae0   :  { %v5535_v44 = vpop.eup %5534 }
 0xae1   :  { %v5537_v47 = vpop.eup %5536  ;;  %v1988_v63 = vmul.f32 %v5535_v44, %v6646_v56  ;;  %v5344_v44 = vld [vmem:[#allocation10 + $0x124] ss:$12 sps:$4 sm:$0xff]  }
 0xae2   :  { %v5539_v48 = vpop.eup %5538  ;;  %v1990_v59 = vmul.f32 %v5537_v47, %v6648_v57  ;;  %v5345_v47 = vld [vmem:[#allocation10 + $0x128] ss:$12 sps:$4 sm:$0xff]  }
 0xae3   :  { %v5541_v50 = vpop.eup %5540  ;;  %v1989_v58 = vmul.f32 %v5539_v48, %v6652_v62  ;;  %v5348_v48 = vld [vmem:[#allocation10 + $0x10c] ss:$12 sps:$4 sm:$0xff]  }
 0xae4   :  { %v5543_v51 = vpop.eup %5542  ;;  %v1991_v46 = vmul.f32 %v5541_v50, %v6654_v2  ;;  %v5346_v50 = vld [vmem:[#allocation10 + $0x108] ss:$12 sps:$4 sm:$0xff]  }
 0xae5   :  { %v5545_v52 = vpop.eup %5544  ;;  %v1992_v54 = vmul.f32 %v5543_v51, %v1885_v61  ;;  %v5349_v51 = vld [vmem:[#allocation10 + $0x110] ss:$12 sps:$4 sm:$0xff]  }
 0xae6   :  { %v5547_v53 = vpop.eup %5546  ;;  %v1994_v45 = vmul.f32 %v5545_v52, %v1928_v6  ;;  %v5352_v52 = vld [vmem:[#allocation10 + $0xf4] ss:$12 sps:$4 sm:$0xff]  }
 0xae7   :  { %v5549_v55 = vpop.eup %5548  ;;  %v1993_v60 = vmul.f32 %v5547_v53, %v1887_v11  ;;  %v2060_v5 = vpack.c.bf16 %v1992_v54, %v1988_v63  ;;  %v5350_v53 = vld [vmem:[#allocation10 + $0xf0] ss:$12 sps:$4 sm:$0xff]   ;;  %v5353_v54 = vld [vmem:[#allocation10 + $0xf8] ss:$12 sps:$4 sm:$0xff]   ;;  %v5358_v63 = vld [vmem:[#allocation10 + $0xc0] ss:$12 sps:$4 sm:$0xff]  }
 0xae8   :  { %v1995_v0 = vmul.f32 %v5549_v55, %v1930_v14  ;;  %v2062_v36 = vpack.c.bf16 %v1994_v45, %v1990_v59  ;;  %v5356_v55 = vld [vmem:[#allocation10 + $0xdc] ss:$12 sps:$4 sm:$0xff]   ;;  %v5357_v45 = vld [vmem:[#allocation10 + $0xe0] ss:$12 sps:$4 sm:$0xff]  }
 0xae9   :  { %v2061_v3 = vpack.c.bf16 %v1993_v60, %v1989_v58  ;;  %v5354_v58 = vld [vmem:[#allocation10 + $0xd8] ss:$12 sps:$4 sm:$0xff]  }
 0xaea   :  { %v2063_v7 = vpack.c.bf16 %v1995_v0, %v1991_v46  ;;  %v5360_v60 = vld [vmem:[#allocation10 + $0xc4] ss:$12 sps:$4 sm:$0xff]   ;;  %v5361_v46 = vld [vmem:[#allocation10 + $0xc8] ss:$12 sps:$4 sm:$0xff]  }
 0xaeb   :  { %2288 = vmatprep.mubr.bf16.mxu0 %v2061_v3 }
 0xaec   :  { %2329 = vmatprep.mubr.bf16.mxu1 %v2063_v7  ;;  %2289 = vmatmul.mubr.bf16.vlgmr.msra.gmra.mxu0 %v2060_v5 }
 0xaed   :  { %2330 = vmatmul.mubr.bf16.vlgmr.msra.gmra.mxu1 %v2062_v36  ;;  %2603 = vmatprep.mubr.bf16.mxu0 %v6005_v1 }
 0xaee   :  { %5024 = vmatprep.mubr.msk.bf16.mxu1 %vm6006_vm0, %v6004_v42  ;;  %5009 = vmatpush3.bf16.msra.mxu1 %v5333_v23 }
 0xaef   :  { %2572 = vmatpush1.bf16.msra.mxu0 %v5330_v19  ;;  %5010 = vmatprep.subr.bf16.mxu1 %v6004_v42 }
 0xaf0   :  { %2573 = vmatprep.subr.bf16.mxu0 %v5336_v33  ;;  %v6702_v33 = vld [vmem:[%s7263_s30] sm:$0xff] }
 0xaf2   :  { %5011 = vmatpush3.bf16.msra.mxu1 %v5337_v37  ;;  %v6708_v37 = vld [vmem:[%s7263_s30 + $0x8] sm:$0xff] }
 0xaf3   :  { %2574 = vmatpush1.bf16.msra.mxu0 %v5334_v34  ;;  %5012 = vmatprep.subr.bf16.mxu1 %v6004_v42 }
 0xaf4   :  { %2575 = vmatprep.subr.bf16.mxu0 %v5340_v38 }
 0xaf6   :  { %5013 = vmatpush3.bf16.msra.mxu1 %v5341_v41 }
 0xaf7   :  { %2576 = vmatpush1.bf16.msra.mxu0 %v5338_v40  ;;  %5014 = vmatprep.subr.bf16.mxu1 %v6004_v42 }
 0xaf8   :  { %2577 = vmatprep.subr.bf16.mxu0 %v5344_v44 }
 0xafa   :  { %5015 = vmatpush3.bf16.msra.mxu1 %v5345_v47  ;;  %v6714_v47 = vld [vmem:[%s7263_s30 + $0x18] sm:$0xff] }
 0xafb   :  { %2578 = vmatpush1.bf16.msra.mxu0 %v5342_v43  ;;  %5016 = vmatprep.subr.bf16.mxu1 %v6004_v42 }
 0xafc   :  { %2579 = vmatprep.subr.bf16.mxu0 %v5348_v48 }
 0xafe   :  { %5017 = vmatpush3.bf16.msra.mxu1 %v5349_v51 }
 0xaff   :  { %2580 = vmatpush1.bf16.msra.mxu0 %v5346_v50  ;;  %5018 = vmatprep.subr.bf16.mxu1 %v6004_v42  ;;  %v6720_v50 = vld [vmem:[%s7263_s30 + $0x28] sm:$0xff] }
 0xb00   :  { %2581 = vmatprep.subr.bf16.mxu0 %v5352_v52  ;;  %v6726_v52 = vld [vmem:[%s7263_s30 + $0x10] sm:$0xff] }
 0xb02   :  { %5019 = vmatpush3.bf16.msra.mxu1 %v5353_v54  ;;  %v6732_v54 = vld [vmem:[%s7263_s30 + $0x20] sm:$0xff] }
 0xb03   :  { %2582 = vmatpush1.bf16.msra.mxu0 %v5350_v53  ;;  %5020 = vmatprep.subr.bf16.mxu1 %v6004_v42 }
 0xb04   :  { %2583 = vmatprep.subr.bf16.mxu0 %v5356_v55 }
 0xb06   :  { %5021 = vmatpush3.bf16.msra.mxu1 %v5357_v45 }
 0xb07   :  { %2584 = vmatpush1.bf16.msra.mxu0 %v5354_v58  ;;  %5022 = vmatprep.subr.bf16.mxu1 %v6004_v42 }
 0xb08   :  { %2585 = vmatprep.subr.bf16.mxu0 %v5360_v60  ;;  %v6738_v60 = vld [vmem:[%s7263_s30 + $0x38] sm:$0xff] }
 0xb0a   :  { %5023 = vmatpush3.bf16.msra.mxu1 %v5361_v46  ;;  %v6745_v46 = vld [vmem:[%s7263_s30 + $0x30] sm:$0xff] }
 0xb0b   :  { %2586 = vmatpush1.bf16.msra.mxu0 %v5358_v63 }
 0xbac   :  { %v4821_v62 = vpop.f32.mrf.mxu0 }
 0xbad   :  { %v4843_v56 = vpop.f32.mrf.mxu1 }
 0xbae   :  { %v4822_v61 = vpop.f32.mrf.mxu0 }
 0xbaf   :  { %v4823_v2 = vadd.f32 %v4822_v61, %v4821_v62  ;;  %v4844_v6 = vpop.f32.mrf.mxu1  ;;  %v4453_v61 = vld [vmem:[#allocation7 + $0x1] ss:$0 sm:$0xff] }
 0xbb0   :  { %v4845_v9 = vadd.f32 %v4844_v6, %v4843_v56  ;;  %v4824_v57 = vpop.f32.mrf.mxu0 }
 0xbb1   :  { %v4846_v39 = vpop.f32.mrf.mxu1 }
 0xbb2   :  { %v2332_v10 = vadd.f32 %v4845_v9, %v4823_v2  ;;  %v4825_v11 = vpop.f32.mrf.mxu0 }
 0xbb3   :  { %v4826_v13 = vadd.f32 %v4825_v11, %v4824_v57  ;;  %v4847_v14 = vpop.f32.mrf.mxu1  ;;  %v4454_v57 = vld [vmem:[#allocation9 + $0x1] ss:$0 sm:$0xff] }
 0xbb4   :  { %v2338_v15 = vadd.f32 %v2332_v10, %v6425_v4  ;;  %v4848_v16 = vadd.f32 %v4847_v14, %v4846_v39 }
 0xbb6   :  { %v6666_v17 = vadd.f32 %v4452_v12, %v2338_v15  ;;  %v2335_v18 = vadd.f32 %v4848_v16, %v4826_v13  ;;  %v4455_v13 = vld [vmem:[%s7262_s23 + $0x3] sm:$0x7] }
 0xbb7   :  { %v2431_v14 = vrot.slane %v4455_v13, %v6275_v29 }
 0xbb8   :  { %v2339_v20 = vadd.f32 %v2335_v18, %v6429_v8  ;;  %2353 = vadd.xlane.f32.xlu0 %v6666_v17  ;;  %v2435_v18 = vrot.slane %v4455_v13, %v6281_v31 }
 0xbba   :  { %v6670_v21 = vadd.f32 %v4452_v12, %v2339_v20 }
 0xbbc   :  { %2355 = vadd.xlane.f32.xlu1 %v6670_v21 }
 0xc41   :  { %v2354_v4 = vpop.xlane.xlu0 %2353 }
 0xc42   :  { %v2357_v24 = vmul.f32 0.0078125, %v2354_v4 }
 0xc44   :  { %v6675_v25 = vsub.f32 %v6666_v17, %v2357_v24  ;;  %v2439_v24 = vrot.slane %v4455_v13, %v6285_v35 }
 0xc45   :  { %v2356_v8 = vpop.xlane.xlu1 %2355 }
 0xc46   :  { %v2358_v26 = vmul.f32 0.0078125, %v2356_v8  ;;  %v2361_v27 = vmul.f32 %v6675_v25, %v6675_v25 }
 0xc48   :  { %v6680_v30 = vsub.f32 %v6670_v21, %v2358_v26  ;;  %2363 = vadd.xlane.f32.xlu0 %v2361_v27 }
 0xc4a   :  { %v2362_v32 = vmul.f32 %v6680_v30, %v6680_v30 }
 0xc4c   :  { %2365 = vadd.xlane.f32.xlu1 %v2362_v32 }
 0xcd1   :  { %v2364_v0 = vpop.xlane.xlu0 %2363 }
 0xcd2   :  { %v2367_v59 = vmul.f32 0.0078125, %v2364_v0 }
 0xcd4   :  { %v2369_v3 = vadd.f32 1e-05, %v2367_v59 }
 0xcd5   :  { %v2366_v5 = vpop.xlane.xlu1 %2365 }
 0xcd6   :  { %5550 = vrsqrt.f32 %v2369_v3  ;;  %v2368_v7 = vmul.f32 0.0078125, %v2366_v5 }
 0xcd8   :  { %v2370_v36 = vadd.f32 1e-05, %v2368_v7 }
 0xcda   :  { %5552 = vrsqrt.f32 %v2370_v36 }
 0xce3   :  { %v5551_v62 = vpop.eup %5550 }
 0xce4   :  { %v2373_v56 = vmul.f32 %v5551_v62, %v6675_v25 }
 0xce6   :  { %v2381_v9 = vmul.f32 %v4453_v61, %v2373_v56  ;;  %v5636_v56 = vld [vmem:[%s7264_s0] sm:$0xff] }
 0xce7   :  { %v5553_v2 = vpop.eup %5552 }
 0xce8   :  { %v2374_v6 = vmul.f32 %v5553_v2, %v6680_v30  ;;  %v2389_v10 = vadd.f32 %v4454_v57, %v2381_v9 }
 0xcea   :  { %v2382_v39 = vmul.f32 %v4453_v61, %v2374_v6 }
 0xcec   :  { %v2390_v11 = vadd.f32 %v4454_v57, %v2382_v39  ;;  %v5637_v39 = vld [vmem:[%s7264_s0 + $0x10] sm:$0xff] }
 0xcee   :  { %v2424_v12 = vpack.c.bf16 %v2390_v11, %v2389_v10 }
 0xcf0   :  { %2604 = vmatmul.mubr.bf16.vlgmr.msra.gmra.mxu0 %v2424_v12  ;;  %5025 = vmatmul.mubr.bf16.vlgmr.msra.gmra.mxu1 %v2424_v12  ;;  %v5638_v12 = vld [vmem:[%s7264_s0 + $0x8] sm:$0xff] }
 0xcf1   :  { %3343 = vmatprep.mubr.bf16.mxu1 %v6005_v1 }
 0xdb0   :  { %v2605_v15 = vpop.f32.mrf.mxu0  ;;  %v2648_v16 = vpop.f32.mrf.mxu1 }
 0xdb1   :  { %v2606_v22 = vadd.f32 %v2605_v15, %v2431_v14  ;;  %v2649_v40 = vadd.f32 %v2648_v16, %v2439_v24  ;;  %v5639_v15 = vld [vmem:[%s7264_s0 + $0x18] sm:$0xff] }
 0xdb2   :  { %v2607_v20 = vpop.f32.mrf.mxu0  ;;  %v5026_v19 = vpop.f32.mrf.mxu1 }
 0xdb3   :  { %v2608_v8 = vadd.f32 %v2607_v20, %v2435_v18  ;;  %v2657_v34 = vmul.f32 %v6702_v33, %v2606_v22  ;;  %v2659_v53 = vmul.f32 %v6726_v52, %v2606_v22  ;;  %v2661_v55 = vmul.f32 %v6732_v54, %v2606_v22 }
 0xdb4   :  { %v2609_v23 = vpop.f32.mrf.mxu0  ;;  %v2651_v4 = vpop.f32.mrf.mxu1  ;;  %v2663_v0 = vmul.f32 %v6745_v46, %v2606_v22 }
 0xdb5   :  { %v2610_v25 = vadd.f32 %v2609_v23, %v2431_v14  ;;  %v2652_v30 = vadd.f32 %v2651_v4, %v2439_v24  ;;  %v5640_v4 = vld [vmem:[%s7264_s0 + $0x20] sm:$0xff] }
 0xdb6   :  { %v2611_v26 = vpop.f32.mrf.mxu0  ;;  %v5027_v27 = vpop.f32.mrf.mxu1 }
 0xdb7   :  { %v2612_v32 = vadd.f32 %v2611_v26, %v2435_v18  ;;  %v2658_v38 = vmul.f32 %v6708_v37, %v2610_v25  ;;  %v2656_v44 = vpack.c.bf16 %v2652_v30, %v2649_v40  ;;  %v2660_v48 = vmul.f32 %v6714_v47, %v2610_v25 }
 0xdb8   :  { %v2662_v51 = vmul.f32 %v6720_v50, %v2610_v25  ;;  %v2664_v63 = vmul.f32 %v6738_v60, %v2610_v25 }
 0xdb9   :  { %v2655_v41 = vpack.c.bf16 %v2612_v32, %v2608_v8  ;;  %v2665_v43 = vpack.c.bf16 %v2658_v38, %v2657_v34  ;;  %v2666_v58 = vpack.c.bf16 %v2660_v48, %v2659_v53  ;;  %v5641_v32 = vld [vmem:[%s7264_s0 + $0x30] sm:$0xff]  ;;  %v5642_v38 = vld [vmem:[%s7264_s0 + $0x28] sm:$0xff] }
 0xdba   :  { %v2667_v45 = vpack.c.bf16 %v2662_v51, %v2661_v55  ;;  %v2668_v59 = vpack.c.bf16 %v2664_v63, %v2663_v0 }
 0xdbb   :  { %5028 = vmatprep.subr.bf16.mxu0 %v2655_v41  ;;  %5030 = vmatprep.mubr.bf16.mxu0 %v2665_v43 }
 0xdbc   :  { %5029 = vmatpush3.bf16.xpose.msra.mxu0 %v2655_v41 }
 0xdbd   :  { %5038 = vmatprep.subr.bf16.mxu0 %v2656_v44 }
 0xdc3   :  { %5031 = vmatmul.mubr.bf16.vlgmr.msra.gmra.mxu0 %v2666_v58 }
 0xdc4   :  { %5034 = vmatprep.mubr.bf16.mxu0 %v2667_v45  ;;  %5039 = vmatpush3.bf16.msra.mxu0 %v2656_v44  ;;  %v5643_v44 = vld [vmem:[%s7264_s0 + $0x38] sm:$0xff] }
 0xdc5   :  { %5048 = vmatprep.subr.bf16.mxu0 %v6004_v42 }
 0xdcb   :  { %5035 = vmatmul.mubr.bf16.gmra.mxu0 %v2668_v59 }
 0xe83   :  { %v5032_v3 = vpop.f32.mrf.mxu0 }
 0xe84   :  { %v2736_v7 = vmul.f32 0.17677669, %v5032_v3 }
 0xe85   :  { %v2703_v5 = vpop.f32.mrf.mxu0 }
 0xe86   :  { %v2734_v36 = vmul.f32 0.17677669, %v2703_v5  ;;  %v2744_v10 = vadd.f32 %v5637_v39, %v2736_v7 }
 0xe87   :  { %v5033_v62 = vpop.f32.mrf.mxu0 }
 0xe88   :  { %v2742_v61 = vadd.f32 %v5636_v56, %v2734_v36  ;;  %v2737_v2 = vmul.f32 0.17677669, %v5033_v62  ;;  %v2756_v19 = vsel %vm1290_vm1, %v2744_v10, -inf }
 0xe89   :  { %v2706_v6 = vpop.f32.mrf.mxu0 }
 0xe8a   :  { %v2735_v9 = vmul.f32 0.17677669, %v2706_v6  ;;  %v2750_v57 = vsel %vm1290_vm1, %v2742_v61, -inf  ;;  %v2745_v16 = vadd.f32 %v5639_v15, %v2737_v2 }
 0xe8b   :  { %2751 = vmax.xlane.f32.xlu0 %v2750_v57  ;;  %v5036_v11 = vpop.f32.mrf.mxu0 }
 0xe8c   :  { %v2743_v13 = vadd.f32 %v5638_v12, %v2735_v9  ;;  %v2740_v18 = vmul.f32 0.17677669, %v5036_v11  ;;  %v2759_v8 = vsel %vm1290_vm1, %v2745_v16, -inf }
 0xe8d   :  { %v2719_v14 = vpop.f32.mrf.mxu0 }
 0xe8e   :  { %v2738_v20 = vmul.f32 0.17677669, %v2719_v14  ;;  %v2753_v22 = vsel %vm1290_vm1, %v2743_v13, -inf  ;;  %v2748_v34 = vadd.f32 %v5641_v32, %v2740_v18 }
 0xe8f   :  { %2757 = vmax.xlane.f32.xlu0 %v2756_v19  ;;  %2754 = vmax.xlane.f32.xlu1 %v2753_v22  ;;  %v5037_v23 = vpop.f32.mrf.mxu0 }
 0xe90   :  { %v2746_v24 = vadd.f32 %v5640_v4, %v2738_v20  ;;  %v2741_v26 = vmul.f32 0.17677669, %v5037_v23  ;;  %v2768_v41 = vsel %vm1290_vm1, %v2748_v34, -inf }
 0xe91   :  { %v2722_v25 = vpop.f32.mrf.mxu0 }
 0xe92   :  { %v2739_v27 = vmul.f32 0.17677669, %v2722_v25  ;;  %v2762_v30 = vsel %vm1290_vm1, %v2746_v24, -inf  ;;  %v2749_v48 = vadd.f32 %v5643_v44, %v2741_v26 }
 0xe93   :  { %2760 = vmax.xlane.f32.xlu1 %v2759_v8  ;;  %2763 = vmax.xlane.f32.xlu0 %v2762_v30 }
 0xe94   :  { %v2747_v40 = vadd.f32 %v5642_v38, %v2739_v27  ;;  %v2771_v51 = vsel %vm1290_vm1, %v2749_v48, -inf }
 0xe96   :  { %v2765_v43 = vsel %vm1290_vm1, %v2747_v40, -inf }
 0xe97   :  { %2769 = vmax.xlane.f32.xlu0 %v2768_v41  ;;  %2766 = vmax.xlane.f32.xlu1 %v2765_v43 }
 0xe9b   :  { %2772 = vmax.xlane.f32.xlu1 %v2771_v51 }
 0xf14   :  { %v2752_v53 = vpop.xlane.xlu0 %2751 }
 0xf15   :  { %v2774_v55 = vsub.f32 %v2742_v61, %v2752_v53 }
 0xf17   :  { %v2782_v58 = vmul.f32 1.442695, %v2774_v55 }
 0xf18   :  { %v2758_v45 = vpop.xlane.xlu0 %2757  ;;  %v2755_v63 = vpop.xlane.xlu1 %2754 }
 0xf19   :  { %5554 = vpow2.f32 %v2782_v58  ;;  %v2776_v0 = vsub.f32 %v2744_v10, %v2758_v45  ;;  %v2775_v59 = vsub.f32 %v2743_v13, %v2755_v63 }
 0xf1b   :  { %v2786_v3 = vmul.f32 1.442695, %v2776_v0  ;;  %v2784_v5 = vmul.f32 1.442695, %v2775_v59 }
 0xf1c   :  { %v2761_v7 = vpop.xlane.xlu1 %2760  ;;  %v2764_v36 = vpop.xlane.xlu0 %2763 }
 0xf1d   :  { %5556 = vpow2.f32 %v2786_v3  ;;  %v2777_v62 = vsub.f32 %v2745_v16, %v2761_v7  ;;  %v2778_v56 = vsub.f32 %v2746_v24, %v2764_v36 }
 0xf1e   :  { %5558 = vpow2.f32 %v2784_v5 }
 0xf1f   :  { %v2788_v2 = vmul.f32 1.442695, %v2777_v62  ;;  %v2790_v6 = vmul.f32 1.442695, %v2778_v56  ;;  %v5362_v62 = vld [vmem:[%s7265_s3 + $0x78] sm:$0xff]  }
 0xf20   :  { %v2770_v9 = vpop.xlane.xlu0 %2769  ;;  %v2767_v57 = vpop.xlane.xlu1 %2766 }
 0xf21   :  { %5560 = vpow2.f32 %v2788_v2  ;;  %v2780_v61 = vsub.f32 %v2748_v34, %v2770_v9  ;;  %v2779_v39 = vsub.f32 %v2747_v40, %v2767_v57 }
 0xf22   :  { %5562 = vpow2.f32 %v2790_v6 }
 0xf23   :  { %v2794_v11 = vmul.f32 1.442695, %v2780_v61  ;;  %v2792_v12 = vmul.f32 1.442695, %v2779_v39  ;;  %v5363_v61 = vld [vmem:[%s7265_s3 + $0x70] sm:$0xff]  }
 0xf24   :  { %v2773_v10 = vpop.xlane.xlu1 %2772 }
 0xf25   :  { %5564 = vpow2.f32 %v2794_v11  ;;  %v2781_v13 = vsub.f32 %v2749_v48, %v2773_v10 }
 0xf26   :  { %v5555_v14 = vpop.eup %5554  ;;  %5566 = vpow2.f32 %v2792_v12 }
 0xf27   :  { %v2796_v15 = vmul.f32 1.442695, %v2781_v13  ;;  %v2798_v16 = vsel %vm1290_vm1, %v5555_v14, 0.0 }
 0xf28   :  { %2799 = vadd.xlane.f32.xlu0 %v2798_v16  ;;  %v5366_v16 = vld [vmem:[%s7265_s3 + $0x58] sm:$0xff]  }
 0xf29   :  { %5568 = vpow2.f32 %v2796_v15  ;;  %v5365_v15 = vld [vmem:[%s7265_s3 + $0x60] sm:$0xff]  }
 0xf2a   :  { %v5557_v18 = vpop.eup %5556 }
 0xf2b   :  { %v5559_v20 = vpop.eup %5558  ;;  %v2804_v19 = vsel %vm1290_vm1, %v5557_v18, 0.0 }
 0xf2c   :  { %2805 = vadd.xlane.f32.xlu0 %v2804_v19  ;;  %v2801_v22 = vsel %vm1290_vm1, %v5559_v20, 0.0  ;;  %v5369_v19 = vld [vmem:[%s7265_s3 + $0x40] sm:$0xff]  }
 0xf2d   :  { %2802 = vadd.xlane.f32.xlu1 %v2801_v22 }
 0xf2e   :  { %v5561_v23 = vpop.eup %5560 }
 0xf2f   :  { %v5563_v4 = vpop.eup %5562  ;;  %v2807_v24 = vsel %vm1290_vm1, %v5561_v23, 0.0 }
 0xf30   :  { %v2810_v25 = vsel %vm1290_vm1, %v5563_v4, 0.0 }
 0xf31   :  { %2811 = vadd.xlane.f32.xlu0 %v2810_v25  ;;  %2808 = vadd.xlane.f32.xlu1 %v2807_v24 }
 0xf32   :  { %v5565_v8 = vpop.eup %5564 }
 0xf33   :  { %v5567_v26 = vpop.eup %5566  ;;  %v2816_v27 = vsel %vm1290_vm1, %v5565_v8, 0.0 }
 0xf34   :  { %v2813_v30 = vsel %vm1290_vm1, %v5567_v26, 0.0 }
 0xf35   :  { %2817 = vadd.xlane.f32.xlu0 %v2816_v27  ;;  %2814 = vadd.xlane.f32.xlu1 %v2813_v30 }
 0xf36   :  { %v5569_v32 = vpop.eup %5568 }
 0xf37   :  { %v2819_v34 = vsel %vm1290_vm1, %v5569_v32, 0.0 }
 0xf39   :  { %2820 = vadd.xlane.f32.xlu1 %v2819_v34 }
 0xfb1   :  { %v2800_v38 = vpop.xlane.xlu0 %2799 }
 0xfb2   :  { %5570 = vrcp.f32 %v2800_v38 }
 0xfb5   :  { %v2806_v40 = vpop.xlane.xlu0 %2805 }
 0xfb6   :  { %v2803_v41 = vpop.xlane.xlu1 %2802 }
 0xfb7   :  { %5572 = vrcp.f32 %v2803_v41 }
 0xfb8   :  { %5574 = vrcp.f32 %v2806_v40 }
 0xfba   :  { %v2812_v43 = vpop.xlane.xlu0 %2811  ;;  %v2809_v44 = vpop.xlane.xlu1 %2808 }
 0xfbb   :  { %5576 = vrcp.f32 %v2809_v44 }
 0xfbc   :  { %5578 = vrcp.f32 %v2812_v43 }
 0xfbe   :  { %v2818_v48 = vpop.xlane.xlu0 %2817  ;;  %v2815_v51 = vpop.xlane.xlu1 %2814 }
 0xfbf   :  { %5580 = vrcp.f32 %v2815_v51  ;;  %v5571_v53 = vpop.eup %5570 }
 0xfc0   :  { %5582 = vrcp.f32 %v2818_v48  ;;  %v2830_v45 = vmul.f32 %v5571_v53, %v5555_v14  ;;  %v5364_v14 = vld [vmem:[%s7265_s3 + $0x68] sm:$0xff]  }
 0xfc2   :  { %v2821_v55 = vpop.xlane.xlu1 %2820 }
 0xfc3   :  { %5584 = vrcp.f32 %v2821_v55 }
 0xfc4   :  { %v5573_v58 = vpop.eup %5572 }
 0xfc5   :  { %v2831_v63 = vmul.f32 %v5573_v58, %v5559_v20  ;;  %v5575_v0 = vpop.eup %5574  ;;  %v5368_v20 = vld [vmem:[%s7265_s3 + $0x48] sm:$0xff]  }
 0xfc6   :  { %v2832_v5 = vmul.f32 %v5575_v0, %v5557_v18  ;;  %v5367_v18 = vld [vmem:[%s7265_s3 + $0x50] sm:$0xff]  }
 0xfc7   :  { %v2838_v59 = vpack.c.bf16 %v2831_v63, %v2830_v45 }
 0xfc8   :  { %v5577_v3 = vpop.eup %5576 }
 0xfc9   :  { %5040 = vmatprep.mubr.msk.bf16.mxu0 %vm1290_vm1, %v2838_v59  ;;  %v2833_v7 = vmul.f32 %v5577_v3, %v5561_v23  ;;  %v5579_v36 = vpop.eup %5578  ;;  %v5372_v59 = vld [vmem:[%s7218_s15 + $0x1e4] ss:$16 sps:$4 sm:$0xff]   ;;  %v5373_v3 = vld [vmem:[%s7218_s15 + $0x1e8] ss:$16 sps:$4 sm:$0xff]  }
 0xfca   :  { %v2834_v9 = vmul.f32 %v5579_v36, %v5563_v4  ;;  %3311 = vmatprep.subr.bf16.mxu1 %v5372_v59 }
 0xfcb   :  { %v2839_v56 = vpack.c.bf16 %v2833_v7, %v2832_v5  ;;  %v5375_v5 = vld [vmem:[%s7218_s15 + $0x1ec] ss:$16 sps:$4 sm:$0xff]  }
 0xfcc   :  { %v5581_v2 = vpop.eup %5580 }
 0xfcd   :  { %v5583_v6 = vpop.eup %5582  ;;  %5041 = vmatmul.mubr.msk.bf16.vlgmr.msra.gmra.mxu0 %vm1290_vm1, %v2839_v56  ;;  %v2835_v57 = vmul.f32 %v5581_v2, %v5567_v26 }
 0xfce   :  { %5049 = vmatpush3.bf16.msra.mxu0 %v5362_v62  ;;  %v2836_v12 = vmul.f32 %v5583_v6, %v5565_v8 }
 0xfcf   :  { %v2840_v11 = vpack.c.bf16 %v2835_v57, %v2834_v9  ;;  %5050 = vmatprep.subr.bf16.mxu0 %v6004_v42 }
 0xfd0   :  { %v5585_v39 = vpop.eup %5584 }
 0xfd1   :  { %v2837_v10 = vmul.f32 %v5585_v39, %v5569_v32  ;;  %5044 = vmatprep.mubr.msk.bf16.mxu0 %vm1290_vm1, %v2840_v11  ;;  %v5381_v39 = vld [vmem:[%s7218_s15 + $0x1cc] ss:$16 sps:$4 sm:$0xff]   ;;  %v5376_v11 = vld [vmem:[%s7218_s15 + $0x1c0] ss:$16 sps:$4 sm:$0xff]  }
 0xfd2   :  { %5051 = vmatpush3.bf16.msra.mxu0 %v5363_v61  ;;  %v5378_v61 = vld [vmem:[%s7218_s15 + $0x1c4] ss:$16 sps:$4 sm:$0xff]  }
 0xfd3   :  { %v2841_v13 = vpack.c.bf16 %v2837_v10, %v2836_v12  ;;  %5052 = vmatprep.subr.bf16.mxu0 %v6004_v42  ;;  %v5379_v12 = vld [vmem:[%s7218_s15 + $0x1c8] ss:$16 sps:$4 sm:$0xff]   ;;  %v5384_v10 = vld [vmem:[%s7218_s15 + $0x1a4] ss:$16 sps:$4 sm:$0xff]  }
 0xfd5   :  { %5045 = vmatmul.mubr.msk.bf16.gmra.mxu0 %vm1290_vm1, %v2841_v13  ;;  %v5387_v13 = vld [vmem:[%s7218_s15 + $0x1ac] ss:$16 sps:$4 sm:$0xff]  }
 0xfd6   :  { %5064 = vmatprep.mubr.msk.bf16.mxu0 %vm6006_vm0, %v6004_v42  ;;  %5053 = vmatpush3.bf16.msra.mxu0 %v5364_v14  ;;  %v5382_v14 = vld [vmem:[%s7218_s15 + $0x1a0] ss:$16 sps:$4 sm:$0xff]  }
 0xfd7   :  { %5054 = vmatprep.subr.bf16.mxu0 %v6004_v42 }
 0xfda   :  { %5055 = vmatpush3.bf16.msra.mxu0 %v5365_v15  ;;  %v5385_v15 = vld [vmem:[%s7218_s15 + $0x1a8] ss:$16 sps:$4 sm:$0xff]  }
 0xfdb   :  { %5056 = vmatprep.subr.bf16.mxu0 %v6004_v42 }
 0xfde   :  { %5057 = vmatpush3.bf16.msra.mxu0 %v5366_v16  ;;  %v5388_v16 = vld [vmem:[%s7218_s15 + $0x180] ss:$16 sps:$4 sm:$0xff]  }
 0xfdf   :  { %5058 = vmatprep.subr.bf16.mxu0 %v6004_v42 }
 0xfe2   :  { %5059 = vmatpush3.bf16.msra.mxu0 %v5367_v18  ;;  %v5390_v18 = vld [vmem:[%s7218_s15 + $0x184] ss:$16 sps:$4 sm:$0xff]  }
 0xfe3   :  { %5060 = vmatprep.subr.bf16.mxu0 %v6004_v42 }
 0xfe6   :  { %5061 = vmatpush3.bf16.msra.mxu0 %v5368_v20  ;;  %v5391_v20 = vld [vmem:[%s7218_s15 + $0x188] ss:$16 sps:$4 sm:$0xff]  }
 0xfe7   :  { %5062 = vmatprep.subr.bf16.mxu0 %v6004_v42 }
 0xfea   :  { %5063 = vmatpush3.bf16.msra.mxu0 %v5369_v19  ;;  %v5393_v19 = vld [vmem:[%s7218_s15 + $0x18c] ss:$16 sps:$4 sm:$0xff]  }
 0xfeb   :  { %3354 = vmatprep.subr.bf16.mxu0 %v5375_v5  ;;  %v5418_v5 = vld [vmem:[%s7220_s17 + $0x178] sm:$0xff]  }
0x108d   :  { %v5042_v22 = vpop.f32.mrf.mxu0 }
0x108e   :  { %v2921_v27 = vmul.f32 %v6726_v52, %v5042_v22  ;;  %v5396_v22 = vld [vmem:[%s7218_s15 + $0x164] ss:$16 sps:$4 sm:$0xff]  }
0x108f   :  { %v2888_v23 = vpop.f32.mrf.mxu0 }
0x1090   :  { %v2919_v8 = vmul.f32 %v6702_v33, %v2888_v23  ;;  %v5399_v23 = vld [vmem:[%s7218_s15 + $0x16c] ss:$16 sps:$4 sm:$0xff]  }
0x1091   :  { %v5043_v4 = vpop.f32.mrf.mxu0 }
0x1092   :  { %v2927_v38 = vadd.f32 %v2921_v27, %v2919_v8  ;;  %v2922_v40 = vmul.f32 %v6714_v47, %v5043_v4  ;;  %v5394_v4 = vld [vmem:[%s7218_s15 + $0x160] ss:$16 sps:$4 sm:$0xff]   ;;  %v5405_v8 = vld [vmem:[%s7218_s15 + $0x14c] ss:$16 sps:$4 sm:$0xff]   ;;  %v5403_v27 = vld [vmem:[%s7218_s15 + $0x148] ss:$16 sps:$4 sm:$0xff]  }
0x1093   :  { %v2891_v24 = vpop.f32.mrf.mxu0 }
0x1094   :  { %v2920_v30 = vmul.f32 %v6708_v37, %v2891_v24  ;;  %v5397_v24 = vld [vmem:[%s7218_s15 + $0x168] ss:$16 sps:$4 sm:$0xff]  }
0x1095   :  { %v5046_v25 = vpop.f32.mrf.mxu0 }
0x1096   :  { %v2928_v43 = vadd.f32 %v2922_v40, %v2920_v30  ;;  %v2925_v51 = vmul.f32 %v6745_v46, %v5046_v25  ;;  %v5402_v25 = vld [vmem:[%s7218_s15 + $0x144] ss:$16 sps:$4 sm:$0xff]  }
0x1097   :  { %v2904_v26 = vpop.f32.mrf.mxu0  ;;  %v5408_v30 = vld [vmem:[%s7218_s15 + $0x124] ss:$16 sps:$4 sm:$0xff]  }
0x1098   :  { %v2923_v32 = vmul.f32 %v6732_v54, %v2904_v26  ;;  %v4508_v54 = vld [vmem:[#allocation12 + $0x1] ss:$0 sm:$0xff]  ;;  %v5400_v26 = vld [vmem:[%s7218_s15 + $0x140] ss:$16 sps:$4 sm:$0xff]   ;;  %v5414_v40 = vld [vmem:[%s7218_s15 + $0x104] ss:$16 sps:$4 sm:$0xff]  }
0x1099   :  { %v5047_v34 = vpop.f32.mrf.mxu0 }
0x109a   :  { %v2929_v44 = vadd.f32 %v2927_v38, %v2923_v32  ;;  %v2926_v33 = vmul.f32 %v6738_v60, %v5047_v34  ;;  %v5411_v32 = vld [vmem:[%s7218_s15 + $0x12c] ss:$16 sps:$4 sm:$0xff]   ;;  %v5406_v34 = vld [vmem:[%s7218_s15 + $0x120] ss:$16 sps:$4 sm:$0xff]   ;;  %v5409_v38 = vld [vmem:[%s7218_s15 + $0x128] ss:$16 sps:$4 sm:$0xff]  }
0x109b   :  { %v2907_v41 = vpop.f32.mrf.mxu0 }
0x109c   :  { %v2924_v48 = vmul.f32 %v6720_v50, %v2907_v41  ;;  %v2931_v55 = vadd.f32 %v2929_v44, %v2925_v51  ;;  %v5417_v41 = vld [vmem:[%s7218_s15 + $0x10c] ss:$16 sps:$4 sm:$0xff]   ;;  %v5415_v44 = vld [vmem:[%s7218_s15 + $0x108] ss:$16 sps:$4 sm:$0xff]  }
0x109e   :  { %v2930_v53 = vadd.f32 %v2928_v43, %v2924_v48  ;;  %v5412_v43 = vld [vmem:[%s7218_s15 + $0x100] ss:$16 sps:$4 sm:$0xff]  }
0x10a0   :  { %v2932_v52 = vadd.f32 %v2930_v53, %v2926_v33 }
0x10a2   :  { %v2950_v58 = vpack.c.bf16 %v2932_v52, %v2931_v55 }
0x10a4   :  { %5065 = vmatmul.mubr.bf16.vlgmr.msra.gmra.mxu0 %v2950_v58 }
0x10a5   :  { %3386 = vmatprep.mubr.bf16.mxu0 %v6005_v1  ;;  %v5370_v1 = vld [vmem:[%s7218_s15 + $0x1e0] ss:$16 sps:$4 sm:$0xff]   ;;  %3355 = vmatpush1.bf16.msra.mxu0 %v5373_v3 }
0x10a6   :  { %3312 = vmatpush1.bf16.msra.mxu1 %v5370_v1  ;;  %3356 = vmatprep.subr.bf16.mxu0 %v5381_v39  ;;  %v5428_v39 = vld [vmem:[%s7220_s17 + $0x128] sm:$0xff]  }
0x10a7   :  { %3313 = vmatprep.subr.bf16.mxu1 %v5378_v61  ;;  %v5427_v61 = vld [vmem:[%s7220_s17 + $0x1e8] sm:$0xff]  }
0x10a9   :  { %3357 = vmatpush1.bf16.msra.mxu0 %v5379_v12  ;;  %v5430_v12 = vld [vmem:[%s7220_s17 + $0x160] sm:$0xff]  }
0x10aa   :  { %3314 = vmatpush1.bf16.msra.mxu1 %v5376_v11  ;;  %3358 = vmatprep.subr.bf16.mxu0 %v5387_v13  ;;  %v5429_v11 = vld [vmem:[%s7220_s17 + $0x1a8] sm:$0xff]   ;;  %v5432_v13 = vld [vmem:[%s7220_s17 + $0x120] sm:$0xff]  }
0x10ab   :  { %3315 = vmatprep.subr.bf16.mxu1 %v5384_v10  ;;  %v5431_v10 = vld [vmem:[%s7220_s17 + $0x1e0] sm:$0xff]  }
0x10ad   :  { %3359 = vmatpush1.bf16.msra.mxu0 %v5385_v15  ;;  %v5434_v15 = vld [vmem:[%s7220_s17 + $0x158] sm:$0xff]  }
0x10ae   :  { %3316 = vmatpush1.bf16.msra.mxu1 %v5382_v14  ;;  %3360 = vmatprep.subr.bf16.mxu0 %v5393_v19  ;;  %v5433_v14 = vld [vmem:[%s7220_s17 + $0x1a0] sm:$0xff]   ;;  %v5438_v19 = vld [vmem:[%s7220_s17 + $0x150] sm:$0xff]  }
0x10af   :  { %3317 = vmatprep.subr.bf16.mxu1 %v5390_v18  ;;  %v5436_v18 = vld [vmem:[%s7220_s17 + $0x118] sm:$0xff]  }
0x10b1   :  { %3361 = vmatpush1.bf16.msra.mxu0 %v5391_v20  ;;  %v5437_v20 = vld [vmem:[%s7220_s17 + $0x198] sm:$0xff]  }
0x10b2   :  { %3318 = vmatpush1.bf16.msra.mxu1 %v5388_v16  ;;  %3362 = vmatprep.subr.bf16.mxu0 %v5399_v23  ;;  %v5435_v16 = vld [vmem:[%s7220_s17 + $0x1d8] sm:$0xff]   ;;  %v5440_v23 = vld [vmem:[%s7220_s17 + $0x110] sm:$0xff]  }
0x10b3   :  { %3319 = vmatprep.subr.bf16.mxu1 %v5396_v22  ;;  %v5439_v22 = vld [vmem:[%s7220_s17 + $0x1d0] sm:$0xff]  }
0x10b5   :  { %3363 = vmatpush1.bf16.msra.mxu0 %v5397_v24  ;;  %v5442_v24 = vld [vmem:[%s7220_s17 + $0x148] sm:$0xff]  }
0x10b6   :  { %3320 = vmatpush1.bf16.msra.mxu1 %v5394_v4  ;;  %3364 = vmatprep.subr.bf16.mxu0 %v5405_v8  ;;  %v5441_v4 = vld [vmem:[%s7220_s17 + $0x190] sm:$0xff]   ;;  %v5444_v8 = vld [vmem:[%s7220_s17 + $0x108] sm:$0xff]  }
0x10b7   :  { %3321 = vmatprep.subr.bf16.mxu1 %v5402_v25  ;;  %v5443_v25 = vld [vmem:[%s7220_s17 + $0x1c8] sm:$0xff]  }
0x10b9   :  { %3365 = vmatpush1.bf16.msra.mxu0 %v5403_v27  ;;  %v5446_v27 = vld [vmem:[%s7220_s17 + $0x140] sm:$0xff]  }
0x10ba   :  { %3322 = vmatpush1.bf16.msra.mxu1 %v5400_v26  ;;  %3366 = vmatprep.subr.bf16.mxu0 %v5411_v32  ;;  %v5445_v26 = vld [vmem:[%s7220_s17 + $0x188] sm:$0xff]   ;;  %v5448_v32 = vld [vmem:[%s7220_s17 + $0x100] sm:$0xff]  }
0x10bb   :  { %3323 = vmatprep.subr.bf16.mxu1 %v5408_v30  ;;  %v5447_v30 = vld [vmem:[%s7220_s17 + $0x1c0] sm:$0xff]  }
0x10bd   :  { %3367 = vmatpush1.bf16.msra.mxu0 %v5409_v38  ;;  %v4543_v38 = vld [vmem:[%s7219_s16 + $0x4] sm:$0xf] }
0x10be   :  { %3324 = vmatpush1.bf16.msra.mxu1 %v5406_v34  ;;  %3368 = vmatprep.subr.bf16.mxu0 %v5417_v41  ;;  %v5449_v34 = vld [vmem:[%s7220_s17 + $0x180] sm:$0xff]   ;;  %v3142_v41 = vrot.slane %v4543_v38, %v6285_v35 }
0x10bf   :  { %3325 = vmatprep.subr.bf16.mxu1 %v5414_v40  ;;  %v3134_v40 = vrot.slane %v4543_v38, %v6275_v29 }
0x10c1   :  { %3369 = vmatpush1.bf16.msra.mxu0 %v5415_v44  ;;  %v3146_v44 = vrot.slane %v4543_v38, %v1680_v49 }
0x10c2   :  { %3326 = vmatpush1.bf16.msra.mxu1 %v5412_v43  ;;  %v3138_v43 = vrot.slane %v4543_v38, %v6281_v31 }
0x10c3   :  { %4877 = vmatprep.subr.bf16.mxu1 %v5418_v5 }
0x1164   :  { %v3033_v37 = vpop.f32.mrf.mxu0 }
0x1165   :  { %v3040_v47 = vadd.f32 %v3033_v37, %v6666_v17 }
0x1166   :  { %v5066_v45 = vpop.f32.mrf.mxu0 }
0x1167   :  { %v6835_v63 = vadd.f32 %v4508_v54, %v3040_v47 }
0x1168   :  { %v3036_v0 = vpop.f32.mrf.mxu0 }
0x1169   :  { %v3041_v50 = vadd.f32 %v3036_v0, %v6670_v21  ;;  %3056 = vadd.xlane.f32.xlu0 %v6835_v63 }
0x116a   :  { %v5067_v60 = vpop.f32.mrf.mxu0 }
0x116b   :  { %v6839_v46 = vadd.f32 %v4508_v54, %v3041_v50  ;;  %v4509_v54 = vld [vmem:[#allocation13 + $0x1] ss:$0 sm:$0xff]  ;;  %v4510_v50 = vld [vmem:[#allocation15 + $0x1] ss:$0 sm:$0xff] }
0x116d   :  { %3058 = vadd.xlane.f32.xlu1 %v6839_v46 }
0x11f2   :  { %v3057_v7 = vpop.xlane.xlu0 %3056 }
0x11f3   :  { %v3060_v36 = vmul.f32 0.0078125, %v3057_v7  ;;  %v5419_v7 = vld [vmem:[%s7220_s17 + $0x1f8] sm:$0xff]  }
0x11f4   :  { %4899 = vmatprep.subr.bf16.mxu0 %v5419_v7 }
0x11f5   :  { %v6855_v62 = vsub.f32 %v6835_v63, %v3060_v36  ;;  %v5420_v36 = vld [vmem:[%s7220_s17 + $0x138] sm:$0xff]  }
0x11f6   :  { %v3059_v56 = vpop.xlane.xlu1 %3058 }
0x11f7   :  { %v3061_v2 = vmul.f32 0.0078125, %v3059_v56  ;;  %v3064_v6 = vmul.f32 %v6855_v62, %v6855_v62  ;;  %v5422_v56 = vld [vmem:[%s7220_s17 + $0x170] sm:$0xff]  }
0x11f9   :  { %v6860_v9 = vsub.f32 %v6839_v46, %v3061_v2  ;;  %3066 = vadd.xlane.f32.xlu0 %v3064_v6  ;;  %v5423_v2 = vld [vmem:[%s7220_s17 + $0x1f0] sm:$0xff]  }
0x11fa   :  { %v5424_v6 = vld [vmem:[%s7220_s17 + $0x130] sm:$0xff]  }
0x11fb   :  { %v3065_v57 = vmul.f32 %v6860_v9, %v6860_v9 }
0x11fd   :  { %3068 = vadd.xlane.f32.xlu1 %v3065_v57  ;;  %v5426_v57 = vld [vmem:[%s7220_s17 + $0x168] sm:$0xff]  }
0x1282   :  { %v3067_v48 = vpop.xlane.xlu0 %3066 }
0x1283   :  { %v3070_v51 = vmul.f32 0.0078125, %v3067_v48 }
0x1285   :  { %v3072_v33 = vadd.f32 1e-05, %v3070_v51 }
0x1286   :  { %v3069_v53 = vpop.xlane.xlu1 %3068 }
0x1287   :  { %5586 = vrsqrt.f32 %v3072_v33  ;;  %v3071_v55 = vmul.f32 0.0078125, %v3069_v53 }
0x1289   :  { %v3073_v52 = vadd.f32 1e-05, %v3071_v55 }
0x128b   :  { %5588 = vrsqrt.f32 %v3073_v52 }
0x1294   :  { %v5587_v58 = vpop.eup %5586 }
0x1295   :  { %v3076_v37 = vmul.f32 %v5587_v58, %v6855_v62  ;;  %v5421_v62 = vld [vmem:[%s7220_s17 + $0x1b8] sm:$0xff]  }
0x1297   :  { %v3084_v0 = vmul.f32 %v4509_v54, %v3076_v37 }
0x1298   :  { %v5589_v47 = vpop.eup %5588 }
0x1299   :  { %v3077_v45 = vmul.f32 %v5589_v47, %v6860_v9  ;;  %v3092_v1 = vadd.f32 %v4510_v50, %v3084_v0  ;;  %v5425_v9 = vld [vmem:[%s7220_s17 + $0x1b0] sm:$0xff]  }
0x129b   :  { %v3085_v60 = vmul.f32 %v4509_v54, %v3077_v45 }
0x129d   :  { %v3093_v59 = vadd.f32 %v4510_v50, %v3085_v60 }
0x129f   :  { %v3127_v3 = vpack.c.bf16 %v3093_v59, %v3092_v1 }
0x12a1   :  { %3344 = vmatmul.mubr.bf16.vlgmr.msra.gmra.mxu1 %v3127_v3  ;;  %3387 = vmatmul.mubr.bf16.vlgmr.msra.gmra.mxu0 %v3127_v3 }
0x12a2   :  { %4878 = vmatpush3.bf16.msra.mxu1 %v5420_v36  ;;  %4900 = vmatpush3.bf16.msra.mxu0 %v5421_v62 }
0x12a3   :  { %4879 = vmatprep.subr.bf16.mxu1 %v5422_v56  ;;  %4901 = vmatprep.subr.bf16.mxu0 %v5423_v2 }
0x12a6   :  { %4880 = vmatpush3.bf16.msra.mxu1 %v5424_v6  ;;  %4902 = vmatpush3.bf16.msra.mxu0 %v5425_v9 }
0x12a7   :  { %4881 = vmatprep.subr.bf16.mxu1 %v5426_v57  ;;  %4903 = vmatprep.subr.bf16.mxu0 %v5427_v61 }
0x12aa   :  { %4882 = vmatpush3.bf16.msra.mxu1 %v5428_v39  ;;  %4904 = vmatpush3.bf16.msra.mxu0 %v5429_v11 }
0x12ab   :  { %4883 = vmatprep.subr.bf16.mxu1 %v5430_v12  ;;  %4905 = vmatprep.subr.bf16.mxu0 %v5431_v10 }
0x12ae   :  { %4884 = vmatpush3.bf16.msra.mxu1 %v5432_v13  ;;  %4906 = vmatpush3.bf16.msra.mxu0 %v5433_v14 }
0x12af   :  { %4885 = vmatprep.subr.bf16.mxu1 %v5434_v15  ;;  %4907 = vmatprep.subr.bf16.mxu0 %v5435_v16 }
0x12b2   :  { %4886 = vmatpush3.bf16.msra.mxu1 %v5436_v18  ;;  %4908 = vmatpush3.bf16.msra.mxu0 %v5437_v20 }
0x12b3   :  { %4887 = vmatprep.subr.bf16.mxu1 %v5438_v19  ;;  %4909 = vmatprep.subr.bf16.mxu0 %v5439_v22 }
0x12b6   :  { %4888 = vmatpush3.bf16.msra.mxu1 %v5440_v23  ;;  %4910 = vmatpush3.bf16.msra.mxu0 %v5441_v4 }
0x12b7   :  { %4889 = vmatprep.subr.bf16.mxu1 %v5442_v24  ;;  %4911 = vmatprep.subr.bf16.mxu0 %v5443_v25 }
0x12ba   :  { %4890 = vmatpush3.bf16.msra.mxu1 %v5444_v8  ;;  %4912 = vmatpush3.bf16.msra.mxu0 %v5445_v26 }
0x12bb   :  { %4891 = vmatprep.subr.bf16.mxu1 %v5446_v27  ;;  %4913 = vmatprep.subr.bf16.mxu0 %v5447_v30 }
0x12be   :  { %4892 = vmatpush3.bf16.msra.mxu1 %v5448_v32  ;;  %4914 = vmatpush3.bf16.msra.mxu0 %v5449_v34 }
0x12bf   :  { %5068 = vmatprep.subr.bf16.mxu1 %v6004_v42  ;;  %5088 = vmatprep.subr.bf16.mxu0 %v6004_v42 }
0x1361   :  { %v3345_v48 = vpop.f32.mrf.mxu1  ;;  %v3388_v51 = vpop.f32.mrf.mxu0 }
0x1362   :  { %v7056_v33 = vadd.f32 %v3345_v48, %v3134_v40  ;;  %v7058_v53 = vadd.f32 %v3388_v51, %v3142_v41 }
0x1363   :  { %v3347_v55 = vpop.f32.mrf.mxu1  ;;  %v3390_v52 = vpop.f32.mrf.mxu0 }
0x1364   :  { %v4576_v58 = vmul.f32 -1.702, %v7056_v33  ;;  %v4578_v37 = vmul.f32 -1.702, %v7058_v53  ;;  %v7062_v29 = vadd.f32 %v3347_v55, %v3138_v43  ;;  %v7064_v35 = vadd.f32 %v3390_v52, %v3146_v44 }
0x1365   :  { %v3349_v31 = vpop.f32.mrf.mxu1  ;;  %v3392_v54 = vpop.f32.mrf.mxu0 }
0x1366   :  { %v3413_v28 = vmul.f32 1.442695, %v4576_v58  ;;  %v3417_v49 = vmul.f32 1.442695, %v4578_v37  ;;  %v4577_v47 = vmul.f32 -1.702, %v7062_v29  ;;  %v3350_v45 = vadd.f32 %v3349_v31, %v3134_v40 }
0x1367   :  { %v4579_v0 = vmul.f32 -1.702, %v7064_v35  ;;  %v3393_v50 = vadd.f32 %v3392_v54, %v3142_v41  ;;  %v3351_v60 = vpop.f32.mrf.mxu1  ;;  %v3394_v1 = vpop.f32.mrf.mxu0 }
0x1368   :  { %5590 = vpow2.f32 %v3413_v28  ;;  %v3415_v59 = vmul.f32 1.442695, %v4577_v47  ;;  %v4580_v3 = vmul.f32 -1.702, %v3350_v45  ;;  %v3352_v5 = vadd.f32 %v3351_v60, %v3138_v43 }
0x1369   :  { %5592 = vpow2.f32 %v3417_v49  ;;  %v3419_v7 = vmul.f32 1.442695, %v4579_v0  ;;  %v4582_v36 = vmul.f32 -1.702, %v3393_v50  ;;  %v3395_v62 = vadd.f32 %v3394_v1, %v3146_v44 }
0x136a   :  { %5594 = vpow2.f32 %v3415_v59  ;;  %v3421_v56 = vmul.f32 1.442695, %v4580_v3  ;;  %v4581_v2 = vmul.f32 -1.702, %v3352_v5 }
0x136b   :  { %5596 = vpow2.f32 %v3419_v7  ;;  %v3425_v6 = vmul.f32 1.442695, %v4582_v36  ;;  %v4583_v9 = vmul.f32 -1.702, %v3395_v62 }
0x136c   :  { %5598 = vpow2.f32 %v3421_v56  ;;  %v3423_v57 = vmul.f32 1.442695, %v4581_v2 }
0x136d   :  { %5600 = vpow2.f32 %v3425_v6  ;;  %v3427_v61 = vmul.f32 1.442695, %v4583_v9 }
0x136e   :  { %5602 = vpow2.f32 %v3423_v57 }
0x136f   :  { %5604 = vpow2.f32 %v3427_v61  ;;  %v5450_v61 = vld [vmem:[%s7224_s21 + $0x38] sm:$0xff]  }
0x1375   :  { %v5591_v39 = vpop.eup %5590 }
0x1376   :  { %v5593_v11 = vpop.eup %5592  ;;  %v3429_v12 = vadd.f32 1.0, %v5591_v39 }
0x1377   :  { %v5595_v10 = vpop.eup %5594  ;;  %v3431_v13 = vadd.f32 1.0, %v5593_v11 }
0x1378   :  { %v5597_v14 = vpop.eup %5596  ;;  %5606 = vrcp.f32 %v3429_v12  ;;  %v3430_v15 = vadd.f32 1.0, %v5595_v10 }
0x1379   :  { %v5599_v16 = vpop.eup %5598  ;;  %5608 = vrcp.f32 %v3431_v13  ;;  %v3432_v18 = vadd.f32 1.0, %v5597_v14  ;;  %v5452_v13 = vld [vmem:[%s7224_s21 + $0x28] sm:$0xff]   ;;  %v5453_v14 = vld [vmem:[%s7224_s21 + $0x20] sm:$0xff]  }
0x137a   :  { %v5601_v20 = vpop.eup %5600  ;;  %5610 = vrcp.f32 %v3430_v15  ;;  %v3433_v19 = vadd.f32 1.0, %v5599_v16  ;;  %v5454_v15 = vld [vmem:[%s7224_s21 + $0x18] sm:$0xff]   ;;  %v5455_v16 = vld [vmem:[%s7224_s21 + $0x10] sm:$0xff]  }
0x137b   :  { %v5603_v22 = vpop.eup %5602  ;;  %5612 = vrcp.f32 %v3432_v18  ;;  %v3435_v23 = vadd.f32 1.0, %v5601_v20  ;;  %v5456_v18 = vld [vmem:[%s7224_s21 + $0x8] sm:$0xff]   ;;  %v5457_v20 = vld [vmem:[%s7224_s21] sm:$0xff]  }
0x137c   :  { %v5605_v4 = vpop.eup %5604  ;;  %5614 = vrcp.f32 %v3433_v19  ;;  %v3434_v24 = vadd.f32 1.0, %v5603_v22  ;;  %v5458_v19 = vld [vmem:[%s7229_s26 + $0x38] sm:$0xff]   ;;  %v5459_v22 = vld [vmem:[%s7229_s26 + $0x30] sm:$0xff]  }
0x137d   :  { %5616 = vrcp.f32 %v3435_v23  ;;  %v3436_v25 = vadd.f32 1.0, %v5605_v4  ;;  %v5460_v23 = vld [vmem:[%s7229_s26 + $0x28] sm:$0xff]   ;;  %v5461_v4 = vld [vmem:[%s7229_s26 + $0x20] sm:$0xff]  }
0x137e   :  { %5618 = vrcp.f32 %v3434_v24  ;;  %v5462_v24 = vld [vmem:[%s7229_s26 + $0x18] sm:$0xff]  }
0x137f   :  { %5620 = vrcp.f32 %v3436_v25  ;;  %v5463_v25 = vld [vmem:[%s7229_s26 + $0x10] sm:$0xff]  }
0x1385   :  { %v5607_v8 = vpop.eup %5606 }
0x1386   :  { %v5609_v26 = vpop.eup %5608  ;;  %v3453_v51 = vmul.f32 %v5607_v8, %v7056_v33  ;;  %v5464_v8 = vld [vmem:[%s7229_s26 + $0x8] sm:$0xff]  }
0x1387   :  { %v5611_v27 = vpop.eup %5610  ;;  %v3455_v58 = vmul.f32 %v5609_v26, %v7058_v53  ;;  %v5465_v26 = vld [vmem:[%s7229_s26] sm:$0xff]  }
0x1388   :  { %v5613_v30 = vpop.eup %5612  ;;  %v3454_v43 = vmul.f32 %v5611_v27, %v7062_v29 }
0x1389   :  { %v5615_v32 = vpop.eup %5614  ;;  %v3456_v55 = vmul.f32 %v5613_v30, %v7064_v35 }
0x138a   :  { %v5617_v34 = vpop.eup %5616  ;;  %v3457_v40 = vmul.f32 %v5615_v32, %v3350_v45 }
0x138b   :  { %v5619_v38 = vpop.eup %5618  ;;  %v3459_v44 = vmul.f32 %v5617_v34, %v3393_v50 }
0x138c   :  { %v5621_v41 = vpop.eup %5620  ;;  %v3458_v48 = vmul.f32 %v5619_v38, %v3352_v5  ;;  %v3526_v31 = vpack.c.bf16 %v3457_v40, %v3453_v51  ;;  %v4681_v38 = vld [vmem:[#allocation18] ss:$0 sm:$0xff] }
0x138d   :  { %v3460_v52 = vmul.f32 %v5621_v41, %v3395_v62  ;;  %v3528_v28 = vpack.c.bf16 %v3459_v44, %v3455_v58  ;;  %v4680_v62 = vld [vmem:[#allocation16 + $0x1] ss:$0 sm:$0xff]  ;;  %v4682_v41 = vld [vmem:[#allocation19] ss:$0 sm:$0xff] }
0x138e   :  { %v3527_v37 = vpack.c.bf16 %v3458_v48, %v3454_v43 }
0x138f   :  { %v3529_v54 = vpack.c.bf16 %v3460_v52, %v3456_v55 }
0x1390   :  { %3754 = vmatprep.mubr.bf16.mxu1 %v3527_v37 }
0x1391   :  { %3795 = vmatprep.mubr.bf16.mxu0 %v3529_v54  ;;  %3755 = vmatmul.mubr.bf16.vlgmr.msra.gmra.mxu1 %v3526_v31 }
0x1392   :  { %3796 = vmatmul.mubr.bf16.vlgmr.msra.gmra.mxu0 %v3528_v28  ;;  %5084 = vmatprep.mubr.msk.bf16.mxu1 %vm6006_vm0, %v6004_v42 }
0x1393   :  { %5104 = vmatprep.mubr.msk.bf16.mxu0 %vm6006_vm0, %v6004_v42  ;;  %5069 = vmatpush3.bf16.msra.mxu1 %v5450_v61  ;;  %v5470_v61 = vld [vmem:[%s7230_s27 + $0x18] sm:$0xff]  }
0x1394   :  { %5070 = vmatprep.subr.bf16.mxu1 %v6004_v42  ;;  %5089 = vmatpush3.bf16.msra.mxu0 %v5458_v19 }
0x1395   :  { %5090 = vmatprep.subr.bf16.mxu0 %v6004_v42 }
0x1398   :  { %5091 = vmatpush3.bf16.msra.mxu0 %v5459_v22 }
0x1399   :  { %5092 = vmatprep.subr.bf16.mxu0 %v6004_v42 }
0x139c   :  { %5093 = vmatpush3.bf16.msra.mxu0 %v5460_v23 }
0x139d   :  { %5094 = vmatprep.subr.bf16.mxu0 %v6004_v42 }
0x13a0   :  { %5095 = vmatpush3.bf16.msra.mxu0 %v5461_v4 }
0x13a1   :  { %5096 = vmatprep.subr.bf16.mxu0 %v6004_v42 }
0x13a4   :  { %5097 = vmatpush3.bf16.msra.mxu0 %v5462_v24 }
0x13a5   :  { %5098 = vmatprep.subr.bf16.mxu0 %v6004_v42 }
0x13a8   :  { %5099 = vmatpush3.bf16.msra.mxu0 %v5463_v25 }
0x13a9   :  { %5100 = vmatprep.subr.bf16.mxu0 %v6004_v42 }
0x13ac   :  { %5101 = vmatpush3.bf16.msra.mxu0 %v5464_v8 }
0x13ad   :  { %5102 = vmatprep.subr.bf16.mxu0 %v6004_v42 }
0x13b0   :  { %5103 = vmatpush3.bf16.msra.mxu0 %v5465_v26 }
0x1451   :  { %v4893_v33 = vpop.f32.mrf.mxu1 }
0x1452   :  { %v4915_v29 = vpop.f32.mrf.mxu0 }
0x1453   :  { %v4894_v35 = vpop.f32.mrf.mxu1 }
0x1454   :  { %v4916_v49 = vpop.f32.mrf.mxu0  ;;  %v4895_v47 = vadd.f32 %v4894_v35, %v4893_v33 }
0x1455   :  { %v4917_v53 = vadd.f32 %v4916_v49, %v4915_v29  ;;  %v4896_v45 = vpop.f32.mrf.mxu1 }
0x1456   :  { %v4918_v0 = vpop.f32.mrf.mxu0 }
0x1457   :  { %v4897_v50 = vpop.f32.mrf.mxu1  ;;  %v3798_v59 = vadd.f32 %v4917_v53, %v4895_v47 }
0x1458   :  { %v4898_v60 = vadd.f32 %v4897_v50, %v4896_v45  ;;  %v4919_v1 = vpop.f32.mrf.mxu0 }
0x1459   :  { %v4920_v3 = vadd.f32 %v4919_v1, %v4918_v0  ;;  %v3804_v7 = vadd.f32 %v3798_v59, %v6835_v63  ;;  %v5451_v63 = vld [vmem:[%s7224_s21 + $0x30] sm:$0xff]  }
0x145a   :  { %5071 = vmatpush3.bf16.msra.mxu1 %v5451_v63  ;;  %v5471_v63 = vld [vmem:[%s7230_s27 + $0x10] sm:$0xff]  }
0x145b   :  { %v3801_v5 = vadd.f32 %v4920_v3, %v4898_v60  ;;  %v3814_v2 = vadd.f32 %v4680_v62, %v3804_v7  ;;  %5072 = vmatprep.subr.bf16.mxu1 %v6004_v42  ;;  %v4691_v3 = vld [vmem:[#allocation21] ss:$0 sm:$0xff]  ;;  %v4692_v7 = vld [vmem:[#allocation22] ss:$0 sm:$0xff] }
0x145d   :  { %v3805_v36 = vadd.f32 %v3801_v5, %v6839_v46 }
0x145e   :  { %5073 = vmatpush3.bf16.msra.mxu1 %v5452_v13 }
0x145f   :  { %v3815_v56 = vadd.f32 %v4680_v62, %v3805_v36  ;;  %5074 = vmatprep.subr.bf16.mxu1 %v6004_v42 }
0x1461   :  { %v3822_v6 = vrot.slane %v3815_v56, 7 }
0x1462   :  { %5075 = vmatpush3.bf16.msra.mxu1 %v5453_v14 }
0x1463   :  { %v3824_v9 = vsel %vm3819_vm3, %v3814_v2, %v3822_v6  ;;  %5076 = vmatprep.subr.bf16.mxu1 %v6004_v42  ;;  %v5466_v2 = vld [vmem:[%s7230_s27 + $0x38] sm:$0xff]   ;;  %v5467_v6 = vld [vmem:[%s7230_s27 + $0x30] sm:$0xff]  }
0x1464   :  { %v3828_v57 = vsel %vm3827_vm2, %v3824_v9, 0.0 }
0x1465   :  { %3829 = vadd.xlane.f32.xlu0 %v3828_v57  ;;  %v5469_v57 = vld [vmem:[%s7230_s27 + $0x20] sm:$0xff]  }
0x1466   :  { %5077 = vmatpush3.bf16.msra.mxu1 %v5454_v15 }
0x1467   :  { %5078 = vmatprep.subr.bf16.mxu1 %v6004_v42 }
0x146a   :  { %5079 = vmatpush3.bf16.msra.mxu1 %v5455_v16 }
0x146b   :  { %5080 = vmatprep.subr.bf16.mxu1 %v6004_v42 }
0x146e   :  { %5081 = vmatpush3.bf16.msra.mxu1 %v5456_v18 }
0x146f   :  { %5082 = vmatprep.subr.bf16.mxu1 %v6004_v42 }
0x1472   :  { %5083 = vmatpush3.bf16.msra.mxu1 %v5457_v20 }
0x1473   :  { %5108 = vmatprep.subr.bf16.mxu1 %v6004_v42 }
0x14ee   :  { %v3830_v46 = vpop.xlane.xlu0 %3829 }
0x14ef   :  { %v3831_v39 = vmul.f32 0.0078125, %v3830_v46  ;;  %v5472_v46 = vld [vmem:[%s7230_s27 + $0x8] sm:$0xff]  }
0x14f1   :  { %v3832_v11 = vsub.f32 %v3824_v9, %v3831_v39  ;;  %v5468_v9 = vld [vmem:[%s7230_s27 + $0x28] sm:$0xff]   ;;  %v5473_v39 = vld [vmem:[%s7230_s27] sm:$0xff]  }
0x14f3   :  { %v3833_v12 = vmul.f32 %v3832_v11, %v3832_v11 }
0x14f5   :  { %v3834_v10 = vsel %vm3827_vm2, %v3833_v12, 0.0 }
0x14f6   :  { %3835 = vadd.xlane.f32.xlu1 %v3834_v10 }
0x157f   :  { %v3836_v27 = vpop.xlane.xlu1 %3835 }
0x1580   :  { %v3837_v30 = vmul.f32 0.0078125, %v3836_v27 }
0x1582   :  { %v3838_v32 = vadd.f32 1e-05, %v3837_v30 }
0x1584   :  { %5622 = vrsqrt.f32 %v3838_v32 }
0x1591   :  { %v5623_v34 = vpop.eup %5622 }
0x1592   :  { %v3840_v40 = vmul.f32 %v5623_v34, %v3832_v11  ;;  %v3817_v11 = vrot.slane %v6670_v21, 7 }
0x1594   :  { %v3847_v43 = vmul.f32 %v4681_v38, %v3840_v40  ;;  %v3820_v13 = vsel %vm3819_vm3, %v6666_v17, %v3817_v11 }
0x1596   :  { %v7144_v44 = vadd.f32 %v4682_v41, %v3847_v43 }
0x1598   :  { %v3871_v48 = vpack.c.bf16 %v7144_v44, %v7144_v44  ;;  %v3962_v51 = vsel %vm3827_vm2, %v7144_v44, 0.0  ;;  %v4246_v12 = vrot.slane %v7144_v44, 6 }
0x1599   :  { %v3963_v55 = vrot.slane %v3962_v51, 4 }
0x159a   :  { %5085 = vmatmul.mubr.bf16.vlgmr.msra.gmra.mxu1 %v3871_v48  ;;  %v4260_v20 = vsel %vm3827_vm2, %v3820_v13, %v4246_v12 }
0x159b   :  { %v3964_v52 = vadd.f32 %v3963_v55, %v3962_v51  ;;  %5124 = vmatprep.mubr.msk.bf16.mxu1 %vm6006_vm0, %v6004_v42  ;;  %5109 = vmatpush3.bf16.msra.mxu1 %v5466_v2 }
0x159c   :  { %5110 = vmatprep.subr.bf16.mxu1 %v6004_v42 }
0x159d   :  { %v3965_v58 = vrot.slane %v3964_v52, 2 }
0x159f   :  { %v3966_v37 = vadd.f32 %v3965_v58, %v3964_v52  ;;  %5111 = vmatpush3.bf16.msra.mxu1 %v5467_v6  ;;  %v4693_v52 = vld [vmem:[#allocation24] ss:$0 sm:$0xff] }
0x15a0   :  { %5112 = vmatprep.subr.bf16.mxu1 %v6004_v42 }
0x15a1   :  { %v3967_v31 = vrot.slane %v3966_v37, 1 }
0x15a3   :  { %v3968_v54 = vadd.f32 %v3967_v31, %v3966_v37  ;;  %5113 = vmatpush3.bf16.msra.mxu1 %v5468_v9  ;;  %v4694_v37 = vld [vmem:[#allocation25] ss:$0 sm:$0xff] }
0x15a4   :  { %5114 = vmatprep.subr.bf16.mxu1 %v6004_v42 }
0x15a5   :  { %v3970_v28 = vmul.f32 0.5, %v3968_v54 }
0x15a7   :  { %v3971_v33 = vsub.f32 %v7144_v44, %v3970_v28  ;;  %5115 = vmatpush3.bf16.msra.mxu1 %v5469_v57 }
0x15a8   :  { %5116 = vmatprep.subr.bf16.mxu1 %v6004_v42 }
0x15a9   :  { %v3972_v29 = vmul.f32 %v3971_v33, %v3971_v33 }
0x15ab   :  { %v3973_v35 = vsel %vm3827_vm2, %v3972_v29, 0.0  ;;  %5117 = vmatpush3.bf16.msra.mxu1 %v5470_v61 }
0x15ac   :  { %v3974_v49 = vrot.slane %v3973_v35, 4  ;;  %5118 = vmatprep.subr.bf16.mxu1 %v6004_v42 }
0x15ae   :  { %v3975_v47 = vadd.f32 %v3974_v49, %v3973_v35 }
0x15af   :  { %5119 = vmatpush3.bf16.msra.mxu1 %v5471_v63 }
0x15b0   :  { %v3976_v53 = vrot.slane %v3975_v47, 2  ;;  %5120 = vmatprep.subr.bf16.mxu1 %v6004_v42 }
0x15b2   :  { %v3977_v45 = vadd.f32 %v3976_v53, %v3975_v47 }
0x15b3   :  { %5121 = vmatpush3.bf16.msra.mxu1 %v5472_v46 }
0x15b4   :  { %v3978_v0 = vrot.slane %v3977_v45, 1  ;;  %5122 = vmatprep.subr.bf16.mxu1 %v6004_v42 }
0x15b6   :  { %v3979_v50 = vadd.f32 %v3978_v0, %v3977_v45 }
0x15b7   :  { %5123 = vmatpush3.bf16.msra.mxu1 %v5473_v39 }
0x15b8   :  { %v3980_v60 = vmul.f32 0.5, %v3979_v50 }
0x15ba   :  { %v3981_v1 = vadd.f32 1e-05, %v3980_v60 }
0x15bc   :  { %5624 = vrsqrt.f32 %v3981_v1 }
0x15c9   :  { %v5625_v59 = vpop.eup %5624 }
0x15ca   :  { %v3983_v5 = vmul.f32 %v5625_v59, %v3971_v33 }
0x15cc   :  { %v3990_v36 = vmul.f32 %v4691_v3, %v3983_v5 }
0x15ce   :  { %v3997_v62 = vadd.f32 %v4692_v7, %v3990_v36 }
0x15d0   :  { %v4051_v56 = vpack.c.bf16 %v3997_v62, %v3997_v62  ;;  %v4252_v16 = vrot.slane %v3997_v62, 2 }
0x15d2   :  { %5105 = vmatmul.mubr.bf16.vlgmr.msra.gmra.mxu0 %v4051_v56 }
0x165a   :  { %v3954_v10 = vpop.f32.mrf.mxu1 }
0x165b   :  { %v4000_v14 = vsel %vm3827_vm2, %v3954_v10, 0.0  ;;  %v4249_v15 = vrot.slane %v3954_v10, 4 }
0x165c   :  { %v4001_v42 = vrot.slane %v4000_v14, 4  ;;  %v5086_v18 = vpop.f32.mrf.mxu1 }
0x165d   :  { %v4262_v19 = vsel %vm4261_vm4, %v4260_v20, %v4249_v15 }
0x165e   :  { %v4002_v22 = vadd.f32 %v4001_v42, %v4000_v14  ;;  %v3957_v21 = vpop.f32.mrf.mxu1  ;;  %v4264_v23 = vsel %vm4263_vm5, %v4262_v19, %v4252_v16 }
0x165f   :  { %4268 = vst [vmem:[%s7266_s12] sm:$0xff] %v4264_v23 }
0x1660   :  { %v4003_v17 = vrot.slane %v4002_v22, 2  ;;  %v5087_v4 = vpop.f32.mrf.mxu1 }
0x1662   :  { %v4004_v24 = vadd.f32 %v4003_v17, %v4002_v22 }
0x1664   :  { %v4005_v25 = vrot.slane %v4004_v24, 1 }
0x1666   :  { %v4006_v8 = vadd.f32 %v4005_v25, %v4004_v24 }
0x1668   :  { %v4007_v26 = vmul.f32 0.5, %v4006_v8 }
0x166a   :  { %v4008_v27 = vsub.f32 %v3954_v10, %v4007_v26 }
0x166c   :  { %v4009_v30 = vmul.f32 %v4008_v27, %v4008_v27 }
0x166e   :  { %v4010_v32 = vsel %vm3827_vm2, %v4009_v30, 0.0 }
0x166f   :  { %v4011_v34 = vrot.slane %v4010_v32, 4 }
0x1671   :  { %v4012_v38 = vadd.f32 %v4011_v34, %v4010_v32 }
0x1673   :  { %v4013_v40 = vrot.slane %v4012_v38, 2 }
0x1675   :  { %v4014_v41 = vadd.f32 %v4013_v40, %v4012_v38 }
0x1677   :  { %v4015_v43 = vrot.slane %v4014_v41, 1 }
0x1679   :  { %v4016_v44 = vadd.f32 %v4015_v43, %v4014_v41 }
0x167b   :  { %v4017_v48 = vmul.f32 0.5, %v4016_v44 }
0x167d   :  { %v4018_v51 = vadd.f32 1e-05, %v4017_v48 }
0x167f   :  { %5626 = vrsqrt.f32 %v4018_v51 }
0x168c   :  { %v5627_v55 = vpop.eup %5626 }
0x168d   :  { %v4020_v58 = vmul.f32 %v5627_v55, %v4008_v27 }
0x168f   :  { %v4027_v31 = vmul.f32 %v4693_v52, %v4020_v58 }
0x1691   :  { %v4034_v54 = vadd.f32 %v4694_v37, %v4027_v31 }
0x1692   :  { %v4134_v28 = vpop.f32.mrf.mxu0 }
0x1693   :  { %v4255_v33 = vrot.slane %v4134_v28, 6  ;;  %v4156_v29 = vpack.c.bf16 %v4034_v54, %v4034_v54 }
0x1694   :  { %v5106_v35 = vpop.f32.mrf.mxu0 }
0x1695   :  { %v4265_v49 = vsel %vm3827_vm2, %v4034_v54, %v4255_v33  ;;  %5125 = vmatmul.mubr.bf16.vlgmr.msra.gmra.mxu1 %v4156_v29 }
0x1696   :  { %v4137_v47 = vpop.f32.mrf.mxu0 }
0x1698   :  { %v5107_v53 = vpop.f32.mrf.mxu0 }
0x1755   :  { %v4239_v45 = vpop.f32.mrf.mxu1 }
0x1756   :  { %v4258_v0 = vrot.slane %v4239_v45, 4 }
0x1757   :  { %v5126_v50 = vpop.f32.mrf.mxu1 }
0x1758   :  { %v4266_v60 = vsel %vm4261_vm4, %v4265_v49, %v4258_v0 }
0x1759   :  { %v4267_v1 = vsel %vm4263_vm5, %v4266_v60, 0.0  ;;  %v4242_v59 = vpop.f32.mrf.mxu1 }
0x175a   :  { %4269 = vst [vmem:[%s7266_s12 + $0x8] sm:$0xff] %v4267_v1 }
0x175b   :  { %v5127_v3 = vpop.f32.mrf.mxu1 }
0x175c   :  { %4274 = vsyncpa [#allocation3], 1 }
0x175d   :  { %4275 = vsyncpa [#allocation5], 1 }
0x175e   :  { %4276 = vsyncpa [#allocation8], 1 }
0x175f   :  { %4277 = vsyncpa [#allocation11], 1 }
0x1760   :  { %4278 = vsyncpa [#allocation14], 1 }
0x1761   :  { %4279 = vsyncpa [#allocation17], 1 }
0x1762   :  { %4280 = vsyncpa [#allocation20], 1 }
0x1763   :  { %4281 = vsyncpa [#allocation23], 1 }
0x1764   :  { %4282 = vsyncpa [#allocation26], 1 }

</bundles_post_ra>
